<compile_context>
chip_gen: v6e
topology: v6e:2x2x1
jax: 0.10.0
libtpu: 0.0.40
codegen_flags: <defaults>
</compile_context>

<pallas_src>
import functools

import jax
import jax.numpy as jnp
from jax.experimental import pallas as pl
from jax.experimental.pallas import tpu as pltpu

# Scoped-VMEM budget: far above what these tiles need and safely below the
# 64 MiB physical VMEM of v7x (128 MiB on v5e/v6e).  Tile caps tm/tn<=256,
# tk<=512 keep double-buffered blocks at ~1-2 MiB.
_VMEM_LIMIT_BYTES = 32 * 1024 * 1024


def _round_up(x, m):
    return (x + m - 1) // m * m


# ----------------------------------------------------------------------------
# Kernel 1: tiled matmul with fused bias / ReLU / InstanceNorm epilogue
# ----------------------------------------------------------------------------
def _mm_kernel(x_ref, w_ref, b_ref, o_ref, acc_ref, *, relu, instnorm, eps):
    k = pl.program_id(2)

    @pl.when(k == 0)
    def _init():
        acc_ref[...] = jnp.zeros_like(acc_ref)

    acc_ref[...] += jnp.dot(x_ref[...], w_ref[...],
                            preferred_element_type=jnp.float32)

    @pl.when(k == pl.num_programs(2) - 1)
    def _finalize():
        acc = acc_ref[...] + b_ref[...]            # bias only at the last K step
        if instnorm:
            # InstanceNorm2d(affine=False), biased variance (PyTorch semantics).
            # The M tile is exactly one sample's H*W rows; columns = channels.
            mean = jnp.mean(acc, axis=0, keepdims=True)
            cen = acc - mean
            var = jnp.mean(cen * cen, axis=0, keepdims=True)
            acc = cen * jax.lax.rsqrt(var + eps)
        if relu:
            acc = jnp.maximum(acc, 0.0)
        o_ref[...] = acc.astype(o_ref.dtype)


def matmul_bias_act(x, w, b, *, relu=False, instnorm=False, eps=1e-5, tm=None,
                    keep_padded_n=False, out_dtype=jnp.float32,
                    tm_cap=256, tn_cap=256, tk_cap=512):
    """act(x @ w + b); x:(M,K) w:(K,N) b:(N,).

    Inputs are cast to bf16 (MXU-friendly); accumulator + epilogue are f32.
    M/K/N are zero-padded to the tile grid; with keep_padded_n the lane-dense
    padded N columns (exact zeros after the epilogue) are kept so the next
    layer stays 128-aligned.
    """
    M, K = x.shape
    Kw, N = w.shape
    assert Kw == K
    if tm is None:
        tm = min(_round_up(M, 8), tm_cap)
    tn = min(_round_up(N, 128), tn_cap)
    tk = min(_round_up(K, 128), tk_cap)
    Mp, Kp, Np = _round_up(M, tm), _round_up(K, tk), _round_up(N, tn)
    if instnorm:
        # Each M tile must cover exactly one instance's spatial rows.
        assert Mp == M and M % tm == 0 and tm % 8 == 0

    xp = jnp.pad(x, ((0, Mp - M), (0, Kp - K))).astype(jnp.bfloat16)
    wp = jnp.pad(w, ((0, Kp - K), (0, Np - N))).astype(jnp.bfloat16)
    bp = jnp.pad(b.astype(jnp.float32), (0, Np - N)).reshape(1, Np)

    grid = (Mp // tm, Np // tn, Kp // tk)
    y = pl.pallas_call(
        functools.partial(_mm_kernel, relu=relu, instnorm=instnorm, eps=eps),
        out_shape=jax.ShapeDtypeStruct((Mp, Np), out_dtype),
        grid=grid,
        in_specs=[
            pl.BlockSpec((tm, tk), lambda i, j, k: (i, k)),
            pl.BlockSpec((tk, tn), lambda i, j, k: (k, j)),
            pl.BlockSpec((1, tn), lambda i, j, k: (0, j)),   # bias resident over K
        ],
        out_specs=pl.BlockSpec((tm, tn), lambda i, j, k: (i, j)),
        scratch_shapes=[pltpu.VMEM((tm, tn), jnp.float32)],
        compiler_params=pltpu.CompilerParams(
            dimension_semantics=("parallel", "parallel", "arbitrary"),
            vmem_limit_bytes=_VMEM_LIMIT_BYTES),
    )(xp, wp, bp)
    if Mp != M:
        y = y[:M]
    if not keep_padded_n:
        y = y[:, :N]
    return y


# ----------------------------------------------------------------------------
# Kernel 2: stride-1 conv with in-kernel im2col (tap loop over VMEM windows)
# ----------------------------------------------------------------------------
def _conv_s1_kernel(x_ref, w_ref, b_ref, o_ref, acc_ref, *, ksize, w_padded, relu):
    # x_ref : (S_in, Cp)     flattened, spatially padded sample (bf16)
    # w_ref : (k*k, Cp, tn)  per-tap weight slabs (bf16)
    # b_ref : (1, tn)        f32 bias
    # o_ref : (S_out, tn)    S_out = Ho * Wp (garbage columns cropped outside)
    acc_ref[...] = jnp.zeros_like(acc_ref)
    s_out = acc_ref.shape[0]
    for di in range(ksize):
        for dj in range(ksize):
            win = x_ref[pl.ds(di * w_padded + dj, s_out), :]
            acc_ref[...] += jnp.dot(win, w_ref[di * ksize + dj],
                                    preferred_element_type=jnp.float32)
    out = acc_ref[...] + b_ref[...]
    if relu:
        out = jnp.maximum(out, 0.0)
    o_ref[...] = out.astype(o_ref.dtype)


def conv2d_s1_relu(x_nhwc, w, b, *, pad=1, out_dtype=jnp.bfloat16):
    """Stride-1 Conv2d + bias + ReLU with the im2col done *inside* the kernel.

    x_nhwc: (B, H, W, Cp) channels-last, Cp lane-dense (>= Cin, zero padded).
    w: (Cout, Cin, k, k) PyTorch layout.  Returns (B, Ho, Wo, Np) with
    Np = round_up(Cout, 128); padded output channels are exact zeros.

    Trick: with row stride Wp (padded width) the tap (di, dj) window of every
    output position is one contiguous slice of the flattened sample at offset
    di*Wp + dj, so each tap is a single (Ho*Wp, Cp) x (Cp, tn) matmul.
    Columns Wo..Wp-1 of each output row are garbage and cropped afterwards.
    """
    B, H, W, Cp = x_nhwc.shape
    Cout, Cin, k, _ = w.shape
    assert Cin <= Cp
    Ho, Wo = H + 2 * pad - k + 1, W + 2 * pad - k + 1
    Wp = W + 2 * pad
    S_out = Ho * Wp
    # The last valid window reads k-1 flat elements past Hp*Wp; add zero rows.
    extra_rows = -(-(k - 1) // Wp) if k > 1 else 0
    xp = jnp.pad(x_nhwc, ((0, 0), (pad, pad + extra_rows), (pad, pad), (0, 0)))
    S_in = (H + 2 * pad + extra_rows) * Wp
    xflat = xp.reshape(B, S_in, Cp).astype(jnp.bfloat16)

    Np = _round_up(Cout, 128)
    wt = jnp.transpose(w, (2, 3, 1, 0))                        # (k, k, Cin, Cout)
    wt = jnp.pad(wt, ((0, 0), (0, 0), (0, Cp - Cin), (0, Np - Cout)))
    wt = wt.reshape(k * k, Cp, Np).astype(jnp.bfloat16)
    bp = jnp.pad(b.astype(jnp.float32), (0, Np - Cout)).reshape(1, Np)

    tn = 256 if Np % 256 == 0 else 128
    y = pl.pallas_call(
        functools.partial(_conv_s1_kernel, ksize=k, w_padded=Wp, relu=True),
        out_shape=jax.ShapeDtypeStruct((B, S_out, Np), out_dtype),
        grid=(B, Np // tn),
        in_specs=[
            pl.BlockSpec((None, S_in, Cp), lambda bi, j: (bi, 0, 0)),
            pl.BlockSpec((k * k, Cp, tn), lambda bi, j: (0, 0, j)),
            pl.BlockSpec((1, tn), lambda bi, j: (0, j)),
        ],
        out_specs=pl.BlockSpec((None, S_out, tn), lambda bi, j: (bi, 0, j)),
        scratch_shapes=[pltpu.VMEM((S_out, tn), jnp.float32)],
        compiler_params=pltpu.CompilerParams(
            dimension_semantics=("parallel", "parallel"),
            vmem_limit_bytes=_VMEM_LIMIT_BYTES),
    )(xflat, wt, bp)
    return y.reshape(B, Ho, Wp, Np)[:, :, :Wo, :]


# ----------------------------------------------------------------------------
# Strided convs: channels-last im2col (tiny maps) + tiled matmul kernel
# ----------------------------------------------------------------------------
def _im2col_nhwc(x, k, stride, pad):
    B, H, W, C = x.shape
    Ho = (H + 2 * pad - k) // stride + 1
    Wo = (W + 2 * pad - k) // stride + 1
    xp = jnp.pad(x, ((0, 0), (pad, pad), (pad, pad), (0, 0)))
    taps = []
    for di in range(k):
        for dj in range(k):
            taps.append(xp[:, di:di + stride * (Ho - 1) + 1:stride,
                              dj:dj + stride * (Wo - 1) + 1:stride, :])
    cols = jnp.concatenate(taps, axis=-1)          # (B, Ho, Wo, k*k*C), (kh,kw,c)
    return cols.reshape(B * Ho * Wo, k * k * C), Ho, Wo


def conv2d_strided_relu(x_nhwc, w, b, *, stride=2, pad=1, out_dtype=jnp.bfloat16):
    # TODO(synk): move the stride-2 im2col in-kernel too; these maps are tiny
    # (<=64 real channels, <=4x4 output) so wrapper-side im2col is not the
    # bandwidth bottleneck.
    B = x_nhwc.shape[0]
    Cp = x_nhwc.shape[-1]
    Cout, Cin, k, _ = w.shape
    cols, Ho, Wo = _im2col_nhwc(x_nhwc, k, stride, pad)
    wm = jnp.transpose(w, (2, 3, 1, 0))            # (k, k, Cin, Cout)
    wm = jnp.pad(wm, ((0, 0), (0, 0), (0, Cp - Cin), (0, 0)))
    wm = wm.reshape(k * k * Cp, Cout)
    y = matmul_bias_act(cols, wm, b, relu=True, keep_padded_n=True,
                        out_dtype=out_dtype)
    return y.reshape(B, Ho, Wo, y.shape[-1])


# ----------------------------------------------------------------------------
# Kernel 3: fused regression head  (out@w1+b1).view(bs,ic,hd) @ w2 + b2
# ----------------------------------------------------------------------------
def _head_kernel(f_ref, w1_ref, b1_ref, w2_ref, b2_ref, o_ref):
    # One in_channels slice per grid step; the (bs, hd) intermediate stays in
    # VMEM (no HBM round trip, no in-kernel reshape).
    t = jnp.dot(f_ref[...], w1_ref[...],
                preferred_element_type=jnp.float32) + b1_ref[...]
    y = jnp.dot(t, w2_ref[...], preferred_element_type=jnp.float32) + b2_ref[...]
    o_ref[...] = y.astype(o_ref.dtype)


def regressor_head(feat, w1, b1, w2, b2, *, in_channels, hidden_dim, ockk):
    bs, hd = feat.shape
    assert hd == hidden_dim
    w1r = w1.reshape(hd, in_channels, hd).transpose(1, 0, 2)   # (ic, hd, hd)
    b1r = b1.reshape(in_channels, 1, hd)
    n_pad = _round_up(ockk, 128)                               # lane-dense output
    w2p = jnp.pad(w2, ((0, 0), (0, n_pad - ockk)))
    b2p = jnp.pad(b2, (0, n_pad - ockk)).reshape(1, n_pad)

    y = pl.pallas_call(
        _head_kernel,
        out_shape=jax.ShapeDtypeStruct((in_channels, bs, n_pad), jnp.float32),
        grid=(in_channels,),
        in_specs=[
            pl.BlockSpec((bs, hd), lambda i: (0, 0)),
            pl.BlockSpec((None, hd, hd), lambda i: (i, 0, 0)),
            pl.BlockSpec((None, 1, hd), lambda i: (i, 0, 0)),
            pl.BlockSpec((hd, n_pad), lambda i: (0, 0)),
            pl.BlockSpec((1, n_pad), lambda i: (0, 0)),
        ],
        out_specs=pl.BlockSpec((None, bs, n_pad), lambda i: (i, 0, 0)),
        compiler_params=pltpu.CompilerParams(
            dimension_semantics=("parallel",),
            vmem_limit_bytes=_VMEM_LIMIT_BYTES),
    )(feat.astype(jnp.float32), w1r.astype(jnp.float32),
      b1r.astype(jnp.float32), w2p.astype(jnp.float32), b2p.astype(jnp.float32))
    return y[:, :, :ockk].transpose(1, 0, 2)                   # (bs, ic, oc*k*k)


# ----------------------------------------------------------------------------
# Parameter construction (deterministic, synthetic)
# ----------------------------------------------------------------------------
def _kaiming(key, shape, fan_in):
    return jax.random.normal(key, shape, jnp.float32) * jnp.sqrt(2.0 / fan_in)


def init_weight_regressor(key, input_dim, hidden_dim, kernel_size,
                          out_channels, in_channels):
    ks = jax.random.split(key, 7)
    p = {}
    p["fusion_w"] = _kaiming(ks[0], (input_dim, 2 * input_dim, 1, 1), 2 * input_dim)
    p["fusion_b"] = jnp.zeros((input_dim,), jnp.float32)
    p["fe1_w"] = _kaiming(ks[1], (64, input_dim, 3, 3), input_dim * 9)
    p["fe1_b"] = jnp.zeros((64,), jnp.float32)
    p["fe2_w"] = _kaiming(ks[2], (64, 64, 4, 4), 64 * 16)
    p["fe2_b"] = jnp.zeros((64,), jnp.float32)
    p["fe3_w"] = _kaiming(ks[3], (64, 64, 4, 4), 64 * 16)
    p["fe3_b"] = jnp.zeros((64,), jnp.float32)
    p["fe4_w"] = _kaiming(ks[4], (hidden_dim, 64, 4, 4), 64 * 16)
    p["fe4_b"] = jnp.zeros((hidden_dim,), jnp.float32)
    # rank == -1 branch of WeightRegressor.__init__
    p["w1"] = _kaiming(ks[5], (hidden_dim, in_channels * hidden_dim), hidden_dim)
    p["b1"] = jnp.zeros((in_channels * hidden_dim,), jnp.float32)
    p["w2"] = _kaiming(ks[6], (hidden_dim, out_channels * kernel_size * kernel_size),
                       hidden_dim)
    p["b2"] = jnp.zeros((out_channels * kernel_size * kernel_size,), jnp.float32)
    return p


def init_hypernetwork(key, input_dim, hidden_dim, target_shape, dimensions, layers):
    params, meta = {}, {}
    keys = jax.random.split(key, len(target_shape))
    for i, (layer_name, cfg) in enumerate(target_shape.items()):
        if cfg["w_idx"] not in layers:
            continue
        shape = list(cfg["shape"])
        if len(shape) == 4:
            eff = [s if dimensions[d] else 1 for d, s in enumerate(shape)]
            out_channels, in_channels, kernel_size = eff[0], eff[1], eff[2]
        else:
            out_channels, in_channels = shape
            kernel_size = 1
        new_name = "_".join(layer_name.split("."))
        params[new_name] = init_weight_regressor(
            keys[i], input_dim, hidden_dim, kernel_size, out_channels, in_channels)
        meta[new_name] = dict(layer_name=layer_name, w_idx=cfg["w_idx"],
                              shape=shape, out_channels=out_channels,
                              in_channels=in_channels, kernel_size=kernel_size,
                              hidden_dim=hidden_dim)
    return params, meta


# ----------------------------------------------------------------------------
# Forward passes
# ----------------------------------------------------------------------------
def weight_regressor_forward(p, x_img, x_bar, *, hidden_dim, in_channels,
                             out_channels, kernel_size):
    """One WeightRegressor forward.  x_img / x_bar are NHWC (bs, H, W, C)."""
    bs, H, W, C = x_img.shape
    x = jnp.concatenate([x_img, x_bar], axis=-1)               # (bs, H, W, 2C)

    # fusion: 1x1 conv (+bias) with InstanceNorm + ReLU fused in the epilogue.
    cf = p["fusion_w"].shape[0]
    y = matmul_bias_act(
        x.reshape(bs * H * W, 2 * C),
        p["fusion_w"].reshape(cf, 2 * C).T, p["fusion_b"],
        relu=True, instnorm=True, tm=H * W, keep_padded_n=True,
        out_dtype=jnp.bfloat16)
    y = y.reshape(bs, H, W, y.shape[-1])

    # fe1: 3x3 / stride 1 / pad 1 conv + ReLU, im2col inside the kernel.
    y = conv2d_s1_relu(y, p["fe1_w"], p["fe1_b"], pad=1)

    # fe2..fe4: 4x4 / stride 2 / pad 1 convs + ReLU.
    y = conv2d_strided_relu(y, p["fe2_w"], p["fe2_b"])
    y = conv2d_strided_relu(y, p["fe3_w"], p["fe3_b"])
    y = conv2d_strided_relu(y, p["fe4_w"], p["fe4_b"], out_dtype=jnp.float32)

    # The reference's out.view(bs, -1) implicitly assumes a 1x1 final map.
    assert y.shape[1] == 1 and y.shape[2] == 1, "final feature map must be 1x1"
    feat = y[:, 0, 0, :hidden_dim]                             # (bs, hidden_dim)

    ockk = out_channels * kernel_size * kernel_size
    out1 = regressor_head(feat, p["w1"], p["b1"], p["w2"], p["b2"],
                          in_channels=in_channels, hidden_dim=hidden_dim,
                          ockk=ockk)                           # (bs, ic, oc*k*k)
    # Same flat reinterpret as PyTorch's double .view().
    return out1.reshape(bs, out_channels, in_channels, kernel_size, kernel_size)


def hypernetwork_forward(params, w_image_codes, w_bar_codes, *, meta, dimensions):
    bs = w_image_codes.shape[0]
    # NCHW -> NHWC once at the module boundary; the hot path is channels-last.
    img = jnp.transpose(w_image_codes, (0, 1, 3, 4, 2))
    bar = jnp.transpose(w_bar_codes, (0, 1, 3, 4, 2))
    # TODO(synk): for the full model, stack the per-layer regressor inputs along
    # the batch axis (same architecture, different weights) so the tiny head
    # matmuls reach MXU-friendly M instead of looping per layer in Python.
    out_weights = {}
    for new_name, m in meta.items():
        kernel = weight_regressor_forward(
            params[new_name], img[:, m["w_idx"]], bar[:, m["w_idx"]],
            hidden_dim=m["hidden_dim"], in_channels=m["in_channels"],
            out_channels=m["out_channels"], kernel_size=m["kernel_size"])
        shape = m["shape"]
        if len(shape) == 4:
            # TODO(synk): rank > 0 low-rank (mat1, mat2, shape) branch not
            # implemented; this mirrors the default rank == -1 full-kernel path.
            pred_shape = [s if dimensions[d] else 1 for d, s in enumerate(shape)]
            kernel = kernel.reshape((bs,) + tuple(pred_shape))
            reps = [1] + [1 if dimensions[d] else shape[d] for d in range(4)]
            out_weights[m["layer_name"]] = jnp.tile(kernel, reps)
        else:
            out_weights[m["layer_name"]] = kernel.reshape((bs,) + tuple(shape))
    return out_weights


# ----------------------------------------------------------------------------
# Pure-JAX reference (for a loose numerical self-check; bf16 MXU path inside
# the Pallas kernels vs f32 XLA reference).
# ----------------------------------------------------------------------------
def _ref_conv(x, w, b, stride, pad):
    y = jax.lax.conv_general_dilated(
        x, w, window_strides=(stride, stride),
        padding=((pad, pad), (pad, pad)),
        dimension_numbers=("NCHW", "OIHW", "NCHW"),
        precision=jax.lax.Precision.HIGHEST)
    return y + b.reshape(1, -1, 1, 1)


def _ref_instnorm_relu(x, eps=1e-5):
    mean = jnp.mean(x, axis=(2, 3), keepdims=True)
    var = jnp.mean((x - mean) ** 2, axis=(2, 3), keepdims=True)
    return jnp.maximum((x - mean) * jax.lax.rsqrt(var + eps), 0.0)


def _ref_regressor(p, xi, xb, hd, ic, oc, k):
    bs = xi.shape[0]
    x = jnp.concatenate([xi, xb], axis=1)
    x = _ref_instnorm_relu(_ref_conv(x, p["fusion_w"], p["fusion_b"], 1, 0))
    x = jnp.maximum(_ref_conv(x, p["fe1_w"], p["fe1_b"], 1, 1), 0.0)
    x = jnp.maximum(_ref_conv(x, p["fe2_w"], p["fe2_b"], 2, 1), 0.0)
    x = jnp.maximum(_ref_conv(x, p["fe3_w"], p["fe3_b"], 2, 1), 0.0)
    x = jnp.maximum(_ref_conv(x, p["fe4_w"], p["fe4_b"], 2, 1), 0.0)
    out = x.reshape(bs, -1)
    out1 = out @ p["w1"] + p["b1"]
    out1 = out1.reshape(bs * ic, hd) @ p["w2"] + p["b2"]
    return out1.reshape(bs, oc, ic, k, k)


def _ref_forward(params, meta, dimensions, wi, wb):
    bs = wi.shape[0]
    outs = {}
    for name, m in meta.items():
        kern = _ref_regressor(params[name], wi[:, m["w_idx"]], wb[:, m["w_idx"]],
                              m["hidden_dim"], m["in_channels"],
                              m["out_channels"], m["kernel_size"])
        shape = m["shape"]
        if len(shape) == 4:
            pred = [s if dimensions[d] else 1 for d, s in enumerate(shape)]
            kern = kern.reshape((bs,) + tuple(pred))
            reps = [1] + [1 if dimensions[d] else shape[d] for d in range(4)]
            outs[m["layer_name"]] = jnp.tile(kern, reps)
        else:
            outs[m["layer_name"]] = kern.reshape((bs,) + tuple(shape))
    return outs


# ----------------------------------------------------------------------------
if __name__ == "__main__":
    key = jax.random.PRNGKey(0)
    bs = 2
    input_dim = 16      # (orig 512)
    hidden_dim = 32     # (orig 64)
    H = W = 8           # 3 stride-2 convs -> 1x1 final map, flatten == hidden_dim
    num_ws = 2

    target_shape = {
        "convs.0.conv.weight": {"w_idx": 0, "shape": [8, 8, 3, 3]},   # 4D conv layer
        "to_rgb.linear.weight": {"w_idx": 1, "shape": [8, 16]},       # 2D linear layer
    }
    dimensions = [True, True, True, True]   # all dims predicted -> repeat is identity
    layers = [0, 1]

    k_param, k_img, k_bar = jax.random.split(key, 3)
    params, meta = init_hypernetwork(k_param, input_dim, hidden_dim,
                                     target_shape, dimensions, layers)

    w_image_codes = jax.random.normal(k_img, (bs, num_ws, input_dim, H, W), jnp.float32)
    w_bar_codes = jax.random.normal(k_bar, (bs, num_ws, input_dim, H, W), jnp.float32)

    forward = jax.jit(functools.partial(hypernetwork_forward,
                                        meta=meta, dimensions=dimensions))
    out = jax.block_until_ready(forward(params, w_image_codes, w_bar_codes))

    assert out["convs.0.conv.weight"].shape == (bs, 8, 8, 3, 3)
    assert out["to_rgb.linear.weight"].shape == (bs, 8, 16)
    assert all(bool(jnp.all(jnp.isfinite(v))) for v in out.values())

    # Loose numerical self-check vs a pure-JAX f32 reference (Pallas path runs
    # the convs in bf16 with f32 accumulation).
    ref = _ref_forward(params, meta, dimensions, w_image_codes, w_bar_codes)
    for name, val in out.items():
        r = ref[name]
        err = float(jnp.max(jnp.abs(val - r)))
        scale = float(jnp.max(jnp.abs(r))) + 1e-6
        assert err <= 0.1 * scale + 1e-2, (name, err, scale)

    print("KERNEL_OK")
</pallas_src>

<mosaic_0001>
module attributes {stable_mosaic.version = 11 : i64} {
  func.func @_mm_kernel(%arg0: i32, %arg1: i32, %arg2: i32, %arg3: memref<64x128xbf16, #tpu.memory_space<vmem>>, %arg4: memref<128x128xbf16, #tpu.memory_space<vmem>>, %arg5: memref<1x128xf32, #tpu.memory_space<vmem>>, %arg6: memref<64x128xbf16, #tpu.memory_space<vmem>>, %arg7: memref<64x128xf32, #tpu.memory_space<vmem>>) attributes {dimension_semantics = [#tpu.dimension_semantics<parallel>, #tpu.dimension_semantics<parallel>, #tpu.dimension_semantics<arbitrary>], iteration_bounds = array<i64: 2, 1, 1>, scalar_prefetch = 0 : i64, scratch_operands = 1 : i64, tpu.core_type = #tpu.core_type<tc>, window_params = [{transform_indices = @transform_0, window_bounds = array<i64: 64, 128>}, {transform_indices = @transform_1, window_bounds = array<i64: 128, 128>}, {transform_indices = @transform_2, window_bounds = array<i64: 1, 128>}, {transform_indices = @transform_3, window_bounds = array<i64: 64, 128>}]} {
    %c0_i32 = arith.constant 0 : i32
    %0 = arith.cmpi eq, %arg2, %c0_i32 : i32
    %1 = arith.extui %0 : i1 to i32
    %c0_i32_0 = arith.constant 0 : i32
    %2 = arith.cmpi ne, %1, %c0_i32_0 : i32
    scf.if %2 {
      %cst_10 = arith.constant 0.000000e+00 : f32
      %12 = vector.broadcast %cst_10 : f32 to vector<64x128xf32>
      %c0_11 = arith.constant 0 : index
      %c0_12 = arith.constant 0 : index
      %13 = vector.load %arg7[%c0_11, %c0_12] : memref<64x128xf32, #tpu.memory_space<vmem>>, vector<64x128xf32>
      tpu.vector_store %arg7[%c0_11, %c0_12], %12 {strides = array<i32>} : memref<64x128xf32, #tpu.memory_space<vmem>>, vector<64x128xf32>,
    } else {
    }
    %c0 = arith.constant 0 : index
    %c0_1 = arith.constant 0 : index
    %3 = vector.load %arg7[%c0, %c0_1] : memref<64x128xf32, #tpu.memory_space<vmem>>, vector<64x128xf32>
    %c0_2 = arith.constant 0 : index
    %c0_3 = arith.constant 0 : index
    %4 = vector.load %arg3[%c0_2, %c0_3] : memref<64x128xbf16, #tpu.memory_space<vmem>>, vector<64x128xbf16>
    %c0_4 = arith.constant 0 : index
    %c0_5 = arith.constant 0 : index
    %5 = vector.load %arg4[%c0_4, %c0_5] : memref<128x128xbf16, #tpu.memory_space<vmem>>, vector<128x128xbf16>
    %cst = arith.constant dense<0.000000e+00> : vector<64x128xf32>
    %6 = tpu.matmul %4, %5, %cst {dimension_numbers = #tpu.dot_dimension_numbers<[1], [0], [0], [1], [0, 0, 1, 1], [], []>} : vector<64x128xbf16>, vector<128x128xbf16>, vector<64x128xf32> -> vector<64x128xf32>
    %7 = arith.addf %3, %6 : vector<64x128xf32>
    %c0_6 = arith.constant 0 : index
    %c0_7 = arith.constant 0 : index
    %8 = vector.load %arg7[%c0_6, %c0_7] : memref<64x128xf32, #tpu.memory_space<vmem>>, vector<64x128xf32>
    tpu.vector_store %arg7[%c0_6, %c0_7], %7 {strides = array<i32>} : memref<64x128xf32, #tpu.memory_space<vmem>>, vector<64x128xf32>,
    %c0_i32_8 = arith.constant 0 : i32
    %9 = arith.cmpi eq, %arg2, %c0_i32_8 : i32
    %10 = arith.extui %9 : i1 to i32
    %c0_i32_9 = arith.constant 0 : i32
    %11 = arith.cmpi ne, %10, %c0_i32_9 : i32
    scf.if %11 {
      %c0_10 = arith.constant 0 : index
      %c0_11 = arith.constant 0 : index
      %12 = vector.load %arg7[%c0_10, %c0_11] : memref<64x128xf32, #tpu.memory_space<vmem>>, vector<64x128xf32>
      %c0_12 = arith.constant 0 : index
      %c0_13 = arith.constant 0 : index
      %13 = vector.load %arg5[%c0_12, %c0_13] : memref<1x128xf32, #tpu.memory_space<vmem>>, vector<1x128xf32>
      %14 = vector.broadcast %13 : vector<1x128xf32> to vector<64x128xf32>
      %15 = arith.addf %12, %14 : vector<64x128xf32>
      %cst_14 = arith.constant dense<0.000000e+00> : vector<128xf32>
      %16 = vector.multi_reduction <add>, %15, %cst_14 [0] : vector<64x128xf32> to vector<128xf32>
      %17 = vector.shape_cast %16 : vector<128xf32> to vector<1x128xf32>
      %cst_15 = arith.constant 6.400000e+01 : f32
      %18 = vector.broadcast %cst_15 : f32 to vector<1x128xf32>
      %19 = arith.divf %17, %18 : vector<1x128xf32>
      %20 = vector.broadcast %19 : vector<1x128xf32> to vector<64x128xf32>
      %21 = arith.subf %15, %20 : vector<64x128xf32>
      %22 = arith.mulf %21, %21 : vector<64x128xf32>
      %cst_16 = arith.constant dense<0.000000e+00> : vector<128xf32>
      %23 = vector.multi_reduction <add>, %22, %cst_16 [0] : vector<64x128xf32> to vector<128xf32>
      %24 = vector.shape_cast %23 : vector<128xf32> to vector<1x128xf32>
      %cst_17 = arith.constant 6.400000e+01 : f32
      %25 = vector.broadcast %cst_17 : f32 to vector<1x128xf32>
      %26 = arith.divf %24, %25 : vector<1x128xf32>
      %cst_18 = arith.constant 9.99999974E-6 : f32
      %27 = vector.broadcast %cst_18 : f32 to vector<1x128xf32>
      %28 = arith.addf %26, %27 : vector<1x128xf32>
      %29 = math.rsqrt %28 : vector<1x128xf32>
      %30 = vector.broadcast %29 : vector<1x128xf32> to vector<64x128xf32>
      %31 = arith.mulf %21, %30 : vector<64x128xf32>
      %cst_19 = arith.constant 0.000000e+00 : f32
      %32 = vector.broadcast %cst_19 : f32 to vector<64x128xf32>
      %33 = arith.maximumf %31, %32 : vector<64x128xf32>
      %34 = arith.truncf %33 : vector<64x128xf32> to vector<64x128xbf16>
      %c0_20 = arith.constant 0 : index
      %c0_21 = arith.constant 0 : index
      %35 = vector.load %arg6[%c0_20, %c0_21] : memref<64x128xbf16, #tpu.memory_space<vmem>>, vector<64x128xbf16>
      tpu.vector_store %arg6[%c0_20, %c0_21], %34 {strides = array<i32>} : memref<64x128xbf16, #tpu.memory_space<vmem>>, vector<64x128xbf16>,
    } else {
    }
    return
  }
  func.func @transform_0(%arg0: i32, %arg1: i32, %arg2: i32) -> (i32, i32) {
    %c0_i32 = arith.constant 0 : i32
    return %arg0, %arg2 : i32, i32
  }
  func.func @transform_1(%arg0: i32, %arg1: i32, %arg2: i32) -> (i32, i32) {
    %c0_i32 = arith.constant 0 : i32
    return %arg2, %arg1 : i32, i32
  }
  func.func @transform_2(%arg0: i32, %arg1: i32, %arg2: i32) -> (i32, i32) {
    %c0_i32 = arith.constant 0 : i32
    %c0_i32_0 = arith.constant 0 : i32
    return %c0_i32, %arg1 : i32, i32
  }
  func.func @transform_3(%arg0: i32, %arg1: i32, %arg2: i32) -> (i32, i32) {
    %c0_i32 = arith.constant 0 : i32
    return %arg0, %arg1 : i32, i32
  }
}

module attributes {stable_mosaic.version = 11 : i64} {
  func.func @_conv_s1_kernel(%arg0: i32, %arg1: i32, %arg2: memref<1x110x128xbf16, #tpu.memory_space<vmem>>, %arg3: memref<9x128x128xbf16, #tpu.memory_space<vmem>>, %arg4: memref<1x128xf32, #tpu.memory_space<vmem>>, %arg5: memref<1x80x128xbf16, #tpu.memory_space<vmem>>, %arg6: memref<80x128xf32, #tpu.memory_space<vmem>>) attributes {dimension_semantics = [#tpu.dimension_semantics<parallel>, #tpu.dimension_semantics<parallel>], iteration_bounds = array<i64: 2, 1>, scalar_prefetch = 0 : i64, scratch_operands = 1 : i64, tpu.core_type = #tpu.core_type<tc>, window_params = [{transform_indices = @transform_0, window_bounds = array<i64: 1, 110, 128>}, {transform_indices = @transform_1, window_bounds = array<i64: 9, 128, 128>}, {transform_indices = @transform_2, window_bounds = array<i64: 1, 128>}, {transform_indices = @transform_3, window_bounds = array<i64: 1, 80, 128>}]} {
    %cst = arith.constant 0.000000e+00 : f32
    %0 = vector.broadcast %cst : f32 to vector<80x128xf32>
    %c0 = arith.constant 0 : index
    %c0_0 = arith.constant 0 : index
    %1 = vector.load %arg6[%c0, %c0_0] : memref<80x128xf32, #tpu.memory_space<vmem>>, vector<80x128xf32>
    tpu.vector_store %arg6[%c0, %c0_0], %0 {strides = array<i32>} : memref<80x128xf32, #tpu.memory_space<vmem>>, vector<80x128xf32>,
    %c0_1 = arith.constant 0 : index
    %c0_2 = arith.constant 0 : index
    %c0_3 = arith.constant 0 : index
    %2 = vector.load %arg2[%c0_1, %c0_2, %c0_3] : memref<1x110x128xbf16, #tpu.memory_space<vmem>>, vector<1x80x128xbf16>
    %3 = vector.shape_cast %2 : vector<1x80x128xbf16> to vector<80x128xbf16>
    %c0_4 = arith.constant 0 : index
    %c0_5 = arith.constant 0 : index
    %4 = vector.load %arg6[%c0_4, %c0_5] : memref<80x128xf32, #tpu.memory_space<vmem>>, vector<80x128xf32>
    %c0_6 = arith.constant 0 : index
    %c0_7 = arith.constant 0 : index
    %c0_8 = arith.constant 0 : index
    %5 = vector.load %arg3[%c0_6, %c0_7, %c0_8] : memref<9x128x128xbf16, #tpu.memory_space<vmem>>, vector<1x128x128xbf16>
    %6 = vector.shape_cast %5 : vector<1x128x128xbf16> to vector<128x128xbf16>
    %cst_9 = arith.constant dense<0.000000e+00> : vector<80x128xf32>
    %7 = tpu.matmul %3, %6, %cst_9 {dimension_numbers = #tpu.dot_dimension_numbers<[1], [0], [0], [1], [0, 0, 1, 1], [], []>} : vector<80x128xbf16>, vector<128x128xbf16>, vector<80x128xf32> -> vector<80x128xf32>
    %8 = arith.addf %4, %7 : vector<80x128xf32>
    %c0_10 = arith.constant 0 : index
    %c0_11 = arith.constant 0 : index
    %9 = vector.load %arg6[%c0_10, %c0_11] : memref<80x128xf32, #tpu.memory_space<vmem>>, vector<80x128xf32>
    tpu.vector_store %arg6[%c0_10, %c0_11], %8 {strides = array<i32>} : memref<80x128xf32, #tpu.memory_space<vmem>>, vector<80x128xf32>,
    %c0_12 = arith.constant 0 : index
    %c1 = arith.constant 1 : index
    %c0_13 = arith.constant 0 : index
    %10 = vector.load %arg2[%c0_12, %c1, %c0_13] : memref<1x110x128xbf16, #tpu.memory_space<vmem>>, vector<1x80x128xbf16>
    %11 = vector.shape_cast %10 : vector<1x80x128xbf16> to vector<80x128xbf16>
    %c0_14 = arith.constant 0 : index
    %c0_15 = arith.constant 0 : index
    %12 = vector.load %arg6[%c0_14, %c0_15] : memref<80x128xf32, #tpu.memory_space<vmem>>, vector<80x128xf32>
    %c1_16 = arith.constant 1 : index
    %c0_17 = arith.constant 0 : index
    %c0_18 = arith.constant 0 : index
    %13 = vector.load %arg3[%c1_16, %c0_17, %c0_18] : memref<9x128x128xbf16, #tpu.memory_space<vmem>>, vector<1x128x128xbf16>
    %14 = vector.shape_cast %13 : vector<1x128x128xbf16> to vector<128x128xbf16>
    %cst_19 = arith.constant dense<0.000000e+00> : vector<80x128xf32>
    %15 = tpu.matmul %11, %14, %cst_19 {dimension_numbers = #tpu.dot_dimension_numbers<[1], [0], [0], [1], [0, 0, 1, 1], [], []>} : vector<80x128xbf16>, vector<128x128xbf16>, vector<80x128xf32> -> vector<80x128xf32>
    %16 = arith.addf %12, %15 : vector<80x128xf32>
    %c0_20 = arith.constant 0 : index
    %c0_21 = arith.constant 0 : index
    %17 = vector.load %arg6[%c0_20, %c0_21] : memref<80x128xf32, #tpu.memory_space<vmem>>, vector<80x128xf32>
    tpu.vector_store %arg6[%c0_20, %c0_21], %16 {strides = array<i32>} : memref<80x128xf32, #tpu.memory_space<vmem>>, vector<80x128xf32>,
    %c0_22 = arith.constant 0 : index
    %c2 = arith.constant 2 : index
    %c0_23 = arith.constant 0 : index
    %18 = vector.load %arg2[%c0_22, %c2, %c0_23] : memref<1x110x128xbf16, #tpu.memory_space<vmem>>, vector<1x80x128xbf16>
    %19 = vector.shape_cast %18 : vector<1x80x128xbf16> to vector<80x128xbf16>
    %c0_24 = arith.constant 0 : index
    %c0_25 = arith.constant 0 : index
    %20 = vector.load %arg6[%c0_24, %c0_25] : memref<80x128xf32, #tpu.memory_space<vmem>>, vector<80x128xf32>
    %c2_26 = arith.constant 2 : index
    %c0_27 = arith.constant 0 : index
    %c0_28 = arith.constant 0 : index
    %21 = vector.load %arg3[%c2_26, %c0_27, %c0_28] : memref<9x128x128xbf16, #tpu.memory_space<vmem>>, vector<1x128x128xbf16>
    %22 = vector.shape_cast %21 : vector<1x128x128xbf16> to vector<128x128xbf16>
    %cst_29 = arith.constant dense<0.000000e+00> : vector<80x128xf32>
    %23 = tpu.matmul %19, %22, %cst_29 {dimension_numbers = #tpu.dot_dimension_numbers<[1], [0], [0], [1], [0, 0, 1, 1], [], []>} : vector<80x128xbf16>, vector<128x128xbf16>, vector<80x128xf32> -> vector<80x128xf32>
    %24 = arith.addf %20, %23 : vector<80x128xf32>
    %c0_30 = arith.constant 0 : index
    %c0_31 = arith.constant 0 : index
    %25 = vector.load %arg6[%c0_30, %c0_31] : memref<80x128xf32, #tpu.memory_space<vmem>>, vector<80x128xf32>
    tpu.vector_store %arg6[%c0_30, %c0_31], %24 {strides = array<i32>} : memref<80x128xf32, #tpu.memory_space<vmem>>, vector<80x128xf32>,
    %c0_32 = arith.constant 0 : index
    %c10 = arith.constant 10 : index
    %c0_33 = arith.constant 0 : index
    %26 = vector.load %arg2[%c0_32, %c10, %c0_33] : memref<1x110x128xbf16, #tpu.memory_space<vmem>>, vector<1x80x128xbf16>
    %27 = vector.shape_cast %26 : vector<1x80x128xbf16> to vector<80x128xbf16>
    %c0_34 = arith.constant 0 : index
    %c0_35 = arith.constant 0 : index
    %28 = vector.load %arg6[%c0_34, %c0_35] : memref<80x128xf32, #tpu.memory_space<vmem>>, vector<80x128xf32>
    %c3 = arith.constant 3 : index
    %c0_36 = arith.constant 0 : index
    %c0_37 = arith.constant 0 : index
    %29 = vector.load %arg3[%c3, %c0_36, %c0_37] : memref<9x128x128xbf16, #tpu.memory_space<vmem>>, vector<1x128x128xbf16>
    %30 = vector.shape_cast %29 : vector<1x128x128xbf16> to vector<128x128xbf16>
    %cst_38 = arith.constant dense<0.000000e+00> : vector<80x128xf32>
    %31 = tpu.matmul %27, %30, %cst_38 {dimension_numbers = #tpu.dot_dimension_numbers<[1], [0], [0], [1], [0, 0, 1, 1], [], []>} : vector<80x128xbf16>, vector<128x128xbf16>, vector<80x128xf32> -> vector<80x128xf32>
    %32 = arith.addf %28, %31 : vector<80x128xf32>
    %c0_39 = arith.constant 0 : index
    %c0_40 = arith.constant 0 : index
    %33 = vector.load %arg6[%c0_39, %c0_40] : memref<80x128xf32, #tpu.memory_space<vmem>>, vector<80x128xf32>
    tpu.vector_store %arg6[%c0_39, %c0_40], %32 {strides = array<i32>} : memref<80x128xf32, #tpu.memory_space<vmem>>, vector<80x128xf32>,
    %c0_41 = arith.constant 0 : index
    %c11 = arith.constant 11 : index
    %c0_42 = arith.constant 0 : index
    %34 = vector.load %arg2[%c0_41, %c11, %c0_42] : memref<1x110x128xbf16, #tpu.memory_space<vmem>>, vector<1x80x128xbf16>
    %35 = vector.shape_cast %34 : vector<1x80x128xbf16> to vector<80x128xbf16>
    %c0_43 = arith.constant 0 : index
    %c0_44 = arith.constant 0 : index
    %36 = vector.load %arg6[%c0_43, %c0_44] : memref<80x128xf32, #tpu.memory_space<vmem>>, vector<80x128xf32>
    %c4 = arith.constant 4 : index
    %c0_45 = arith.constant 0 : index
    %c0_46 = arith.constant 0 : index
    %37 = vector.load %arg3[%c4, %c0_45, %c0_46] : memref<9x128x128xbf16, #tpu.memory_space<vmem>>, vector<1x128x128xbf16>
    %38 = vector.shape_cast %37 : vector<1x128x128xbf16> to vector<128x128xbf16>
    %cst_47 = arith.constant dense<0.000000e+00> : vector<80x128xf32>
    %39 = tpu.matmul %35, %38, %cst_47 {dimension_numbers = #tpu.dot_dimension_numbers<[1], [0], [0], [1], [0, 0, 1, 1], [], []>} : vector<80x128xbf16>, vector<128x128xbf16>, vector<80x128xf32> -> vector<80x128xf32>
    %40 = arith.addf %36, %39 : vector<80x128xf32>
    %c0_48 = arith.constant 0 : index
    %c0_49 = arith.constant 0 : index
    %41 = vector.load %arg6[%c0_48, %c0_49] : memref<80x128xf32, #tpu.memory_space<vmem>>, vector<80x128xf32>
    tpu.vector_store %arg6[%c0_48, %c0_49], %40 {strides = array<i32>} : memref<80x128xf32, #tpu.memory_space<vmem>>, vector<80x128xf32>,
    %c0_50 = arith.constant 0 : index
    %c12 = arith.constant 12 : index
    %c0_51 = arith.constant 0 : index
    %42 = vector.load %arg2[%c0_50, %c12, %c0_51] : memref<1x110x128xbf16, #tpu.memory_space<vmem>>, vector<1x80x128xbf16>
    %43 = vector.shape_cast %42 : vector<1x80x128xbf16> to vector<80x128xbf16>
    %c0_52 = arith.constant 0 : index
    %c0_53 = arith.constant 0 : index
    %44 = vector.load %arg6[%c0_52, %c0_53] : memref<80x128xf32, #tpu.memory_space<vmem>>, vector<80x128xf32>
    %c5 = arith.constant 5 : index
    %c0_54 = arith.constant 0 : index
    %c0_55 = arith.constant 0 : index
    %45 = vector.load %arg3[%c5, %c0_54, %c0_55] : memref<9x128x128xbf16, #tpu.memory_space<vmem>>, vector<1x128x128xbf16>
    %46 = vector.shape_cast %45 : vector<1x128x128xbf16> to vector<128x128xbf16>
    %cst_56 = arith.constant dense<0.000000e+00> : vector<80x128xf32>
    %47 = tpu.matmul %43, %46, %cst_56 {dimension_numbers = #tpu.dot_dimension_numbers<[1], [0], [0], [1], [0, 0, 1, 1], [], []>} : vector<80x128xbf16>, vector<128x128xbf16>, vector<80x128xf32> -> vector<80x128xf32>
    %48 = arith.addf %44, %47 : vector<80x128xf32>
    %c0_57 = arith.constant 0 : index
    %c0_58 = arith.constant 0 : index
    %49 = vector.load %arg6[%c0_57, %c0_58] : memref<80x128xf32, #tpu.memory_space<vmem>>, vector<80x128xf32>
    tpu.vector_store %arg6[%c0_57, %c0_58], %48 {strides = array<i32>} : memref<80x128xf32, #tpu.memory_space<vmem>>, vector<80x128xf32>,
    %c0_59 = arith.constant 0 : index
    %c20 = arith.constant 20 : index
    %c0_60 = arith.constant 0 : index
    %50 = vector.load %arg2[%c0_59, %c20, %c0_60] : memref<1x110x128xbf16, #tpu.memory_space<vmem>>, vector<1x80x128xbf16>
    %51 = vector.shape_cast %50 : vector<1x80x128xbf16> to vector<80x128xbf16>
    %c0_61 = arith.constant 0 : index
    %c0_62 = arith.constant 0 : index
    %52 = vector.load %arg6[%c0_61, %c0_62] : memref<80x128xf32, #tpu.memory_space<vmem>>, vector<80x128xf32>
    %c6 = arith.constant 6 : index
    %c0_63 = arith.constant 0 : index
    %c0_64 = arith.constant 0 : index
    %53 = vector.load %arg3[%c6, %c0_63, %c0_64] : memref<9x128x128xbf16, #tpu.memory_space<vmem>>, vector<1x128x128xbf16>
    %54 = vector.shape_cast %53 : vector<1x128x128xbf16> to vector<128x128xbf16>
    %cst_65 = arith.constant dense<0.000000e+00> : vector<80x128xf32>
    %55 = tpu.matmul %51, %54, %cst_65 {dimension_numbers = #tpu.dot_dimension_numbers<[1], [0], [0], [1], [0, 0, 1, 1], [], []>} : vector<80x128xbf16>, vector<128x128xbf16>, vector<80x128xf32> -> vector<80x128xf32>
    %56 = arith.addf %52, %55 : vector<80x128xf32>
    %c0_66 = arith.constant 0 : index
    %c0_67 = arith.constant 0 : index
    %57 = vector.load %arg6[%c0_66, %c0_67] : memref<80x128xf32, #tpu.memory_space<vmem>>, vector<80x128xf32>
    tpu.vector_store %arg6[%c0_66, %c0_67], %56 {strides = array<i32>} : memref<80x128xf32, #tpu.memory_space<vmem>>, vector<80x128xf32>,
    %c0_68 = arith.constant 0 : index
    %c21 = arith.constant 21 : index
    %c0_69 = arith.constant 0 : index
    %58 = vector.load %arg2[%c0_68, %c21, %c0_69] : memref<1x110x128xbf16, #tpu.memory_space<vmem>>, vector<1x80x128xbf16>
    %59 = vector.shape_cast %58 : vector<1x80x128xbf16> to vector<80x128xbf16>
    %c0_70 = arith.constant 0 : index
    %c0_71 = arith.constant 0 : index
    %60 = vector.load %arg6[%c0_70, %c0_71] : memref<80x128xf32, #tpu.memory_space<vmem>>, vector<80x128xf32>
    %c7 = arith.constant 7 : index
    %c0_72 = arith.constant 0 : index
    %c0_73 = arith.constant 0 : index
    %61 = vector.load %arg3[%c7, %c0_72, %c0_73] : memref<9x128x128xbf16, #tpu.memory_space<vmem>>, vector<1x128x128xbf16>
    %62 = vector.shape_cast %61 : vector<1x128x128xbf16> to vector<128x128xbf16>
    %cst_74 = arith.constant dense<0.000000e+00> : vector<80x128xf32>
    %63 = tpu.matmul %59, %62, %cst_74 {dimension_numbers = #tpu.dot_dimension_numbers<[1], [0], [0], [1], [0, 0, 1, 1], [], []>} : vector<80x128xbf16>, vector<128x128xbf16>, vector<80x128xf32> -> vector<80x128xf32>
    %64 = arith.addf %60, %63 : vector<80x128xf32>
    %c0_75 = arith.constant 0 : index
    %c0_76 = arith.constant 0 : index
    %65 = vector.load %arg6[%c0_75, %c0_76] : memref<80x128xf32, #tpu.memory_space<vmem>>, vector<80x128xf32>
    tpu.vector_store %arg6[%c0_75, %c0_76], %64 {strides = array<i32>} : memref<80x128xf32, #tpu.memory_space<vmem>>, vector<80x128xf32>,
    %c0_77 = arith.constant 0 : index
    %c22 = arith.constant 22 : index
    %c0_78 = arith.constant 0 : index
    %66 = vector.load %arg2[%c0_77, %c22, %c0_78] : memref<1x110x128xbf16, #tpu.memory_space<vmem>>, vector<1x80x128xbf16>
    %67 = vector.shape_cast %66 : vector<1x80x128xbf16> to vector<80x128xbf16>
    %c0_79 = arith.constant 0 : index
    %c0_80 = arith.constant 0 : index
    %68 = vector.load %arg6[%c0_79, %c0_80] : memref<80x128xf32, #tpu.memory_space<vmem>>, vector<80x128xf32>
    %c8 = arith.constant 8 : index
    %c0_81 = arith.constant 0 : index
    %c0_82 = arith.constant 0 : index
    %69 = vector.load %arg3[%c8, %c0_81, %c0_82] : memref<9x128x128xbf16, #tpu.memory_space<vmem>>, vector<1x128x128xbf16>
    %70 = vector.shape_cast %69 : vector<1x128x128xbf16> to vector<128x128xbf16>
    %cst_83 = arith.constant dense<0.000000e+00> : vector<80x128xf32>
    %71 = tpu.matmul %67, %70, %cst_83 {dimension_numbers = #tpu.dot_dimension_numbers<[1], [0], [0], [1], [0, 0, 1, 1], [], []>} : vector<80x128xbf16>, vector<128x128xbf16>, vector<80x128xf32> -> vector<80x128xf32>
    %72 = arith.addf %68, %71 : vector<80x128xf32>
    %c0_84 = arith.constant 0 : index
    %c0_85 = arith.constant 0 : index
    %73 = vector.load %arg6[%c0_84, %c0_85] : memref<80x128xf32, #tpu.memory_space<vmem>>, vector<80x128xf32>
    tpu.vector_store %arg6[%c0_84, %c0_85], %72 {strides = array<i32>} : memref<80x128xf32, #tpu.memory_space<vmem>>, vector<80x128xf32>,
    %c0_86 = arith.constant 0 : index
    %c0_87 = arith.constant 0 : index
    %74 = vector.load %arg6[%c0_86, %c0_87] : memref<80x128xf32, #tpu.memory_space<vmem>>, vector<80x128xf32>
    %c0_88 = arith.constant 0 : index
    %c0_89 = arith.constant 0 : index
    %75 = vector.load %arg4[%c0_88, %c0_89] : memref<1x128xf32, #tpu.memory_space<vmem>>, vector<1x128xf32>
    %76 = vector.broadcast %75 : vector<1x128xf32> to vector<80x128xf32>
    %77 = arith.addf %74, %76 : vector<80x128xf32>
    %cst_90 = arith.constant 0.000000e+00 : f32
    %78 = vector.broadcast %cst_90 : f32 to vector<80x128xf32>
    %79 = arith.maximumf %77, %78 : vector<80x128xf32>
    %80 = arith.truncf %79 : vector<80x128xf32> to vector<80x128xbf16>
    %c0_91 = arith.constant 0 : index
    %c0_92 = arith.constant 0 : index
    %c0_93 = arith.constant 0 : index
    %81 = vector.load %arg5[%c0_91, %c0_92, %c0_93] : memref<1x80x128xbf16, #tpu.memory_space<vmem>>, vector<1x80x128xbf16>
    %82 = vector.shape_cast %81 : vector<1x80x128xbf16> to vector<80x128xbf16>
    %83 = vector.shape_cast %80 : vector<80x128xbf16> to vector<1x80x128xbf16>
    tpu.vector_store %arg5[%c0_91, %c0_92, %c0_93], %83 {strides = array<i32>} : memref<1x80x128xbf16, #tpu.memory_space<vmem>>, vector<1x80x128xbf16>,
    return
  }
  func.func @transform_0(%arg0: i32, %arg1: i32) -> (i32, i32, i32) {
    %c0_i32 = arith.constant 0 : i32
    %c0_i32_0 = arith.constant 0 : i32
    %c0_i32_1 = arith.constant 0 : i32
    return %arg0, %c0_i32, %c0_i32_0 : i32, i32, i32
  }
  func.func @transform_1(%arg0: i32, %arg1: i32) -> (i32, i32, i32) {
    %c0_i32 = arith.constant 0 : i32
    %c0_i32_0 = arith.constant 0 : i32
    %c0_i32_1 = arith.constant 0 : i32
    return %c0_i32, %c0_i32_0, %arg1 : i32, i32, i32
  }
  func.func @transform_2(%arg0: i32, %arg1: i32) -> (i32, i32) {
    %c0_i32 = arith.constant 0 : i32
    %c0_i32_0 = arith.constant 0 : i32
    return %c0_i32, %arg1 : i32, i32
  }
  func.func @transform_3(%arg0: i32, %arg1: i32) -> (i32, i32, i32) {
    %c0_i32 = arith.constant 0 : i32
    %c0_i32_0 = arith.constant 0 : i32
    return %arg0, %c0_i32, %arg1 : i32, i32, i32
  }
}

module attributes {stable_mosaic.version = 11 : i64} {
  func.func @_mm_kernel(%arg0: i32, %arg1: i32, %arg2: i32, %arg3: memref<32x512xbf16, #tpu.memory_space<vmem>>, %arg4: memref<512x128xbf16, #tpu.memory_space<vmem>>, %arg5: memref<1x128xf32, #tpu.memory_space<vmem>>, %arg6: memref<32x128xbf16, #tpu.memory_space<vmem>>, %arg7: memref<32x128xf32, #tpu.memory_space<vmem>>) attributes {dimension_semantics = [#tpu.dimension_semantics<parallel>, #tpu.dimension_semantics<parallel>, #tpu.dimension_semantics<arbitrary>], iteration_bounds = array<i64: 1, 1, 4>, scalar_prefetch = 0 : i64, scratch_operands = 1 : i64, tpu.core_type = #tpu.core_type<tc>, window_params = [{transform_indices = @transform_0, window_bounds = array<i64: 32, 512>}, {transform_indices = @transform_1, window_bounds = array<i64: 512, 128>}, {transform_indices = @transform_2, window_bounds = array<i64: 1, 128>}, {transform_indices = @transform_3, window_bounds = array<i64: 32, 128>}]} {
    %c0_i32 = arith.constant 0 : i32
    %0 = arith.cmpi eq, %arg2, %c0_i32 : i32
    %1 = arith.extui %0 : i1 to i32
    %c0_i32_0 = arith.constant 0 : i32
    %2 = arith.cmpi ne, %1, %c0_i32_0 : i32
    scf.if %2 {
      %cst_9 = arith.constant 0.000000e+00 : f32
      %12 = vector.broadcast %cst_9 : f32 to vector<32x128xf32>
      %c0_10 = arith.constant 0 : index
      %c0_11 = arith.constant 0 : index
      %13 = vector.load %arg7[%c0_10, %c0_11] : memref<32x128xf32, #tpu.memory_space<vmem>>, vector<32x128xf32>
      tpu.vector_store %arg7[%c0_10, %c0_11], %12 {strides = array<i32>} : memref<32x128xf32, #tpu.memory_space<vmem>>, vector<32x128xf32>,
    } else {
    }
    %c0 = arith.constant 0 : index
    %c0_1 = arith.constant 0 : index
    %3 = vector.load %arg7[%c0, %c0_1] : memref<32x128xf32, #tpu.memory_space<vmem>>, vector<32x128xf32>
    %c0_2 = arith.constant 0 : index
    %c0_3 = arith.constant 0 : index
    %4 = vector.load %arg3[%c0_2, %c0_3] : memref<32x512xbf16, #tpu.memory_space<vmem>>, vector<32x512xbf16>
    %c0_4 = arith.constant 0 : index
    %c0_5 = arith.constant 0 : index
    %5 = vector.load %arg4[%c0_4, %c0_5] : memref<512x128xbf16, #tpu.memory_space<vmem>>, vector<512x128xbf16>
    %cst = arith.constant dense<0.000000e+00> : vector<32x128xf32>
    %6 = tpu.matmul %4, %5, %cst {dimension_numbers = #tpu.dot_dimension_numbers<[1], [0], [0], [1], [0, 0, 1, 1], [], []>} : vector<32x512xbf16>, vector<512x128xbf16>, vector<32x128xf32> -> vector<32x128xf32>
    %7 = arith.addf %3, %6 : vector<32x128xf32>
    %c0_6 = arith.constant 0 : index
    %c0_7 = arith.constant 0 : index
    %8 = vector.load %arg7[%c0_6, %c0_7] : memref<32x128xf32, #tpu.memory_space<vmem>>, vector<32x128xf32>
    tpu.vector_store %arg7[%c0_6, %c0_7], %7 {strides = array<i32>} : memref<32x128xf32, #tpu.memory_space<vmem>>, vector<32x128xf32>,
    %c3_i32 = arith.constant 3 : i32
    %9 = arith.cmpi eq, %arg2, %c3_i32 : i32
    %10 = arith.extui %9 : i1 to i32
    %c0_i32_8 = arith.constant 0 : i32
    %11 = arith.cmpi ne, %10, %c0_i32_8 : i32
    scf.if %11 {
      %c0_9 = arith.constant 0 : index
      %c0_10 = arith.constant 0 : index
      %12 = vector.load %arg7[%c0_9, %c0_10] : memref<32x128xf32, #tpu.memory_space<vmem>>, vector<32x128xf32>
      %c0_11 = arith.constant 0 : index
      %c0_12 = arith.constant 0 : index
      %13 = vector.load %arg5[%c0_11, %c0_12] : memref<1x128xf32, #tpu.memory_space<vmem>>, vector<1x128xf32>
      %14 = vector.broadcast %13 : vector<1x128xf32> to vector<32x128xf32>
      %15 = arith.addf %12, %14 : vector<32x128xf32>
      %cst_13 = arith.constant 0.000000e+00 : f32
      %16 = vector.broadcast %cst_13 : f32 to vector<32x128xf32>
      %17 = arith.maximumf %15, %16 : vector<32x128xf32>
      %18 = arith.truncf %17 : vector<32x128xf32> to vector<32x128xbf16>
      %c0_14 = arith.constant 0 : index
      %c0_15 = arith.constant 0 : index
      %19 = vector.load %arg6[%c0_14, %c0_15] : memref<32x128xbf16, #tpu.memory_space<vmem>>, vector<32x128xbf16>
      tpu.vector_store %arg6[%c0_14, %c0_15], %18 {strides = array<i32>} : memref<32x128xbf16, #tpu.memory_space<vmem>>, vector<32x128xbf16>,
    } else {
    }
    return
  }
  func.func @transform_0(%arg0: i32, %arg1: i32, %arg2: i32) -> (i32, i32) {
    %c0_i32 = arith.constant 0 : i32
    return %arg0, %arg2 : i32, i32
  }
  func.func @transform_1(%arg0: i32, %arg1: i32, %arg2: i32) -> (i32, i32) {
    %c0_i32 = arith.constant 0 : i32
    return %arg2, %arg1 : i32, i32
  }
  func.func @transform_2(%arg0: i32, %arg1: i32, %arg2: i32) -> (i32, i32) {
    %c0_i32 = arith.constant 0 : i32
    %c0_i32_0 = arith.constant 0 : i32
    return %c0_i32, %arg1 : i32, i32
  }
  func.func @transform_3(%arg0: i32, %arg1: i32, %arg2: i32) -> (i32, i32) {
    %c0_i32 = arith.constant 0 : i32
    return %arg0, %arg1 : i32, i32
  }
}

module attributes {stable_mosaic.version = 11 : i64} {
  func.func @_mm_kernel(%arg0: i32, %arg1: i32, %arg2: i32, %arg3: memref<8x512xbf16, #tpu.memory_space<vmem>>, %arg4: memref<512x128xbf16, #tpu.memory_space<vmem>>, %arg5: memref<1x128xf32, #tpu.memory_space<vmem>>, %arg6: memref<8x128xbf16, #tpu.memory_space<vmem>>, %arg7: memref<8x128xf32, #tpu.memory_space<vmem>>) attributes {dimension_semantics = [#tpu.dimension_semantics<parallel>, #tpu.dimension_semantics<parallel>, #tpu.dimension_semantics<arbitrary>], iteration_bounds = array<i64: 1, 1, 4>, scalar_prefetch = 0 : i64, scratch_operands = 1 : i64, tpu.core_type = #tpu.core_type<tc>, window_params = [{transform_indices = @transform_0, window_bounds = array<i64: 8, 512>}, {transform_indices = @transform_1, window_bounds = array<i64: 512, 128>}, {transform_indices = @transform_2, window_bounds = array<i64: 1, 128>}, {transform_indices = @transform_3, window_bounds = array<i64: 8, 128>}]} {
    %c0_i32 = arith.constant 0 : i32
    %0 = arith.cmpi eq, %arg2, %c0_i32 : i32
    %1 = arith.extui %0 : i1 to i32
    %c0_i32_0 = arith.constant 0 : i32
    %2 = arith.cmpi ne, %1, %c0_i32_0 : i32
    scf.if %2 {
      %cst_9 = arith.constant 0.000000e+00 : f32
      %12 = vector.broadcast %cst_9 : f32 to vector<8x128xf32>
      %c0_10 = arith.constant 0 : index
      %c0_11 = arith.constant 0 : index
      %13 = vector.load %arg7[%c0_10, %c0_11] : memref<8x128xf32, #tpu.memory_space<vmem>>, vector<8x128xf32>
      tpu.vector_store %arg7[%c0_10, %c0_11], %12 {strides = array<i32>} : memref<8x128xf32, #tpu.memory_space<vmem>>, vector<8x128xf32>,
    } else {
    }
    %c0 = arith.constant 0 : index
    %c0_1 = arith.constant 0 : index
    %3 = vector.load %arg7[%c0, %c0_1] : memref<8x128xf32, #tpu.memory_space<vmem>>, vector<8x128xf32>
    %c0_2 = arith.constant 0 : index
    %c0_3 = arith.constant 0 : index
    %4 = vector.load %arg3[%c0_2, %c0_3] : memref<8x512xbf16, #tpu.memory_space<vmem>>, vector<8x512xbf16>
    %c0_4 = arith.constant 0 : index
    %c0_5 = arith.constant 0 : index
    %5 = vector.load %arg4[%c0_4, %c0_5] : memref<512x128xbf16, #tpu.memory_space<vmem>>, vector<512x128xbf16>
    %cst = arith.constant dense<0.000000e+00> : vector<8x128xf32>
    %6 = tpu.matmul %4, %5, %cst {dimension_numbers = #tpu.dot_dimension_numbers<[1], [0], [0], [1], [0, 0, 1, 1], [], []>} : vector<8x512xbf16>, vector<512x128xbf16>, vector<8x128xf32> -> vector<8x128xf32>
    %7 = arith.addf %3, %6 : vector<8x128xf32>
    %c0_6 = arith.constant 0 : index
    %c0_7 = arith.constant 0 : index
    %8 = vector.load %arg7[%c0_6, %c0_7] : memref<8x128xf32, #tpu.memory_space<vmem>>, vector<8x128xf32>
    tpu.vector_store %arg7[%c0_6, %c0_7], %7 {strides = array<i32>} : memref<8x128xf32, #tpu.memory_space<vmem>>, vector<8x128xf32>,
    %c3_i32 = arith.constant 3 : i32
    %9 = arith.cmpi eq, %arg2, %c3_i32 : i32
    %10 = arith.extui %9 : i1 to i32
    %c0_i32_8 = arith.constant 0 : i32
    %11 = arith.cmpi ne, %10, %c0_i32_8 : i32
    scf.if %11 {
      %c0_9 = arith.constant 0 : index
      %c0_10 = arith.constant 0 : index
      %12 = vector.load %arg7[%c0_9, %c0_10] : memref<8x128xf32, #tpu.memory_space<vmem>>, vector<8x128xf32>
      %c0_11 = arith.constant 0 : index
      %c0_12 = arith.constant 0 : index
      %13 = vector.load %arg5[%c0_11, %c0_12] : memref<1x128xf32, #tpu.memory_space<vmem>>, vector<1x128xf32>
      %14 = vector.broadcast %13 : vector<1x128xf32> to vector<8x128xf32>
      %15 = arith.addf %12, %14 : vector<8x128xf32>
      %cst_13 = arith.constant 0.000000e+00 : f32
      %16 = vector.broadcast %cst_13 : f32 to vector<8x128xf32>
      %17 = arith.maximumf %15, %16 : vector<8x128xf32>
      %18 = arith.truncf %17 : vector<8x128xf32> to vector<8x128xbf16>
      %c0_14 = arith.constant 0 : index
      %c0_15 = arith.constant 0 : index
      %19 = vector.load %arg6[%c0_14, %c0_15] : memref<8x128xbf16, #tpu.memory_space<vmem>>, vector<8x128xbf16>
      tpu.vector_store %arg6[%c0_14, %c0_15], %18 {strides = array<i32>} : memref<8x128xbf16, #tpu.memory_space<vmem>>, vector<8x128xbf16>,
    } else {
    }
    return
  }
  func.func @transform_0(%arg0: i32, %arg1: i32, %arg2: i32) -> (i32, i32) {
    %c0_i32 = arith.constant 0 : i32
    return %arg0, %arg2 : i32, i32
  }
  func.func @transform_1(%arg0: i32, %arg1: i32, %arg2: i32) -> (i32, i32) {
    %c0_i32 = arith.constant 0 : i32
    return %arg2, %arg1 : i32, i32
  }
  func.func @transform_2(%arg0: i32, %arg1: i32, %arg2: i32) -> (i32, i32) {
    %c0_i32 = arith.constant 0 : i32
    %c0_i32_0 = arith.constant 0 : i32
    return %c0_i32, %arg1 : i32, i32
  }
  func.func @transform_3(%arg0: i32, %arg1: i32, %arg2: i32) -> (i32, i32) {
    %c0_i32 = arith.constant 0 : i32
    return %arg0, %arg1 : i32, i32
  }
}

module attributes {stable_mosaic.version = 11 : i64} {
  func.func @_mm_kernel(%arg0: i32, %arg1: i32, %arg2: i32, %arg3: memref<8x512xbf16, #tpu.memory_space<vmem>>, %arg4: memref<512x128xbf16, #tpu.memory_space<vmem>>, %arg5: memref<1x128xf32, #tpu.memory_space<vmem>>, %arg6: memref<8x128xf32, #tpu.memory_space<vmem>>, %arg7: memref<8x128xf32, #tpu.memory_space<vmem>>) attributes {dimension_semantics = [#tpu.dimension_semantics<parallel>, #tpu.dimension_semantics<parallel>, #tpu.dimension_semantics<arbitrary>], iteration_bounds = array<i64: 1, 1, 4>, scalar_prefetch = 0 : i64, scratch_operands = 1 : i64, tpu.core_type = #tpu.core_type<tc>, window_params = [{transform_indices = @transform_0, window_bounds = array<i64: 8, 512>}, {transform_indices = @transform_1, window_bounds = array<i64: 512, 128>}, {transform_indices = @transform_2, window_bounds = array<i64: 1, 128>}, {transform_indices = @transform_3, window_bounds = array<i64: 8, 128>}]} {
    %c0_i32 = arith.constant 0 : i32
    %0 = arith.cmpi eq, %arg2, %c0_i32 : i32
    %1 = arith.extui %0 : i1 to i32
    %c0_i32_0 = arith.constant 0 : i32
    %2 = arith.cmpi ne, %1, %c0_i32_0 : i32
    scf.if %2 {
      %cst_9 = arith.constant 0.000000e+00 : f32
      %12 = vector.broadcast %cst_9 : f32 to vector<8x128xf32>
      %c0_10 = arith.constant 0 : index
      %c0_11 = arith.constant 0 : index
      %13 = vector.load %arg7[%c0_10, %c0_11] : memref<8x128xf32, #tpu.memory_space<vmem>>, vector<8x128xf32>
      tpu.vector_store %arg7[%c0_10, %c0_11], %12 {strides = array<i32>} : memref<8x128xf32, #tpu.memory_space<vmem>>, vector<8x128xf32>,
    } else {
    }
    %c0 = arith.constant 0 : index
    %c0_1 = arith.constant 0 : index
    %3 = vector.load %arg7[%c0, %c0_1] : memref<8x128xf32, #tpu.memory_space<vmem>>, vector<8x128xf32>
    %c0_2 = arith.constant 0 : index
    %c0_3 = arith.constant 0 : index
    %4 = vector.load %arg3[%c0_2, %c0_3] : memref<8x512xbf16, #tpu.memory_space<vmem>>, vector<8x512xbf16>
    %c0_4 = arith.constant 0 : index
    %c0_5 = arith.constant 0 : index
    %5 = vector.load %arg4[%c0_4, %c0_5] : memref<512x128xbf16, #tpu.memory_space<vmem>>, vector<512x128xbf16>
    %cst = arith.constant dense<0.000000e+00> : vector<8x128xf32>
    %6 = tpu.matmul %4, %5, %cst {dimension_numbers = #tpu.dot_dimension_numbers<[1], [0], [0], [1], [0, 0, 1, 1], [], []>} : vector<8x512xbf16>, vector<512x128xbf16>, vector<8x128xf32> -> vector<8x128xf32>
    %7 = arith.addf %3, %6 : vector<8x128xf32>
    %c0_6 = arith.constant 0 : index
    %c0_7 = arith.constant 0 : index
    %8 = vector.load %arg7[%c0_6, %c0_7] : memref<8x128xf32, #tpu.memory_space<vmem>>, vector<8x128xf32>
    tpu.vector_store %arg7[%c0_6, %c0_7], %7 {strides = array<i32>} : memref<8x128xf32, #tpu.memory_space<vmem>>, vector<8x128xf32>,
    %c3_i32 = arith.constant 3 : i32
    %9 = arith.cmpi eq, %arg2, %c3_i32 : i32
    %10 = arith.extui %9 : i1 to i32
    %c0_i32_8 = arith.constant 0 : i32
    %11 = arith.cmpi ne, %10, %c0_i32_8 : i32
    scf.if %11 {
      %c0_9 = arith.constant 0 : index
      %c0_10 = arith.constant 0 : index
      %12 = vector.load %arg7[%c0_9, %c0_10] : memref<8x128xf32, #tpu.memory_space<vmem>>, vector<8x128xf32>
      %c0_11 = arith.constant 0 : index
      %c0_12 = arith.constant 0 : index
      %13 = vector.load %arg5[%c0_11, %c0_12] : memref<1x128xf32, #tpu.memory_space<vmem>>, vector<1x128xf32>
      %14 = vector.broadcast %13 : vector<1x128xf32> to vector<8x128xf32>
      %15 = arith.addf %12, %14 : vector<8x128xf32>
      %cst_13 = arith.constant 0.000000e+00 : f32
      %16 = vector.broadcast %cst_13 : f32 to vector<8x128xf32>
      %17 = arith.maximumf %15, %16 : vector<8x128xf32>
      %c0_14 = arith.constant 0 : index
      %c0_15 = arith.constant 0 : index
      %18 = vector.load %arg6[%c0_14, %c0_15] : memref<8x128xf32, #tpu.memory_space<vmem>>, vector<8x128xf32>
      tpu.vector_store %arg6[%c0_14, %c0_15], %17 {strides = array<i32>} : memref<8x128xf32, #tpu.memory_space<vmem>>, vector<8x128xf32>,
    } else {
    }
    return
  }
  func.func @transform_0(%arg0: i32, %arg1: i32, %arg2: i32) -> (i32, i32) {
    %c0_i32 = arith.constant 0 : i32
    return %arg0, %arg2 : i32, i32
  }
  func.func @transform_1(%arg0: i32, %arg1: i32, %arg2: i32) -> (i32, i32) {
    %c0_i32 = arith.constant 0 : i32
    return %arg2, %arg1 : i32, i32
  }
  func.func @transform_2(%arg0: i32, %arg1: i32, %arg2: i32) -> (i32, i32) {
    %c0_i32 = arith.constant 0 : i32
    %c0_i32_0 = arith.constant 0 : i32
    return %c0_i32, %arg1 : i32, i32
  }
  func.func @transform_3(%arg0: i32, %arg1: i32, %arg2: i32) -> (i32, i32) {
    %c0_i32 = arith.constant 0 : i32
    return %arg0, %arg1 : i32, i32
  }
}

module attributes {stable_mosaic.version = 11 : i64} {
  func.func @_head_kernel(%arg0: i32, %arg1: memref<2x32xf32, #tpu.memory_space<vmem>>, %arg2: memref<1x32x32xf32, #tpu.memory_space<vmem>>, %arg3: memref<1x1x32xf32, #tpu.memory_space<vmem>>, %arg4: memref<32x128xf32, #tpu.memory_space<vmem>>, %arg5: memref<1x128xf32, #tpu.memory_space<vmem>>, %arg6: memref<1x2x128xf32, #tpu.memory_space<vmem>>) attributes {dimension_semantics = [#tpu.dimension_semantics<parallel>], iteration_bounds = array<i64: 16>, scalar_prefetch = 0 : i64, scratch_operands = 0 : i64, tpu.core_type = #tpu.core_type<tc>, window_params = [{pipeline_mode = #tpu.pipeline_mode<synchronous>, transform_indices = @transform_0, window_bounds = array<i64: 2, 32>}, {transform_indices = @transform_1, window_bounds = array<i64: 1, 32, 32>}, {transform_indices = @transform_2, window_bounds = array<i64: 1, 1, 32>}, {pipeline_mode = #tpu.pipeline_mode<synchronous>, transform_indices = @transform_3, window_bounds = array<i64: 32, 128>}, {pipeline_mode = #tpu.pipeline_mode<synchronous>, transform_indices = @transform_4, window_bounds = array<i64: 1, 128>}, {transform_indices = @transform_5, window_bounds = array<i64: 1, 2, 128>}]} {
    %c0 = arith.constant 0 : index
    %c0_0 = arith.constant 0 : index
    %0 = vector.load %arg1[%c0, %c0_0] : memref<2x32xf32, #tpu.memory_space<vmem>>, vector<2x32xf32>
    %c0_1 = arith.constant 0 : index
    %c0_2 = arith.constant 0 : index
    %c0_3 = arith.constant 0 : index
    %1 = vector.load %arg2[%c0_1, %c0_2, %c0_3] : memref<1x32x32xf32, #tpu.memory_space<vmem>>, vector<1x32x32xf32>
    %2 = vector.shape_cast %1 : vector<1x32x32xf32> to vector<32x32xf32>
    %cst = arith.constant dense<0.000000e+00> : vector<2x32xf32>
    %3 = tpu.matmul %0, %2, %cst {dimension_numbers = #tpu.dot_dimension_numbers<[1], [0], [0], [1], [0, 0, 1, 1], [], []>} : vector<2x32xf32>, vector<32x32xf32>, vector<2x32xf32> -> vector<2x32xf32>
    %c0_4 = arith.constant 0 : index
    %c0_5 = arith.constant 0 : index
    %c0_6 = arith.constant 0 : index
    %4 = vector.load %arg3[%c0_4, %c0_5, %c0_6] : memref<1x1x32xf32, #tpu.memory_space<vmem>>, vector<1x1x32xf32>
    %5 = vector.shape_cast %4 : vector<1x1x32xf32> to vector<1x32xf32>
    %6 = vector.broadcast %5 : vector<1x32xf32> to vector<2x32xf32>
    %7 = arith.addf %3, %6 : vector<2x32xf32>
    %c0_7 = arith.constant 0 : index
    %c0_8 = arith.constant 0 : index
    %8 = vector.load %arg4[%c0_7, %c0_8] : memref<32x128xf32, #tpu.memory_space<vmem>>, vector<32x128xf32>
    %cst_9 = arith.constant dense<0.000000e+00> : vector<2x128xf32>
    %9 = tpu.matmul %7, %8, %cst_9 {dimension_numbers = #tpu.dot_dimension_numbers<[1], [0], [0], [1], [0, 0, 1, 1], [], []>} : vector<2x32xf32>, vector<32x128xf32>, vector<2x128xf32> -> vector<2x128xf32>
    %c0_10 = arith.constant 0 : index
    %c0_11 = arith.constant 0 : index
    %10 = vector.load %arg5[%c0_10, %c0_11] : memref<1x128xf32, #tpu.memory_space<vmem>>, vector<1x128xf32>
    %11 = vector.broadcast %10 : vector<1x128xf32> to vector<2x128xf32>
    %12 = arith.addf %9, %11 : vector<2x128xf32>
    %c0_12 = arith.constant 0 : index
    %c0_13 = arith.constant 0 : index
    %c0_14 = arith.constant 0 : index
    %13 = vector.load %arg6[%c0_12, %c0_13, %c0_14] : memref<1x2x128xf32, #tpu.memory_space<vmem>>, vector<1x2x128xf32>
    %14 = vector.shape_cast %13 : vector<1x2x128xf32> to vector<2x128xf32>
    %15 = vector.shape_cast %12 : vector<2x128xf32> to vector<1x2x128xf32>
    tpu.vector_store %arg6[%c0_12, %c0_13, %c0_14], %15 {strides = array<i32>} : memref<1x2x128xf32, #tpu.memory_space<vmem>>, vector<1x2x128xf32>,
    return
  }
  func.func @transform_0(%arg0: i32) -> (i32, i32) {
    %c0_i32 = arith.constant 0 : i32
    %c0_i32_0 = arith.constant 0 : i32
    %c0_i32_1 = arith.constant 0 : i32
    return %c0_i32, %c0_i32_0 : i32, i32
  }
  func.func @transform_1(%arg0: i32) -> (i32, i32, i32) {
    %c0_i32 = arith.constant 0 : i32
    %c0_i32_0 = arith.constant 0 : i32
    %c0_i32_1 = arith.constant 0 : i32
    return %arg0, %c0_i32, %c0_i32_0 : i32, i32, i32
  }
  func.func @transform_2(%arg0: i32) -> (i32, i32, i32) {
    %c0_i32 = arith.constant 0 : i32
    %c0_i32_0 = arith.constant 0 : i32
    %c0_i32_1 = arith.constant 0 : i32
    return %arg0, %c0_i32, %c0_i32_0 : i32, i32, i32
  }
  func.func @transform_3(%arg0: i32) -> (i32, i32) {
    %c0_i32 = arith.constant 0 : i32
    %c0_i32_0 = arith.constant 0 : i32
    %c0_i32_1 = arith.constant 0 : i32
    return %c0_i32, %c0_i32_0 : i32, i32
  }
  func.func @transform_4(%arg0: i32) -> (i32, i32) {
    %c0_i32 = arith.constant 0 : i32
    %c0_i32_0 = arith.constant 0 : i32
    %c0_i32_1 = arith.constant 0 : i32
    return %c0_i32, %c0_i32_0 : i32, i32
  }
  func.func @transform_5(%arg0: i32) -> (i32, i32, i32) {
    %c0_i32 = arith.constant 0 : i32
    %c0_i32_0 = arith.constant 0 : i32
    %c0_i32_1 = arith.constant 0 : i32
    return %arg0, %c0_i32, %c0_i32_0 : i32, i32, i32
  }
}

module attributes {stable_mosaic.version = 11 : i64} {
  func.func @_head_kernel(%arg0: i32, %arg1: memref<2x32xf32, #tpu.memory_space<vmem>>, %arg2: memref<1x32x32xf32, #tpu.memory_space<vmem>>, %arg3: memref<1x1x32xf32, #tpu.memory_space<vmem>>, %arg4: memref<32x128xf32, #tpu.memory_space<vmem>>, %arg5: memref<1x128xf32, #tpu.memory_space<vmem>>, %arg6: memref<1x2x128xf32, #tpu.memory_space<vmem>>) attributes {dimension_semantics = [#tpu.dimension_semantics<parallel>], iteration_bounds = array<i64: 8>, scalar_prefetch = 0 : i64, scratch_operands = 0 : i64, tpu.core_type = #tpu.core_type<tc>, window_params = [{pipeline_mode = #tpu.pipeline_mode<synchronous>, transform_indices = @transform_0, window_bounds = array<i64: 2, 32>}, {transform_indices = @transform_1, window_bounds = array<i64: 1, 32, 32>}, {transform_indices = @transform_2, window_bounds = array<i64: 1, 1, 32>}, {pipeline_mode = #tpu.pipeline_mode<synchronous>, transform_indices = @transform_3, window_bounds = array<i64: 32, 128>}, {pipeline_mode = #tpu.pipeline_mode<synchronous>, transform_indices = @transform_4, window_bounds = array<i64: 1, 128>}, {transform_indices = @transform_5, window_bounds = array<i64: 1, 2, 128>}]} {
    %c0 = arith.constant 0 : index
    %c0_0 = arith.constant 0 : index
    %0 = vector.load %arg1[%c0, %c0_0] : memref<2x32xf32, #tpu.memory_space<vmem>>, vector<2x32xf32>
    %c0_1 = arith.constant 0 : index
    %c0_2 = arith.constant 0 : index
    %c0_3 = arith.constant 0 : index
    %1 = vector.load %arg2[%c0_1, %c0_2, %c0_3] : memref<1x32x32xf32, #tpu.memory_space<vmem>>, vector<1x32x32xf32>
    %2 = vector.shape_cast %1 : vector<1x32x32xf32> to vector<32x32xf32>
    %cst = arith.constant dense<0.000000e+00> : vector<2x32xf32>
    %3 = tpu.matmul %0, %2, %cst {dimension_numbers = #tpu.dot_dimension_numbers<[1], [0], [0], [1], [0, 0, 1, 1], [], []>} : vector<2x32xf32>, vector<32x32xf32>, vector<2x32xf32> -> vector<2x32xf32>
    %c0_4 = arith.constant 0 : index
    %c0_5 = arith.constant 0 : index
    %c0_6 = arith.constant 0 : index
    %4 = vector.load %arg3[%c0_4, %c0_5, %c0_6] : memref<1x1x32xf32, #tpu.memory_space<vmem>>, vector<1x1x32xf32>
    %5 = vector.shape_cast %4 : vector<1x1x32xf32> to vector<1x32xf32>
    %6 = vector.broadcast %5 : vector<1x32xf32> to vector<2x32xf32>
    %7 = arith.addf %3, %6 : vector<2x32xf32>
    %c0_7 = arith.constant 0 : index
    %c0_8 = arith.constant 0 : index
    %8 = vector.load %arg4[%c0_7, %c0_8] : memref<32x128xf32, #tpu.memory_space<vmem>>, vector<32x128xf32>
    %cst_9 = arith.constant dense<0.000000e+00> : vector<2x128xf32>
    %9 = tpu.matmul %7, %8, %cst_9 {dimension_numbers = #tpu.dot_dimension_numbers<[1], [0], [0], [1], [0, 0, 1, 1], [], []>} : vector<2x32xf32>, vector<32x128xf32>, vector<2x128xf32> -> vector<2x128xf32>
    %c0_10 = arith.constant 0 : index
    %c0_11 = arith.constant 0 : index
    %10 = vector.load %arg5[%c0_10, %c0_11] : memref<1x128xf32, #tpu.memory_space<vmem>>, vector<1x128xf32>
    %11 = vector.broadcast %10 : vector<1x128xf32> to vector<2x128xf32>
    %12 = arith.addf %9, %11 : vector<2x128xf32>
    %c0_12 = arith.constant 0 : index
    %c0_13 = arith.constant 0 : index
    %c0_14 = arith.constant 0 : index
    %13 = vector.load %arg6[%c0_12, %c0_13, %c0_14] : memref<1x2x128xf32, #tpu.memory_space<vmem>>, vector<1x2x128xf32>
    %14 = vector.shape_cast %13 : vector<1x2x128xf32> to vector<2x128xf32>
    %15 = vector.shape_cast %12 : vector<2x128xf32> to vector<1x2x128xf32>
    tpu.vector_store %arg6[%c0_12, %c0_13, %c0_14], %15 {strides = array<i32>} : memref<1x2x128xf32, #tpu.memory_space<vmem>>, vector<1x2x128xf32>,
    return
  }
  func.func @transform_0(%arg0: i32) -> (i32, i32) {
    %c0_i32 = arith.constant 0 : i32
    %c0_i32_0 = arith.constant 0 : i32
    %c0_i32_1 = arith.constant 0 : i32
    return %c0_i32, %c0_i32_0 : i32, i32
  }
  func.func @transform_1(%arg0: i32) -> (i32, i32, i32) {
    %c0_i32 = arith.constant 0 : i32
    %c0_i32_0 = arith.constant 0 : i32
    %c0_i32_1 = arith.constant 0 : i32
    return %arg0, %c0_i32, %c0_i32_0 : i32, i32, i32
  }
  func.func @transform_2(%arg0: i32) -> (i32, i32, i32) {
    %c0_i32 = arith.constant 0 : i32
    %c0_i32_0 = arith.constant 0 : i32
    %c0_i32_1 = arith.constant 0 : i32
    return %arg0, %c0_i32, %c0_i32_0 : i32, i32, i32
  }
  func.func @transform_3(%arg0: i32) -> (i32, i32) {
    %c0_i32 = arith.constant 0 : i32
    %c0_i32_0 = arith.constant 0 : i32
    %c0_i32_1 = arith.constant 0 : i32
    return %c0_i32, %c0_i32_0 : i32, i32
  }
  func.func @transform_4(%arg0: i32) -> (i32, i32) {
    %c0_i32 = arith.constant 0 : i32
    %c0_i32_0 = arith.constant 0 : i32
    %c0_i32_1 = arith.constant 0 : i32
    return %c0_i32, %c0_i32_0 : i32, i32
  }
  func.func @transform_5(%arg0: i32) -> (i32, i32, i32) {
    %c0_i32 = arith.constant 0 : i32
    %c0_i32_0 = arith.constant 0 : i32
    %c0_i32_1 = arith.constant 0 : i32
    return %arg0, %c0_i32, %c0_i32_0 : i32, i32, i32
  }
}

</mosaic_0001>

<bundles_post_ra>
// kernel: hypernetwork_forward.18
= control target key start
LH: loop header
LB: loop body
LE: loop exit
PB: predicated region body
PF: predicated region fallthrough
CT: control target
= control target key end

     0   :  { %s896_s12 = smov 0   ;;  %s898_s13 = smov 0   ;;  %s969_s0 = inlined_call_operand.vmem [shape: bf16[128,128], index: 0, kind: input, shape index: {}]   ;;  %s970_s1 = inlined_call_operand.vmem [shape: bf16[128,128], index: 1, kind: input, shape index: {}]   ;;  %s971_s2 = inlined_call_operand.vmem [shape: f32[1,128], index: 2, kind: input, shape index: {}]   ;;  %s972_s3 = inlined_call_operand.vmem [shape: bf16[128,128], index: 3, kind: output, shape index: {}]  }
   0x1   :  { %s900_s14 = smov 0  }
   0x2 LB: > { %s32_s15 = sadd.s32 1, %s870_s13  ;;  %p703_p0 = scmp.ge.s32.totalorder %s874_s14, 1  ;;  %s874_s14 = sphi %s900_s14, %s13_s14   ;;  %s870_s13 = sphi %s898_s13, %s974_s13   ;;  %s866_s12 = sphi %s896_s12, %s973_s12  }
   0x3   : > { %p34_p1 = scmp.ge.s32.totalorder %s32_s15, 2  ;;  %p188_p2 = scmp.lt.s32.totalorder %s874_s14, 3 }
   0x5   : > { %s976_s15 = smov (%p34_p1, %s32_s15), 0  ;;  %p189_p3 = pnand %p703_p0, %p188_p2 }
   0x6   : > { %s704_s18 = sshll.u32 (!%p189_p3), %s866_s12, 3 }
   0x7   : > { %192 = sbr.rel (%p189_p3) target bundleno = 330 (0x14a), region = 32  ;;  %p230_p4 = scmp.lt.s32.totalorder (!%p189_p3), %s704_s18, 15 }
   0xc   : > { %v838_v0 = vld [vmem:[%s970_s1 + $0x38] sm:$0xff]   ;;  %v839_v1 = vld [vmem:[%s970_s1 + $0x30] sm:$0xff]   ;;  %s978_s18 = smov (!%p230_p4, %s704_s18), 15  ;;  %v840_v2 = vld [vmem:[%s970_s1 + $0x28] sm:$0xff]  }
   0xd   : > { %774 = vmatprep.subr.bf16.mxu0 %v838_v0  ;;  %798 = vmatprep.subr.bf16.mxu1 %v838_v0  ;;  %s705_s23 = sshll.u32 %s978_s18, 2  ;;  %v841_v3 = vld [vmem:[%s970_s1 + $0x20] sm:$0xff]   ;;  %v842_v6 = vld [vmem:[%s970_s1 + $0x18] sm:$0xff]   ;;  %v843_v7 = vld [vmem:[%s970_s1 + $0x10] sm:$0xff]  }
   0xe   : > { %775 = vmatpush3.bf16.msra.mxu0 %v838_v0  ;;  %806 = vmatpush3.bf16.msra.mxu1 %v838_v0  ;;  %s931_s26 = scalar_lea.vmem %s969_s0, %s705_s23  ;;  %v844_v8 = vld [vmem:[%s970_s1 + $0x8] sm:$0xff]   ;;  %v845_v9 = vld [vmem:[%s970_s1] sm:$0xff]   ;;  %s257_s17 = scalar_lea.vmem %s972_s3, %s705_s23 }
   0xf   : > { %776 = vmatprep.subr.bf16.mxu0 %v839_v1  ;;  %799 = vmatprep.subr.bf16.mxu1 %v839_v1  ;;  %v846_v4 = vld [vmem:[%s931_s26] sm:$0xff]   ;;  %v848_v5 = vld [vmem:[%s931_s26 + $0x10] sm:$0xff]   ;;  %v847_v10 = vld [vmem:[%s931_s26 + $0x8] sm:$0xff]  }
  0x10   : > { %790 = vmatprep.mubr.bf16.mxu0 %v846_v4  ;;  %794 = vmatprep.mubr.bf16.mxu1 %v848_v5  ;;  %v849_v11 = vld [vmem:[%s931_s26 + $0x18] sm:$0xff]   ;;  %v720_v17 = vld [vmem:[%s971_s2] ss:$0 sm:$0xff] }
  0x12   : > { %777 = vmatpush3.bf16.msra.mxu0 %v839_v1  ;;  %807 = vmatpush3.bf16.msra.mxu1 %v839_v1 }
  0x13   : > { %778 = vmatprep.subr.bf16.mxu0 %v840_v2  ;;  %800 = vmatprep.subr.bf16.mxu1 %v840_v2 }
  0x16   : > { %779 = vmatpush3.bf16.msra.mxu0 %v840_v2  ;;  %808 = vmatpush3.bf16.msra.mxu1 %v840_v2 }
  0x17   : > { %780 = vmatprep.subr.bf16.mxu0 %v841_v3  ;;  %801 = vmatprep.subr.bf16.mxu1 %v841_v3 }
  0x1a   : > { %781 = vmatpush3.bf16.msra.mxu0 %v841_v3  ;;  %809 = vmatpush3.bf16.msra.mxu1 %v841_v3 }
  0x1b   : > { %782 = vmatprep.subr.bf16.mxu0 %v842_v6  ;;  %802 = vmatprep.subr.bf16.mxu1 %v842_v6 }
  0x1e   : > { %783 = vmatpush3.bf16.msra.mxu0 %v842_v6  ;;  %810 = vmatpush3.bf16.msra.mxu1 %v842_v6 }
  0x1f   : > { %784 = vmatprep.subr.bf16.mxu0 %v843_v7  ;;  %803 = vmatprep.subr.bf16.mxu1 %v843_v7 }
  0x22   : > { %785 = vmatpush3.bf16.msra.mxu0 %v843_v7  ;;  %811 = vmatpush3.bf16.msra.mxu1 %v843_v7 }
  0x23   : > { %786 = vmatprep.subr.bf16.mxu0 %v844_v8  ;;  %804 = vmatprep.subr.bf16.mxu1 %v844_v8 }
  0x26   : > { %787 = vmatpush3.bf16.msra.mxu0 %v844_v8  ;;  %812 = vmatpush3.bf16.msra.mxu1 %v844_v8 }
  0x27   : > { %788 = vmatprep.subr.bf16.mxu0 %v845_v9  ;;  %805 = vmatprep.subr.bf16.mxu1 %v845_v9 }
  0x2a   : > { %789 = vmatpush3.bf16.msra.mxu0 %v845_v9  ;;  %813 = vmatpush3.bf16.msra.mxu1 %v845_v9 }
  0x2d   : > { %791 = vmatmul.mubr.bf16.vlgmr.msra.gmra.mxu0 %v847_v10  ;;  %795 = vmatmul.mubr.bf16.vlgmr.msra.gmra.mxu1 %v849_v11 }
  0xed   : > { %v792_v12 = vpop.f32.mrf.mxu0  ;;  %v796_v13 = vpop.f32.mrf.mxu1 }
  0xee   : > { %v477_v22 = vadd.f32 %v792_v12, %v720_v17  ;;  %v481_v31 = vadd.f32 %v796_v13, %v720_v17 }
  0xef   : > { %v410_v14 = vpop.f32.mrf.mxu0  ;;  %v426_v16 = vpop.f32.mrf.mxu1 }
  0xf0   : > { %v475_v19 = vadd.f32 %v720_v17, %v410_v14  ;;  %v479_v27 = vadd.f32 %v720_v17, %v426_v16 }
  0xf1   : > { %v793_v15 = vpop.f32.mrf.mxu0  ;;  %v797_v21 = vpop.f32.mrf.mxu1 }
  0xf2   : > { %v478_v24 = vadd.f32 %v793_v15, %v720_v17  ;;  %v482_v33 = vadd.f32 %v797_v21, %v720_v17 }
  0xf3   : > { %v413_v18 = vpop.f32.mrf.mxu0  ;;  %v429_v26 = vpop.f32.mrf.mxu1 }
  0xf4   : > { %v476_v20 = vadd.f32 %v720_v17, %v413_v18  ;;  %v480_v29 = vadd.f32 %v720_v17, %v429_v26 }
  0xf6   : > { %v483_v23 = vadd.f32 %v476_v20, %v475_v19 }
  0xf8   : > { %v484_v25 = vadd.f32 %v483_v23, %v477_v22 }
  0xfa   : > { %v485_v28 = vadd.f32 %v484_v25, %v478_v24 }
  0xfc   : > { %v486_v30 = vadd.f32 %v485_v28, %v479_v27 }
  0xfe   : > { %v487_v32 = vadd.f32 %v486_v30, %v480_v29 }
 0x100   : > { %v488_v34 = vadd.f32 %v487_v32, %v481_v31 }
 0x102   : > { %v489_v35 = vadd.f32 %v488_v34, %v482_v33 }
 0x104   : > { %v490_v36 = vrot.slane %v489_v35, 4 }
 0x106   : > { %v491_v37 = vadd.f32 %v490_v36, %v489_v35 }
 0x108   : > { %v492_v38 = vrot.slane %v491_v37, 2 }
 0x10a   : > { %v493_v39 = vadd.f32 %v492_v38, %v491_v37 }
 0x10c   : > { %v494_v40 = vrot.slane %v493_v39, 1 }
 0x10e   : > { %v495_v41 = vadd.f32 %v494_v40, %v493_v39 }
 0x110   : > { %v497_v42 = vmul.f32 0.015625, %v495_v41 }
 0x112   : > { %v498_v43 = vsub.f32 %v475_v19, %v497_v42  ;;  %v499_v44 = vsub.f32 %v476_v20, %v497_v42  ;;  %v500_v45 = vsub.f32 %v477_v22, %v497_v42  ;;  %v501_v46 = vsub.f32 %v478_v24, %v497_v42 }
 0x113   : > { %v502_v49 = vsub.f32 %v479_v27, %v497_v42  ;;  %v503_v52 = vsub.f32 %v480_v29, %v497_v42  ;;  %v504_v55 = vsub.f32 %v481_v31, %v497_v42  ;;  %v505_v58 = vsub.f32 %v482_v33, %v497_v42 }
 0x114   : > { %v506_v47 = vmul.f32 %v498_v43, %v498_v43  ;;  %v507_v48 = vmul.f32 %v499_v44, %v499_v44  ;;  %v508_v50 = vmul.f32 %v500_v45, %v500_v45  ;;  %v509_v53 = vmul.f32 %v501_v46, %v501_v46 }
 0x115   : > { %v510_v56 = vmul.f32 %v502_v49, %v502_v49  ;;  %v511_v59 = vmul.f32 %v503_v52, %v503_v52  ;;  %v512_v61 = vmul.f32 %v504_v55, %v504_v55  ;;  %v513_v63 = vmul.f32 %v505_v58, %v505_v58 }
 0x116   : > { %v514_v51 = vadd.f32 %v507_v48, %v506_v47 }
 0x118   : > { %v515_v54 = vadd.f32 %v514_v51, %v508_v50 }
 0x11a   : > { %v516_v57 = vadd.f32 %v515_v54, %v509_v53 }
 0x11c   : > { %v517_v60 = vadd.f32 %v516_v57, %v510_v56 }
 0x11e   : > { %v518_v62 = vadd.f32 %v517_v60, %v511_v59 }
 0x120   : > { %v519_v0 = vadd.f32 %v518_v62, %v512_v61 }
 0x122   : > { %v520_v1 = vadd.f32 %v519_v0, %v513_v63 }
 0x124   : > { %v521_v2 = vrot.slane %v520_v1, 4 }
 0x126   : > { %v522_v3 = vadd.f32 %v521_v2, %v520_v1 }
 0x128   : > { %v523_v4 = vrot.slane %v522_v3, 2 }
 0x12a   : > { %v524_v5 = vadd.f32 %v523_v4, %v522_v3 }
 0x12c   : > { %v525_v6 = vrot.slane %v524_v5, 1 }
 0x12e   : > { %v526_v7 = vadd.f32 %v525_v6, %v524_v5 }
 0x130   : > { %v527_v8 = vmul.f32 0.015625, %v526_v7 }
 0x132   : > { %v528_v9 = vadd.f32 1e-05, %v527_v8 }
 0x134   : > { %850 = vrsqrt.f32 %v528_v9 }
 0x141   : > { %v851_v10 = vpop.eup %850 }
 0x142   : > { %v530_v11 = vmul.f32 %v851_v10, %v498_v43  ;;  %v531_v12 = vmul.f32 %v851_v10, %v499_v44  ;;  %v532_v13 = vmul.f32 %v851_v10, %v500_v45  ;;  %v533_v14 = vmul.f32 %v851_v10, %v501_v46 }
 0x143   : > { %v534_v15 = vmul.f32 %v851_v10, %v502_v49  ;;  %v535_v16 = vmul.f32 %v851_v10, %v503_v52  ;;  %v536_v17 = vmul.f32 %v851_v10, %v504_v55  ;;  %v537_v18 = vmul.f32 %v851_v10, %v505_v58 }
 0x144   : > { %v538_v19 = vmax.f32 %v530_v11, 0.0  ;;  %v539_v20 = vmax.f32 %v531_v12, 0.0  ;;  %v540_v21 = vmax.f32 %v532_v13, 0.0  ;;  %v541_v22 = vmax.f32 %v533_v14, 0.0 }
 0x145   : > { %v542_v23 = vmax.f32 %v534_v15, 0.0  ;;  %v543_v24 = vmax.f32 %v535_v16, 0.0  ;;  %v544_v25 = vmax.f32 %v536_v17, 0.0  ;;  %v545_v26 = vmax.f32 %v537_v18, 0.0 }
 0x146   : > { %v742_v27 = vpack.c.bf16 %v539_v20, %v538_v19  ;;  %v747_v28 = vpack.c.bf16 %v541_v22, %v540_v21 }
 0x147   : > { %v752_v29 = vpack.c.bf16 %v543_v24, %v542_v23  ;;  %v757_v30 = vpack.c.bf16 %v545_v26, %v544_v25 }
 0x148   : > { %743 = vst [vmem:[%s257_s17] sm:$0xff] %v742_v27   ;;  %759 = vst [vmem:[%s257_s17 + $0x8] sm:$0xff] %v747_v28  }
 0x149   : > { %760 = vst [vmem:[%s257_s17 + $0x10] sm:$0xff] %v752_v29   ;;  %761 = vst [vmem:[%s257_s17 + $0x18] sm:$0xff] %v757_v30  }
 0x14a PF: > { %s13_s14 = sadd.s32 1, %s874_s14   ;;  %s973_s12 = smov %s870_s13 }
 0x14b   : > { %p10_p5 = scmp.ge.s32.totalorder %s13_s14, 4   ;;  %s974_s13 = smov %s976_s15 }
 0x14d   :  { %12 = sbr.rel (!%p10_p5) target bundleno = 2 (0x2), region = 76 }

// kernel: hypernetwork_forward.19
= control target key start
LH: loop header
LB: loop body
LE: loop exit
PB: predicated region body
PF: predicated region fallthrough
CT: control target
= control target key end

     0   :  { %s3509_s12 = smov 0   ;;  %s3511_s13 = smov 0   ;;  %s4104_s0 = inlined_call_operand.vmem [shape: bf16[2,110,128], index: 0, kind: input, shape index: {}]   ;;  %s4105_s1 = inlined_call_operand.vmem [shape: bf16[9,128,128], index: 1, kind: input, shape index: {}]   ;;  %s4106_s2 = inlined_call_operand.vmem [shape: f32[1,128], index: 2, kind: input, shape index: {}]   ;;  %s4107_s3 = inlined_call_operand.vmem [shape: bf16[2,80,128], index: 3, kind: output, shape index: {}]  }
   0x1   :  { %s3513_s14 = smov 0  }
   0x2 LB: > { %s25_s15 = sadd.s32 1, %s3481_s13  ;;  %p2545_p0 = scmp.ge.s32.totalorder %s3485_s14, 1  ;;  %s3485_s14 = sphi %s3513_s14, %s13_s14   ;;  %s3481_s13 = sphi %s3511_s13, %s4109_s13   ;;  %s3477_s12 = sphi %s3509_s12, %s4108_s12  }
   0x3   : > { %p27_p1 = scmp.ge.s32.totalorder %s25_s15, 2  ;;  %p168_p2 = scmp.lt.s32.totalorder %s3485_s14, 3 }
   0x5   : > { %s4111_s15 = smov (%p27_p1, %s25_s15), 0  ;;  %p169_p3 = pnand %p2545_p0, %p168_p2 }
   0x6   : > { %p202_p4 = scmp.lt.s32.totalorder (!%p169_p3), %s3477_s12, 1 }
   0x7   : > { %172 = sbr.rel (%p169_p3) target bundleno = 427 (0x1ab), region = 32 }
   0xc   : > { %v3338_v0 = vld [vmem:[%s4105_s1 + $0x38] sm:$0xff]   ;;  %v3487_v1 = vmov 0.0   ;;  %v3340_v3 = vld [vmem:[%s4105_s1 + $0x30] sm:$0xff]   ;;  %vm3488_vm0 = vmmov 0   ;;  %v3342_v5 = vld [vmem:[%s4105_s1 + $0x28] sm:$0xff]   ;;  %s4113_s12 = smov (!%p202_p4, %s3477_s12), 1 }
   0xd   : > { %2970 = vmatprep.subr.bf16.mxu0 %v3487_v1  ;;  %3006 = vmatprep.subr.bf16.mxu1 %v3487_v1  ;;  %v3339_v2 = vld [vmem:[%s4105_s1 + $0x78] sm:$0xff]   ;;  %v3341_v4 = vld [vmem:[%s4105_s1 + $0x70] sm:$0xff]   ;;  %v3343_v6 = vld [vmem:[%s4105_s1 + $0x68] sm:$0xff]   ;;  %s3310_s5 = smul.u32 56, %s4113_s12  ;;  %vm506_vm1 = vsmask.f32 7424 }
   0xe   : > { %2971 = vmatpush3.bf16.msra.mxu0 %v3338_v0  ;;  %2986 = vmatprep.mubr.msk.bf16.mxu0 %vm3488_vm0, %v3487_v1  ;;  %v3344_v7 = vld [vmem:[%s4105_s1 + $0x20] sm:$0xff]   ;;  %v3346_v9 = vld [vmem:[%s4105_s1 + $0x18] sm:$0xff]   ;;  %v3348_v11 = vld [vmem:[%s4105_s1 + $0x10] sm:$0xff]   ;;  %vm763_vm2 = vcmask 1046528   ;;  %vm1210_vm3 = vsmask.f32 6400 }
   0xf   : > { %3007 = vmatpush3.bf16.msra.mxu1 %v3339_v2  ;;  %2972 = vmatprep.subr.bf16.mxu0 %v3487_v1  ;;  %v3345_v8 = vld [vmem:[%s4105_s1 + $0x60] sm:$0xff]   ;;  %v3347_v10 = vld [vmem:[%s4105_s1 + $0x58] sm:$0xff]   ;;  %s3580_s16 = scalar_lea.vmem %s4104_s0, %s3310_s5  ;;  %v3349_v12 = vld [vmem:[%s4105_s1 + $0x50] sm:$0xff]   ;;  %vm1476_vm4 = vcmask 1045504   ;;  %vm1923_vm5 = vsmask.f32 5376 }
  0x10   : > { %3008 = vmatprep.subr.bf16.mxu1 %v3487_v1  ;;  %3022 = vmatprep.mubr.msk.bf16.mxu1 %vm3488_vm0, %v3487_v1  ;;  %v3355_v13 = vld [vmem:[%s3580_s16] sm:$0xff]   ;;  %v3356_v14 = vld [vmem:[%s3580_s16 + $0x8] sm:$0xff]   ;;  %v3360_v25 = vld [vmem:[%s3580_s16 + $0x10] sm:$0xff]   ;;  %vm2189_vm6 = vcmask 1044480   ;;  %s3311_s5 = smul.u32 40, %s4113_s12 }
  0x11   : > { %v510_v15 = vshll.u32 %v3355_v13, 16  ;;  %v3350_v16 = vld [vmem:[%s4105_s1 + $0x8] sm:$0xff]   ;;  %v508_v18 = vshrl.u32 %v3355_v13, 16  ;;  %v515_v20 = vshll.u32 %v3356_v14, 16  ;;  %v3352_v21 = vld [vmem:[%s4105_s1] sm:$0xff]   ;;  %v3357_v27 = vld [vmem:[%s4105_s1 + $0xb8] sm:$0xff]  }
  0x12   : > { %2973 = vmatpush3.bf16.msra.mxu0 %v3340_v3  ;;  %v3351_v17 = vld [vmem:[%s4105_s1 + $0x48] sm:$0xff]   ;;  %v3353_v22 = vld [vmem:[%s4105_s1 + $0x40] sm:$0xff]   ;;  %v519_v29 = vshrl.u32 %v3356_v14, 16  ;;  %v523_v30 = vshll.u32 %v3360_v25, 16  ;;  %v3361_v31 = vld [vmem:[%s4105_s1 + $0xf8] sm:$0xff]   ;;  %v527_v40 = vshrl.u32 %v3360_v25, 16  ;;  %s4075_s7 = scalar_lea.vmem %s4107_s3, %s3311_s5 }
  0x13   : > { %3009 = vmatpush3.bf16.msra.mxu1 %v3341_v4  ;;  %2974 = vmatprep.subr.bf16.mxu0 %v3487_v1  ;;  %v512_v19 = vrot.slane %v510_v15, 1  ;;  %v517_v24 = vrot.slane %v515_v20, 1  ;;  %v3354_v26 = vld [vmem:[%s3580_s16] sm:$0xff]   ;;  %v3358_v32 = vld [vmem:[%s4105_s1 + $0xb0] sm:$0xff]   ;;  %v3365_v35 = vld [vmem:[%s3580_s16 + $0x18] sm:$0xff]  }
  0x14   : > { %3010 = vmatprep.subr.bf16.mxu1 %v3487_v1  ;;  %v525_v34 = vrot.slane %v523_v30, 1  ;;  %v3363_v36 = vld [vmem:[%s4105_s1 + $0xf0] sm:$0xff]   ;;  %v3359_v37 = vld [vmem:[%s3580_s16 + $0x8] sm:$0xff]   ;;  %v531_v41 = vshll.u32 %v3365_v35, 16  ;;  %v3366_v43 = vld [vmem:[%s4105_s1 + $0xa0] sm:$0xff]   ;;  %v535_v51 = vshrl.u32 %v3365_v35, 16 }
  0x15   : > { %v513_v23 = vor.u32 %v512_v19, %v508_v18  ;;  %v521_v33 = vor.u32 %v519_v29, %v517_v24  ;;  %v3362_v38 = vld [vmem:[%s4105_s1 + $0xa8] sm:$0xff]   ;;  %v3371_v46 = vld [vmem:[%s3580_s16 + $0x20] sm:$0xff]   ;;  %v3364_v48 = vld [vmem:[%s3580_s16 + $0x10] sm:$0xff]  }
  0x16   : > { %2975 = vmatpush3.bf16.msra.mxu0 %v3342_v5  ;;  %v3367_v42 = vld [vmem:[%s4105_s1 + $0xe8] sm:$0xff]   ;;  %v529_v44 = vor.u32 %v527_v40, %v525_v34  ;;  %v533_v45 = vrot.slane %v531_v41, 1  ;;  %v3369_v47 = vld [vmem:[%s4105_s1 + $0xe0] sm:$0xff]   ;;  %v3368_v49 = vld [vmem:[%s4105_s1 + $0x98] sm:$0xff]   ;;  %v539_v52 = vshll.u32 %v3371_v46, 16  ;;  %v543_v60 = vshrl.u32 %v3371_v46, 16 }
  0x17   : > { %3011 = vmatpush3.bf16.msra.mxu1 %v3343_v6  ;;  %2976 = vmatprep.subr.bf16.mxu0 %v3487_v1  ;;  %v518_v28 = vsel %vm506_vm1, %v513_v23, %v517_v24  ;;  %v526_v39 = vsel %vm506_vm1, %v521_v33, %v525_v34  ;;  %v3372_v53 = vld [vmem:[%s4105_s1 + $0xd8] sm:$0xff]   ;;  %v3377_v54 = vld [vmem:[%s3580_s16 + $0x28] ss:$0 sps:$4 sm:$0x11]   ;;  %v3373_v55 = vld [vmem:[%s4105_s1 + $0x90] sm:$0xff]  }
  0x18   : > { %3012 = vmatprep.subr.bf16.mxu1 %v3487_v1  ;;  %v534_v50 = vsel %vm506_vm1, %v529_v44, %v533_v45  ;;  %v537_v56 = vor.u32 %v535_v51, %v533_v45  ;;  %v541_v57 = vrot.slane %v539_v52, 1  ;;  %v3374_v58 = vld [vmem:[%s4105_s1 + $0xd0] sm:$0xff]   ;;  %v3370_v59 = vld [vmem:[%s3580_s16 + $0x18] sm:$0xff]   ;;  %v3375_v62 = vld [vmem:[%s4105_s1 + $0x88] sm:$0xff]   ;;  %v547_v63 = vshll.u32 %v3377_v54, 16 }
  0x19   : > { %v3378_v0 = vld [vmem:[%s4105_s1 + $0xc8] sm:$0xff]   ;;  %v3379_v2 = vld [vmem:[%s4105_s1 + $0x80] sm:$0xff]   ;;  %v3388_v18 = vld [vmem:[%s3580_s16 + $0x14] sm:$0xff]  }
  0x1a   : > { %2977 = vmatpush3.bf16.msra.mxu0 %v3344_v7  ;;  %v542_v61 = vsel %vm506_vm1, %v537_v56, %v541_v57  ;;  %v3376_v3 = vld [vmem:[%s3580_s16 + $0x20] sm:$0xff]   ;;  %v545_v4 = vor.u32 %v543_v60, %v541_v57  ;;  %v549_v5 = vrot.slane %v547_v63, 1  ;;  %v3382_v7 = vld [vmem:[%s3580_s16 + $0x8] sm:$0xff]   ;;  %v990_v24 = vrot.slane %v3388_v18, 1  ;;  %v3400_v41 = vld [vmem:[%s4105_s1 + $0x158] sm:$0xff]  }
  0x1b   : > { %3013 = vmatpush3.bf16.msra.mxu1 %v3345_v8  ;;  %2978 = vmatprep.subr.bf16.mxu0 %v3487_v1  ;;  %v3380_v6 = vld [vmem:[%s4105_s1 + $0xc0] sm:$0xff]   ;;  %v765_v13 = vrot.slane %v3382_v7, 1  ;;  %v3390_v25 = vld [vmem:[%s4105_s1 + $0x128] sm:$0xff]   ;;  %v3402_v45 = vld [vmem:[%s4105_s1 + $0x150] sm:$0xff]  }
  0x1c   : > { %3014 = vmatprep.subr.bf16.mxu1 %v3487_v1  ;;  %v3381_v8 = vld [vmem:[%s3580_s16] sm:$0xfe]   ;;  %v3404_v46 = vld [vmem:[%s3580_s16 + $0x28] ss:$0 sps:$4 sm:$0x11]   ;;  %v3415_v63 = vld [vmem:[%s3580_s16 + $0x14] sm:$0xff]  }
  0x1d   : > { %v3393_v29 = vld [vmem:[%s3580_s16 + $0x1c] sm:$0xff]   ;;  %v3399_v40 = vld [vmem:[%s3580_s16 + $0x24] sm:$0xff]  }
  0x1e   : > { %2979 = vmatpush3.bf16.msra.mxu0 %v3346_v9  ;;  %v3384_v9 = vld [vmem:[%s3580_s16 + $0xc] sm:$0xff]   ;;  %v992_v33 = vrot.slane %v3393_v29, 1  ;;  %v3394_v34 = vld [vmem:[%s4105_s1 + $0x120] sm:$0xff]   ;;  %v994_v44 = vrot.slane %v3399_v40, 1 }
  0x1f   : > { %3015 = vmatpush3.bf16.msra.mxu1 %v3347_v10  ;;  %2980 = vmatprep.subr.bf16.mxu0 %v3487_v1  ;;  %v550_v10 = vsel %vm506_vm1, %v545_v4, %v549_v5  ;;  %v988_v15 = vrot.slane %v3384_v9, 1  ;;  %v3397_v35 = vld [vmem:[%s4105_s1 + $0x160] sm:$0xff]   ;;  %v3403_v52 = vld [vmem:[%s4105_s1 + $0x108] sm:$0xff]   ;;  %v1232_v9 = vshll.u32 %v3415_v63, 16 }
  0x20   : > { %3016 = vmatprep.subr.bf16.mxu1 %v3487_v1  ;;  %v995_v51 = vsel %vm763_vm2, %v992_v33, %v994_v44  ;;  %v3407_v56 = vld [vmem:[%s4105_s1 + $0x100] sm:$0xff]  }
  0x21   : > { %v991_v30 = vsel %vm763_vm2, %v988_v15, %v990_v24 }
  0x22   : > { %2981 = vmatpush3.bf16.msra.mxu0 %v3348_v11  ;;  %v3383_v11 = vld [vmem:[%s3580_s16 + $0x4] sm:$0xfe]  }
  0x23   : > { %3017 = vmatpush3.bf16.msra.mxu1 %v3349_v12  ;;  %2982 = vmatprep.subr.bf16.mxu0 %v3487_v1  ;;  %v764_v12 = vrot.slane %v3381_v8, 1  ;;  %v987_v14 = vrot.slane %v3383_v11, 1  ;;  %v1229_v8 = vshrl.u32 %v3415_v63, 16  ;;  %v3440_v63 = vld [vmem:[%s3580_s16 + $0x10] sm:$0xff]  }
  0x24   : > { %3018 = vmatprep.subr.bf16.mxu1 %v3487_v1 }
  0x25   : > { %v766_v19 = vsel %vm763_vm2, %v764_v12, %v765_v13  ;;  %v989_v20 = vsel %vm763_vm2, %v987_v14, %v988_v15  ;;  %v3413_v14 = vld [vmem:[%s4105_s1 + $0x1b8] sm:$0xff]   ;;  %v1231_v15 = vrot.slane %v1229_v8, 1  ;;  %v1936_v8 = vshll.u32 %v3440_v63, 16 }
  0x26   : > { %2983 = vmatpush3.bf16.msra.mxu0 %v3350_v16  ;;  %v3385_v16 = vld [vmem:[%s4105_s1 + $0x138] sm:$0xff]  }
  0x27   : > { %3019 = vmatpush3.bf16.msra.mxu1 %v3351_v17  ;;  %2984 = vmatprep.subr.bf16.mxu0 %v3487_v1  ;;  %v3387_v17 = vld [vmem:[%s3580_s16 + $0x10] sm:$0xff]  }
  0x28   : > { %3020 = vmatprep.subr.bf16.mxu1 %v3487_v1  ;;  %v767_v23 = vrot.slane %v3387_v17, 1  ;;  %v3420_v17 = vld [vmem:[%s3580_s16 + $0x1c] sm:$0xff]  }
  0x2a   : > { %2985 = vmatpush3.bf16.msra.mxu0 %v3352_v21  ;;  %v3389_v21 = vld [vmem:[%s4105_s1 + $0x178] sm:$0xff]  }
  0x2b   : > { %3021 = vmatpush3.bf16.msra.mxu1 %v3353_v22  ;;  %3042 = vmatprep.subr.bf16.mxu0 %v3487_v1  ;;  %v3386_v22 = vld [vmem:[%s4105_s1 + $0x130] sm:$0xff]  }
  0x2c   : > { %3078 = vmatprep.subr.bf16.mxu1 %v3487_v1 }
  0x2d   : > { %2987 = vmatmul.mubr.bf16.vlgmr.msra.gmra.mxu0 %v3354_v26  ;;  %v3391_v26 = vld [vmem:[%s4105_s1 + $0x170] sm:$0xff]  }
  0x2e   : > { %3023 = vmatmul.mubr.bf16.vlgmr.msra.gmra.mxu1 %v518_v28  ;;  %3043 = vmatpush3.bf16.msra.mxu0 %v3357_v27  ;;  %v3392_v27 = vld [vmem:[%s3580_s16 + $0x18] sm:$0xff]   ;;  %v768_v28 = vsel %vm763_vm2, %v765_v13, %v767_v23 }
  0x2f   : > { %3044 = vmatprep.subr.bf16.mxu0 %v3487_v1  ;;  %2990 = vmatprep.mubr.msk.bf16.mxu0 %vm3488_vm0, %v3487_v1 }
  0x30   : > { %3026 = vmatprep.mubr.msk.bf16.mxu1 %vm3488_vm0, %v3487_v1  ;;  %3079 = vmatpush3.bf16.msra.mxu1 %v3361_v31  ;;  %v3395_v31 = vld [vmem:[%s4105_s1 + $0x168] sm:$0xff]  }
  0x31   : > { %3080 = vmatprep.subr.bf16.mxu1 %v3487_v1 }
  0x32   : > { %3045 = vmatpush3.bf16.msra.mxu0 %v3358_v32  ;;  %v769_v32 = vrot.slane %v3392_v27, 1  ;;  %v3419_v27 = vld [vmem:[%s4105_s1 + $0x1f0] sm:$0xff]  }
  0x33   : > { %3046 = vmatprep.subr.bf16.mxu0 %v3487_v1 }
  0x34   : > { %3081 = vmatpush3.bf16.msra.mxu1 %v3363_v36  ;;  %v770_v36 = vsel %vm763_vm2, %v767_v23, %v769_v32  ;;  %v3414_v23 = vld [vmem:[%s4105_s1 + $0x1b0] sm:$0xff]  }
  0x35   : > { %2991 = vmatmul.mubr.bf16.gmra.mxu0 %v3359_v37  ;;  %3082 = vmatprep.subr.bf16.mxu1 %v3487_v1  ;;  %v3396_v37 = vld [vmem:[%s4105_s1 + $0x118] sm:$0xff]  }
  0x36   : > { %3027 = vmatmul.mubr.bf16.gmra.mxu1 %v526_v39  ;;  %3047 = vmatpush3.bf16.msra.mxu0 %v3362_v38  ;;  %v3398_v38 = vld [vmem:[%s3580_s16 + $0x20] sm:$0xff]   ;;  %v993_v39 = vsel %vm763_vm2, %v990_v24, %v992_v33 }
  0x37   : > { %2994 = vmatprep.mubr.msk.bf16.mxu0 %vm3488_vm0, %v3487_v1  ;;  %3030 = vmatprep.mubr.msk.bf16.mxu1 %vm3488_vm0, %v3487_v1 }
  0x38   : > { %3048 = vmatprep.subr.bf16.mxu0 %v3487_v1  ;;  %3083 = vmatpush3.bf16.msra.mxu1 %v3367_v42  ;;  %v771_v42 = vrot.slane %v3398_v38, 1 }
  0x39   : > { %3084 = vmatprep.subr.bf16.mxu1 %v3487_v1 }
  0x3a   : > { %3049 = vmatpush3.bf16.msra.mxu0 %v3366_v43  ;;  %v3401_v43 = vld [vmem:[%s4105_s1 + $0x110] sm:$0xff]  }
  0x3b   : > { %3050 = vmatprep.subr.bf16.mxu0 %v3487_v1 }
  0x3c   : > { %3085 = vmatpush3.bf16.msra.mxu1 %v3369_v47  ;;  %v3410_v47 = vld [vmem:[%s3580_s16 + $0xc] sm:$0xff]  }
  0x3d   : > { %2995 = vmatmul.mubr.bf16.gmra.mxu0 %v3364_v48  ;;  %3086 = vmatprep.subr.bf16.mxu1 %v3487_v1  ;;  %v3405_v48 = vld [vmem:[%s3580_s16 + $0x2c] ss:$0 sps:$4 sm:$0x11]   ;;  %v1220_v54 = vshrl.u32 %v3410_v47, 16  ;;  %v1223_v57 = vshll.u32 %v3410_v47, 16 }
  0x3e   : > { %3031 = vmatmul.mubr.bf16.gmra.mxu1 %v534_v50  ;;  %3051 = vmatpush3.bf16.msra.mxu0 %v3368_v49  ;;  %v772_v49 = vsel %vm763_vm2, %v769_v32, %v771_v42  ;;  %v3409_v50 = vld [vmem:[%s3580_s16 + $0x4] sm:$0xfe]   ;;  %v996_v60 = vrot.slane %v3405_v48, 1 }
  0x3f   : > { %2998 = vmatprep.mubr.msk.bf16.mxu0 %vm3488_vm0, %v3487_v1  ;;  %3034 = vmatprep.mubr.msk.bf16.mxu1 %vm3488_vm0, %v3487_v1  ;;  %v1225_v5 = vrot.slane %v1223_v57, 2  ;;  %v3426_v32 = vld [vmem:[%s3580_s16 + $0x24] sm:$0xff]  }
  0x40   : > { %3052 = vmatprep.subr.bf16.mxu0 %v3487_v1  ;;  %3087 = vmatpush3.bf16.msra.mxu1 %v3372_v53  ;;  %v3406_v53 = vld [vmem:[%s4105_s1 + $0x148] sm:$0xff]   ;;  %v997_v7 = vsel %vm763_vm2, %v994_v44, %v996_v60  ;;  %v1247_v38 = vshrl.u32 %v3426_v32, 16 }
  0x41   : > { %3088 = vmatprep.subr.bf16.mxu1 %v3487_v1  ;;  %v3427_v48 = vld [vmem:[%s3580_s16 + $0x24] sm:$0xff]  }
  0x42   : > { %3053 = vmatpush3.bf16.msra.mxu0 %v3373_v55  ;;  %v773_v55 = vrot.slane %v3404_v46, 1 }
  0x43   : > { %3054 = vmatprep.subr.bf16.mxu0 %v3487_v1 }
  0x44   : > { %3089 = vmatpush3.bf16.msra.mxu1 %v3374_v58  ;;  %v1212_v58 = vshrl.u32 %v3409_v50, 16 }
  0x45   : > { %2999 = vmatmul.mubr.bf16.gmra.mxu0 %v3370_v59  ;;  %3090 = vmatprep.subr.bf16.mxu1 %v3487_v1  ;;  %v1215_v59 = vshll.u32 %v3409_v50, 16 }
  0x46   : > { %3035 = vmatmul.mubr.bf16.gmra.mxu1 %v542_v61  ;;  %3002 = vmatprep.mubr.msk.bf16.mxu0 %vm3488_vm0, %v3487_v1  ;;  %v3408_v61 = vld [vmem:[%s4105_s1 + $0x140] sm:$0xff]  }
  0x47   : > { %3038 = vmatprep.mubr.msk.bf16.mxu1 %vm3488_vm0, %v3487_v1  ;;  %3055 = vmatpush3.bf16.msra.mxu0 %v3375_v62  ;;  %v1222_v62 = vrot.slane %v1220_v54, 1  ;;  %v1217_v4 = vrot.slane %v1215_v59, 2  ;;  %v1484_v54 = vrot.slane %v3427_v48, 2  ;;  %v3433_v59 = vld [vmem:[%s3580_s16 + $0x2c] ss:$0 sps:$4 sm:$0x33]  }
  0x48   : > { %3091 = vmatpush3.bf16.msra.mxu1 %v3378_v0  ;;  %3056 = vmatprep.subr.bf16.mxu0 %v3487_v1  ;;  %v3411_v0 = vld [vmem:[%s3580_s16 + $0x4] sm:$0xfc]  }
  0x49   : > { %3092 = vmatprep.subr.bf16.mxu1 %v3487_v1  ;;  %v1226_v11 = vor.u32 %v1225_v5, %v1222_v62  ;;  %v1477_v12 = vrot.slane %v3411_v0, 2  ;;  %v3439_v62 = vld [vmem:[%s3580_s16 + $0x8] sm:$0xfc]  }
  0x4a   : > { %v3434_v0 = vld [vmem:[%s4105_s1 + $0x1c8] sm:$0xff]   ;;  %v1925_v5 = vshrl.u32 %v3439_v62, 16 }
  0x4b   : > { %3057 = vmatpush3.bf16.msra.mxu0 %v3379_v2  ;;  %v774_v2 = vsel %vm763_vm2, %v771_v42, %v773_v55  ;;  %v3424_v42 = vld [vmem:[%s4105_s1 + $0x198] sm:$0xff]   ;;  %v3430_v55 = vld [vmem:[%s4105_s1 + $0x1d0] sm:$0xff]  }
  0x4c   : > { %3093 = vmatpush3.bf16.msra.mxu1 %v3380_v6  ;;  %3114 = vmatprep.subr.bf16.mxu0 %v3487_v1  ;;  %v3412_v6 = vld [vmem:[%s3580_s16 + $0xc] sm:$0xff]  }
  0x4d   : > { %3003 = vmatmul.mubr.bf16.gmra.mxu0 %v3376_v3  ;;  %3150 = vmatprep.subr.bf16.mxu1 %v3487_v1  ;;  %v1214_v3 = vrot.slane %v1212_v58, 1  ;;  %v1478_v13 = vrot.slane %v3412_v6, 2  ;;  %v1928_v6 = vshll.u32 %v3439_v62, 16  ;;  %v3454_v62 = vld [vmem:[%s3580_s16 + $0x30] ss:$0 sps:$4 sm:$0x33]  }
  0x4e   : > { %3039 = vmatmul.mubr.bf16.gmra.mxu1 %v550_v10  ;;  %3058 = vmatprep.mubr.msk.bf16.mxu0 %vm3488_vm0, %v3487_v1 }
  0x4f   : > { %3094 = vmatprep.mubr.msk.bf16.mxu1 %vm3488_vm0, %v3487_v1  ;;  %v1218_v10 = vor.u32 %v1217_v4, %v1214_v3  ;;  %v1486_v3 = vrot.slane %v3433_v59, 2  ;;  %v3435_v4 = vld [vmem:[%s4105_s1 + $0x180] sm:$0xff]  }
  0x51   : > { %v1227_v18 = vsel %vm1210_vm3, %v1218_v10, %v1226_v11 }
  0x55   : > { %3059 = vmatmul.mubr.bf16.vlgmr.msra.gmra.mxu0 %v766_v19  ;;  %v1479_v19 = vsel %vm1476_vm4, %v1477_v12, %v1478_v13  ;;  %v3437_v12 = vld [vmem:[%s3580_s16 + $0x8] sm:$0xfc]  }
  0x56   : > { %3095 = vmatmul.mubr.bf16.vlgmr.msra.gmra.mxu1 %v989_v20  ;;  %3115 = vmatpush3.bf16.msra.mxu0 %v3385_v16  ;;  %v1234_v16 = vrot.slane %v1232_v9, 2  ;;  %v3416_v20 = vld [vmem:[%s3580_s16 + $0x14] sm:$0xff]   ;;  %v3436_v9 = vld [vmem:[%s4105_s1 + $0x1c0] sm:$0xff]  }
  0x57   : > { %3116 = vmatprep.subr.bf16.mxu0 %v3487_v1  ;;  %3062 = vmatprep.mubr.msk.bf16.mxu0 %vm3488_vm0, %v3487_v1 }
  0x58   : > { %3098 = vmatprep.mubr.msk.bf16.mxu1 %vm3488_vm0, %v3487_v1  ;;  %3151 = vmatpush3.bf16.msra.mxu1 %v3389_v21  ;;  %v3417_v21 = vld [vmem:[%s4105_s1 + $0x1f8] sm:$0xff]   ;;  %v1235_v24 = vor.u32 %v1234_v16, %v1231_v15  ;;  %v1930_v15 = vrot.slane %v1928_v6, 3  ;;  %v3456_v6 = vld [vmem:[%s4105_s1 + $0x200] sm:$0xff]  }
  0x59   : > { %3152 = vmatprep.subr.bf16.mxu1 %v3487_v1 }
  0x5a   : > { %3117 = vmatpush3.bf16.msra.mxu0 %v3386_v22  ;;  %v1238_v22 = vshrl.u32 %v3420_v17, 16 }
  0x5b   : > { %3118 = vmatprep.subr.bf16.mxu0 %v3487_v1 }
  0x5c   : > { %3153 = vmatpush3.bf16.msra.mxu1 %v3391_v26  ;;  %v1480_v26 = vrot.slane %v3416_v20, 2  ;;  %v1240_v29 = vrot.slane %v1238_v22, 1 }
  0x5d   : > { %3063 = vmatmul.mubr.bf16.gmra.mxu0 %v768_v28  ;;  %3154 = vmatprep.subr.bf16.mxu1 %v3487_v1  ;;  %v3418_v28 = vld [vmem:[%s4105_s1 + $0x1a8] sm:$0xff]  }
  0x5e   : > { %3099 = vmatmul.mubr.bf16.gmra.mxu1 %v991_v30  ;;  %3119 = vmatpush3.bf16.msra.mxu0 %v3390_v25  ;;  %v1241_v25 = vshll.u32 %v3420_v17, 16  ;;  %v1236_v30 = vsel %vm1210_vm3, %v1226_v11, %v1235_v24  ;;  %v1481_v33 = vsel %vm1476_vm4, %v1478_v13, %v1480_v26  ;;  %v1487_v11 = vsel %vm1476_vm4, %v1484_v54, %v1486_v3  ;;  %v3438_v13 = vld [vmem:[%s3580_s16 + $0x10] sm:$0xff]  }
  0x5f   : > { %3066 = vmatprep.mubr.msk.bf16.mxu0 %vm3488_vm0, %v3487_v1  ;;  %3102 = vmatprep.mubr.msk.bf16.mxu1 %vm3488_vm0, %v3487_v1  ;;  %v1938_v17 = vrot.slane %v1936_v8, 3  ;;  %v1701_v20 = vrot.slane %v3438_v13, 2  ;;  %v3457_v8 = vld [vmem:[%s3580_s16 + $0x8] sm:$0xf8]  }
  0x60   : > { %3120 = vmatprep.subr.bf16.mxu0 %v3487_v1  ;;  %3155 = vmatpush3.bf16.msra.mxu1 %v3395_v31  ;;  %v1243_v31 = vrot.slane %v1241_v25, 2  ;;  %v2190_v13 = vrot.slane %v3457_v8, 3 }
  0x61   : > { %3156 = vmatprep.subr.bf16.mxu1 %v3487_v1 }
  0x62   : > { %3121 = vmatpush3.bf16.msra.mxu0 %v3394_v34  ;;  %v3421_v34 = vld [vmem:[%s3580_s16 + $0x1c] sm:$0xff]  }
  0x63   : > { %3122 = vmatprep.subr.bf16.mxu0 %v3487_v1  ;;  %v1482_v40 = vrot.slane %v3421_v34, 2 }
  0x64   : > { %3157 = vmatpush3.bf16.msra.mxu1 %v3397_v35  ;;  %v3423_v35 = vld [vmem:[%s4105_s1 + $0x1e8] sm:$0xff]  }
  0x65   : > { %3067 = vmatmul.mubr.bf16.gmra.mxu0 %v770_v36  ;;  %3158 = vmatprep.subr.bf16.mxu1 %v3487_v1  ;;  %v1244_v36 = vor.u32 %v1243_v31, %v1240_v29  ;;  %v1483_v47 = vsel %vm1476_vm4, %v1480_v26, %v1482_v40  ;;  %v1485_v60 = vsel %vm1476_vm4, %v1482_v40, %v1484_v54  ;;  %v3441_v26 = vld [vmem:[%s4105_s1 + $0x238] sm:$0xff]   ;;  %v3447_v31 = vld [vmem:[%s3580_s16 + $0x20] sm:$0xff]  }
  0x66   : > { %3103 = vmatmul.mubr.bf16.gmra.mxu1 %v993_v39  ;;  %3123 = vmatpush3.bf16.msra.mxu0 %v3396_v37  ;;  %v3422_v37 = vld [vmem:[%s4105_s1 + $0x1a0] sm:$0xff]   ;;  %v1250_v39 = vshll.u32 %v3426_v32, 16  ;;  %v3442_v32 = vld [vmem:[%s4105_s1 + $0x230] sm:$0xff]  }
  0x67   : > { %3070 = vmatprep.mubr.msk.bf16.mxu0 %vm3488_vm0, %v3487_v1  ;;  %3106 = vmatprep.mubr.msk.bf16.mxu1 %vm3488_vm0, %v3487_v1  ;;  %v1245_v44 = vsel %vm1210_vm3, %v1235_v24, %v1244_v36 }
  0x68   : > { %3124 = vmatprep.subr.bf16.mxu0 %v3487_v1  ;;  %3159 = vmatpush3.bf16.msra.mxu1 %v3400_v41  ;;  %v3425_v41 = vld [vmem:[%s4105_s1 + $0x1e0] sm:$0xff]   ;;  %v1252_v46 = vrot.slane %v1250_v39, 2 }
  0x69   : > { %3160 = vmatprep.subr.bf16.mxu1 %v3487_v1  ;;  %v3446_v39 = vld [vmem:[%s3580_s16 + $0x20] sm:$0xff]  }
  0x6a   : > { %3125 = vmatpush3.bf16.msra.mxu0 %v3401_v43  ;;  %v3432_v43 = vld [vmem:[%s3580_s16 + $0x2c] ss:$0 sps:$4 sm:$0x33]  }
  0x6b   : > { %3126 = vmatprep.subr.bf16.mxu0 %v3487_v1 }
  0x6c   : > { %3161 = vmatpush3.bf16.msra.mxu1 %v3402_v45  ;;  %v1249_v45 = vrot.slane %v1247_v38, 1  ;;  %v3445_v38 = vld [vmem:[%s4105_s1 + $0x228] sm:$0xff]  }
  0x6d   : > { %3071 = vmatmul.mubr.bf16.gmra.mxu0 %v772_v49  ;;  %3162 = vmatprep.subr.bf16.mxu1 %v3487_v1  ;;  %v3428_v49 = vld [vmem:[%s4105_s1 + $0x1d8] sm:$0xff]  }
  0x6e   : > { %3107 = vmatmul.mubr.bf16.gmra.mxu1 %v995_v51  ;;  %3074 = vmatprep.mubr.msk.bf16.mxu0 %vm3488_vm0, %v3487_v1  ;;  %v1253_v50 = vor.u32 %v1252_v46, %v1249_v45  ;;  %v3429_v51 = vld [vmem:[%s4105_s1 + $0x190] sm:$0xff]   ;;  %v3448_v45 = vld [vmem:[%s4105_s1 + $0x220] sm:$0xff]  }
  0x6f   : > { %3110 = vmatprep.mubr.msk.bf16.mxu1 %vm3488_vm0, %v3487_v1  ;;  %3127 = vmatpush3.bf16.msra.mxu0 %v3403_v52  ;;  %v1256_v52 = vshrl.u32 %v3432_v43, 16 }
  0x70   : > { %3163 = vmatpush3.bf16.msra.mxu1 %v3406_v53  ;;  %3128 = vmatprep.subr.bf16.mxu0 %v3487_v1  ;;  %v1259_v53 = vshll.u32 %v3432_v43, 16  ;;  %v3451_v43 = vld [vmem:[%s3580_s16 + $0x28] sm:$0xff]  }
  0x71   : > { %3164 = vmatprep.subr.bf16.mxu1 %v3487_v1  ;;  %v1258_v57 = vrot.slane %v1256_v52, 1  ;;  %v1963_v48 = vshll.u32 %v3451_v43, 16 }
  0x72   : > { %v1261_v58 = vrot.slane %v1259_v53, 2 }
  0x73   : > { %3129 = vmatpush3.bf16.msra.mxu0 %v3407_v56  ;;  %v1254_v56 = vsel %vm1210_vm3, %v1244_v36, %v1253_v50  ;;  %v1954_v36 = vshll.u32 %v3447_v31, 16  ;;  %v1965_v54 = vrot.slane %v1963_v48, 3 }
  0x74   : > { %3165 = vmatpush3.bf16.msra.mxu1 %v3408_v61  ;;  %3186 = vmatprep.subr.bf16.mxu0 %v3487_v1  ;;  %v3431_v61 = vld [vmem:[%s4105_s1 + $0x188] sm:$0xff]  }
  0x75   : > { %3075 = vmatmul.mubr.bf16.gmra.mxu0 %v774_v2  ;;  %3222 = vmatprep.subr.bf16.mxu1 %v3487_v1  ;;  %v1262_v2 = vor.u32 %v1261_v58, %v1258_v57  ;;  %v3452_v57 = vld [vmem:[%s4105_s1 + $0x210] sm:$0xff]  }
  0x76   : > { %3111 = vmatmul.mubr.bf16.gmra.mxu1 %v997_v7  ;;  %3130 = vmatprep.mubr.msk.bf16.mxu0 %vm3488_vm0, %v3487_v1  ;;  %v1933_v7 = vshrl.u32 %v3440_v63, 16 }
  0x77   : > { %3166 = vmatprep.mubr.msk.bf16.mxu1 %vm3488_vm0, %v3487_v1  ;;  %v1263_v10 = vsel %vm1210_vm3, %v1253_v50, %v1262_v2  ;;  %v3449_v50 = vld [vmem:[%s4105_s1 + $0x218] sm:$0xff]  }
  0x78   : > { %v1935_v16 = vrot.slane %v1933_v7, 2 }
  0x7a   : > { %v1939_v22 = vor.u32 %v1938_v17, %v1935_v16 }
  0x7d   : > { %3131 = vmatmul.mubr.bf16.vlgmr.msra.gmra.mxu0 %v1227_v18  ;;  %v3444_v18 = vld [vmem:[%s3580_s16 + $0x18] sm:$0xff]  }
  0x7e   : > { %3167 = vmatmul.mubr.bf16.vlgmr.msra.gmra.mxu1 %v1479_v19  ;;  %3187 = vmatpush3.bf16.msra.mxu0 %v3413_v14  ;;  %v1927_v14 = vrot.slane %v1925_v5, 2  ;;  %v1700_v19 = vrot.slane %v3437_v12, 2  ;;  %v1945_v24 = vshll.u32 %v3444_v18, 16  ;;  %v3460_v12 = vld [vmem:[%s3580_s16 + $0x28] sm:$0xff]  }
  0x7f   : > { %3188 = vmatprep.subr.bf16.mxu0 %v3487_v1  ;;  %3134 = vmatprep.mubr.msk.bf16.mxu0 %vm3488_vm0, %v3487_v1  ;;  %v2197_v16 = vrot.slane %v3460_v12, 3 }
  0x80   : > { %3170 = vmatprep.mubr.msk.bf16.mxu1 %vm3488_vm0, %v3487_v1  ;;  %3223 = vmatpush3.bf16.msra.mxu1 %v3417_v21  ;;  %v1931_v21 = vor.u32 %v1930_v15, %v1927_v14  ;;  %v1702_v25 = vsel %vm1476_vm4, %v1700_v19, %v1701_v20 }
  0x81   : > { %3224 = vmatprep.subr.bf16.mxu1 %v3487_v1 }
  0x82   : > { %3189 = vmatpush3.bf16.msra.mxu0 %v3414_v23  ;;  %v1942_v23 = vshrl.u32 %v3444_v18, 16  ;;  %v3461_v18 = vld [vmem:[%s3580_s16 + $0x18] sm:$0xff]  }
  0x83   : > { %3190 = vmatprep.subr.bf16.mxu0 %v3487_v1 }
  0x84   : > { %3225 = vmatpush3.bf16.msra.mxu1 %v3419_v27  ;;  %v3443_v27 = vld [vmem:[%s3580_s16 + $0x18] sm:$0xff]   ;;  %v1944_v29 = vrot.slane %v1942_v23, 2 }
  0x85   : > { %3135 = vmatmul.mubr.bf16.gmra.mxu0 %v1236_v30  ;;  %3226 = vmatprep.subr.bf16.mxu1 %v3487_v1  ;;  %v1947_v30 = vrot.slane %v1945_v24, 3 }
  0x86   : > { %3171 = vmatmul.mubr.bf16.gmra.mxu1 %v1481_v33  ;;  %3191 = vmatpush3.bf16.msra.mxu0 %v3418_v28  ;;  %v1940_v28 = vsel %vm1923_vm5, %v1931_v21, %v1939_v22  ;;  %v1703_v33 = vrot.slane %v3443_v27, 2  ;;  %v2193_v21 = vrot.slane %v3461_v18, 3 }
  0x87   : > { %3138 = vmatprep.mubr.msk.bf16.mxu0 %vm3488_vm0, %v3487_v1  ;;  %3174 = vmatprep.mubr.msk.bf16.mxu1 %vm3488_vm0, %v3487_v1  ;;  %v1948_v34 = vor.u32 %v1947_v30, %v1944_v29 }
  0x88   : > { %3192 = vmatprep.subr.bf16.mxu0 %v3487_v1  ;;  %3227 = vmatpush3.bf16.msra.mxu1 %v3423_v35  ;;  %v1951_v35 = vshrl.u32 %v3447_v31, 16 }
  0x89   : > { %3228 = vmatprep.subr.bf16.mxu1 %v3487_v1  ;;  %v1949_v40 = vsel %vm1923_vm5, %v1939_v22, %v1948_v34 }
  0x8a   : > { %3193 = vmatpush3.bf16.msra.mxu0 %v3422_v37  ;;  %v1704_v37 = vsel %vm1476_vm4, %v1701_v20, %v1703_v33  ;;  %v3462_v20 = vld [vmem:[%s3580_s16 + $0x30] ss:$0 sps:$4 sm:$0x77]  }
  0x8b   : > { %3194 = vmatprep.subr.bf16.mxu0 %v3487_v1  ;;  %v2199_v22 = vrot.slane %v3462_v20, 3 }
  0x8c   : > { %3229 = vmatpush3.bf16.msra.mxu1 %v3425_v41  ;;  %v1953_v41 = vrot.slane %v1951_v35, 2 }
  0x8d   : > { %3139 = vmatmul.mubr.bf16.gmra.mxu0 %v1245_v44  ;;  %3230 = vmatprep.subr.bf16.mxu1 %v3487_v1  ;;  %v1705_v44 = vrot.slane %v3446_v39, 2  ;;  %v2200_v24 = vsel %vm2189_vm6, %v2197_v16, %v2199_v22 }
  0x8e   : > { %3175 = vmatmul.mubr.bf16.gmra.mxu1 %v1483_v47  ;;  %3195 = vmatpush3.bf16.msra.mxu0 %v3424_v42  ;;  %v1956_v42 = vrot.slane %v1954_v36, 3  ;;  %v1960_v47 = vshrl.u32 %v3451_v43, 16 }
  0x8f   : > { %3142 = vmatprep.mubr.msk.bf16.mxu0 %vm3488_vm0, %v3487_v1  ;;  %3178 = vmatprep.mubr.msk.bf16.mxu1 %vm3488_vm0, %v3487_v1 }
  0x90   : > { %3196 = vmatprep.subr.bf16.mxu0 %v3487_v1  ;;  %3231 = vmatpush3.bf16.msra.mxu1 %v3428_v49  ;;  %v1957_v46 = vor.u32 %v1956_v42, %v1953_v41  ;;  %v1706_v49 = vsel %vm1476_vm4, %v1703_v33, %v1705_v44  ;;  %v1962_v53 = vrot.slane %v1960_v47, 2 }
  0x91   : > { %3232 = vmatprep.subr.bf16.mxu1 %v3487_v1 }
  0x92   : > { %3197 = vmatpush3.bf16.msra.mxu0 %v3429_v51  ;;  %v3450_v51 = vld [vmem:[%s3580_s16 + $0x28] sm:$0xff]   ;;  %v1958_v52 = vsel %vm1923_vm5, %v1948_v34, %v1957_v46  ;;  %v1966_v58 = vor.u32 %v1965_v54, %v1962_v53 }
  0x93   : > { %3198 = vmatprep.subr.bf16.mxu0 %v3487_v1 }
  0x94   : > { %3233 = vmatpush3.bf16.msra.mxu1 %v3430_v55  ;;  %v3455_v55 = vld [vmem:[%s3580_s16 + $0x30] ss:$0 sps:$4 sm:$0x77]   ;;  %v1967_v63 = vsel %vm1923_vm5, %v1957_v46, %v1966_v58 }
  0x95   : > { %3143 = vmatmul.mubr.bf16.gmra.mxu0 %v1254_v56  ;;  %3234 = vmatprep.subr.bf16.mxu1 %v3487_v1  ;;  %v1707_v56 = vrot.slane %v3450_v51, 2  ;;  %v1969_v59 = vshrl.u32 %v3455_v55, 16 }
  0x96   : > { %3179 = vmatmul.mubr.bf16.gmra.mxu1 %v1485_v60  ;;  %3146 = vmatprep.mubr.msk.bf16.mxu0 %vm3488_vm0, %v3487_v1  ;;  %v1972_v60 = vshll.u32 %v3455_v55, 16 }
  0x97   : > { %3182 = vmatprep.mubr.msk.bf16.mxu1 %vm3488_vm0, %v3487_v1  ;;  %3199 = vmatpush3.bf16.msra.mxu0 %v3431_v61  ;;  %v1708_v61 = vsel %vm1476_vm4, %v1705_v44, %v1707_v56  ;;  %v1971_v2 = vrot.slane %v1969_v59, 2 }
  0x98   : > { %3235 = vmatpush3.bf16.msra.mxu1 %v3434_v0  ;;  %3200 = vmatprep.subr.bf16.mxu0 %v3487_v1  ;;  %v3453_v0 = vld [vmem:[%s4105_s1 + $0x208] sm:$0xff]   ;;  %v1974_v3 = vrot.slane %v1972_v60, 3 }
  0x99   : > { %3236 = vmatprep.subr.bf16.mxu1 %v3487_v1 }
  0x9a   : > { %v1975_v5 = vor.u32 %v1974_v3, %v1971_v2 }
  0x9b   : > { %3201 = vmatpush3.bf16.msra.mxu0 %v3435_v4  ;;  %v1709_v4 = vrot.slane %v3454_v62, 2 }
  0x9c   : > { %3237 = vmatpush3.bf16.msra.mxu1 %v3436_v9  ;;  %3258 = vmatprep.subr.bf16.mxu0 %v3487_v1  ;;  %v3458_v9 = vld [vmem:[%s3580_s16 + $0x10] sm:$0xff]  }
  0x9d   : > { %3147 = vmatmul.mubr.bf16.gmra.mxu0 %v1263_v10  ;;  %3294 = vmatprep.subr.bf16.mxu1 %v3487_v1  ;;  %v1710_v7 = vsel %vm1476_vm4, %v1707_v56, %v1709_v4  ;;  %v1976_v10 = vsel %vm1923_vm5, %v1966_v58, %v1975_v5  ;;  %v2191_v14 = vrot.slane %v3458_v9, 3 }
  0x9e   : > { %3183 = vmatmul.mubr.bf16.gmra.mxu1 %v1487_v11  ;;  %3202 = vmatprep.mubr.msk.bf16.mxu0 %vm3488_vm0, %v3487_v1  ;;  %v3459_v11 = vld [vmem:[%s3580_s16 + $0x20] sm:$0xff]  }
  0x9f   : > { %3238 = vmatprep.mubr.msk.bf16.mxu1 %vm3488_vm0, %v3487_v1  ;;  %v2195_v15 = vrot.slane %v3459_v11, 3  ;;  %v2192_v17 = vsel %vm2189_vm6, %v2190_v13, %v2191_v14  ;;  %v2194_v23 = vsel %vm2189_vm6, %v2191_v14, %v2193_v21 }
  0xa1   : > { %v2198_v19 = vsel %vm2189_vm6, %v2195_v15, %v2197_v16 }
  0xa5   : > { %3203 = vmatmul.mubr.bf16.vlgmr.msra.gmra.mxu0 %v1702_v25  ;;  %v2196_v25 = vsel %vm2189_vm6, %v2193_v21, %v2195_v15 }
  0xa6   : > { %3239 = vmatmul.mubr.bf16.vlgmr.msra.gmra.mxu1 %v1940_v28  ;;  %3259 = vmatpush3.bf16.msra.mxu0 %v3441_v26 }
  0xa7   : > { %3260 = vmatprep.subr.bf16.mxu0 %v3487_v1  ;;  %3206 = vmatprep.mubr.msk.bf16.mxu0 %vm3488_vm0, %v3487_v1 }
  0xa8   : > { %3242 = vmatprep.mubr.msk.bf16.mxu1 %vm3488_vm0, %v3487_v1  ;;  %3302 = vmatpush3.bf16.msra.mxu1 %v3441_v26 }
  0xa9   : > { %3295 = vmatprep.subr.bf16.mxu1 %v3487_v1 }
  0xaa   : > { %3261 = vmatpush3.bf16.msra.mxu0 %v3442_v32 }
  0xab   : > { %3262 = vmatprep.subr.bf16.mxu0 %v3487_v1 }
  0xac   : > { %3303 = vmatpush3.bf16.msra.mxu1 %v3442_v32 }
  0xad   : > { %3207 = vmatmul.mubr.bf16.gmra.mxu0 %v1704_v37  ;;  %3296 = vmatprep.subr.bf16.mxu1 %v3487_v1 }
  0xae   : > { %3243 = vmatmul.mubr.bf16.gmra.mxu1 %v1949_v40  ;;  %3263 = vmatpush3.bf16.msra.mxu0 %v3445_v38 }
  0xaf   : > { %3210 = vmatprep.mubr.msk.bf16.mxu0 %vm3488_vm0, %v3487_v1  ;;  %3246 = vmatprep.mubr.msk.bf16.mxu1 %vm3488_vm0, %v3487_v1 }
  0xb0   : > { %3264 = vmatprep.subr.bf16.mxu0 %v3487_v1  ;;  %3304 = vmatpush3.bf16.msra.mxu1 %v3445_v38 }
  0xb1   : > { %3297 = vmatprep.subr.bf16.mxu1 %v3487_v1 }
  0xb2   : > { %3265 = vmatpush3.bf16.msra.mxu0 %v3448_v45 }
  0xb3   : > { %3266 = vmatprep.subr.bf16.mxu0 %v3487_v1 }
  0xb4   : > { %3305 = vmatpush3.bf16.msra.mxu1 %v3448_v45 }
  0xb5   : > { %3211 = vmatmul.mubr.bf16.gmra.mxu0 %v1706_v49  ;;  %3298 = vmatprep.subr.bf16.mxu1 %v3487_v1 }
  0xb6   : > { %3247 = vmatmul.mubr.bf16.gmra.mxu1 %v1958_v52  ;;  %3267 = vmatpush3.bf16.msra.mxu0 %v3449_v50 }
  0xb7   : > { %3214 = vmatprep.mubr.msk.bf16.mxu0 %vm3488_vm0, %v3487_v1  ;;  %3250 = vmatprep.mubr.msk.bf16.mxu1 %vm3488_vm0, %v3487_v1 }
  0xb8   : > { %3306 = vmatpush3.bf16.msra.mxu1 %v3449_v50  ;;  %3268 = vmatprep.subr.bf16.mxu0 %v3487_v1 }
  0xb9   : > { %3299 = vmatprep.subr.bf16.mxu1 %v3487_v1 }
  0xba   : > { %3269 = vmatpush3.bf16.msra.mxu0 %v3452_v57 }
  0xbb   : > { %3270 = vmatprep.subr.bf16.mxu0 %v3487_v1 }
  0xbc   : > { %3307 = vmatpush3.bf16.msra.mxu1 %v3452_v57 }
  0xbd   : > { %3215 = vmatmul.mubr.bf16.gmra.mxu0 %v1708_v61  ;;  %3300 = vmatprep.subr.bf16.mxu1 %v3487_v1 }
  0xbe   : > { %3251 = vmatmul.mubr.bf16.gmra.mxu1 %v1967_v63  ;;  %3218 = vmatprep.mubr.msk.bf16.mxu0 %vm3488_vm0, %v3487_v1 }
  0xbf   : > { %3254 = vmatprep.mubr.msk.bf16.mxu1 %vm3488_vm0, %v3487_v1  ;;  %3271 = vmatpush3.bf16.msra.mxu0 %v3453_v0 }
  0xc0   : > { %3308 = vmatpush3.bf16.msra.mxu1 %v3453_v0  ;;  %3272 = vmatprep.subr.bf16.mxu0 %v3487_v1 }
  0xc1   : > { %3301 = vmatprep.subr.bf16.mxu1 %v3487_v1 }
  0xc3   : > { %3273 = vmatpush3.bf16.msra.mxu0 %v3456_v6 }
  0xc4   : > { %3309 = vmatpush3.bf16.msra.mxu1 %v3456_v6 }
  0xc5   : > { %3219 = vmatmul.mubr.bf16.gmra.mxu0 %v1710_v7 }
  0xc6   : > { %3255 = vmatmul.mubr.bf16.gmra.mxu1 %v1976_v10  ;;  %3274 = vmatprep.mubr.msk.bf16.mxu0 %vm3488_vm0, %v3487_v1 }
  0xc7   : > { %3286 = vmatprep.mubr.msk.bf16.mxu1 %vm3488_vm0, %v3487_v1 }
  0xcd   : > { %3275 = vmatmul.mubr.bf16.vlgmr.msra.gmra.mxu0 %v2192_v17 }
  0xce   : > { %3287 = vmatmul.mubr.bf16.vlgmr.msra.gmra.mxu1 %v2198_v19  ;;  %3278 = vmatprep.mubr.msk.bf16.mxu0 %vm3488_vm0, %v3487_v1 }
  0xcf   : > { %3290 = vmatprep.mubr.msk.bf16.mxu1 %vm3488_vm0, %v3487_v1 }
  0xd5   : > { %3279 = vmatmul.mubr.bf16.gmra.mxu0 %v2194_v23 }
  0xd6   : > { %3291 = vmatmul.mubr.bf16.gmra.mxu1 %v2200_v24  ;;  %3282 = vmatprep.mubr.msk.bf16.mxu0 %vm3488_vm0, %v3487_v1 }
  0xdd   : > { %3283 = vmatmul.mubr.bf16.gmra.mxu0 %v2196_v25 }
  0xed   : > { %v381_v26 = vpop.f32.mrf.mxu0 }
  0xee   : > { %v638_v27 = vpop.f32.mrf.mxu1 }
  0xef   : > { %v677_v28 = vadd.f32 %v638_v27, %v381_v26  ;;  %v2988_v29 = vpop.f32.mrf.mxu0 }
  0xf0   : > { %v3024_v30 = vpop.f32.mrf.mxu1 }
  0xf1   : > { %v384_v31 = vpop.f32.mrf.mxu0 }
  0xf2   : > { %v641_v32 = vpop.f32.mrf.mxu1 }
  0xf3   : > { %v678_v33 = vadd.f32 %v641_v32, %v384_v31  ;;  %v2989_v34 = vpop.f32.mrf.mxu0 }
  0xf4   : > { %v3025_v35 = vpop.f32.mrf.mxu1 }
  0xf5   : > { %v389_v36 = vpop.f32.mrf.mxu0 }
  0xf6   : > { %v646_v37 = vpop.f32.mrf.mxu1 }
  0xf7   : > { %v679_v38 = vadd.f32 %v646_v37, %v389_v36  ;;  %v2992_v39 = vpop.f32.mrf.mxu0 }
  0xf8   : > { %v3028_v40 = vpop.f32.mrf.mxu1 }
  0xf9   : > { %v392_v41 = vpop.f32.mrf.mxu0 }
  0xfa   : > { %v649_v1 = vpop.f32.mrf.mxu1 }
  0xfb   : > { %v680_v42 = vadd.f32 %v649_v1, %v392_v41  ;;  %v2993_v43 = vpop.f32.mrf.mxu0 }
  0xfc   : > { %v3029_v44 = vpop.f32.mrf.mxu1 }
  0xfd   : > { %v397_v45 = vpop.f32.mrf.mxu0 }
  0xfe   : > { %v654_v46 = vpop.f32.mrf.mxu1 }
  0xff   : > { %v681_v47 = vadd.f32 %v654_v46, %v397_v45  ;;  %v2996_v48 = vpop.f32.mrf.mxu0 }
 0x100   : > { %v3032_v49 = vpop.f32.mrf.mxu1 }
 0x101   : > { %v400_v50 = vpop.f32.mrf.mxu0 }
 0x102   : > { %v657_v51 = vpop.f32.mrf.mxu1 }
 0x103   : > { %v682_v52 = vadd.f32 %v657_v51, %v400_v50  ;;  %v2997_v53 = vpop.f32.mrf.mxu0 }
 0x104   : > { %v3033_v54 = vpop.f32.mrf.mxu1 }
 0x105   : > { %v405_v55 = vpop.f32.mrf.mxu0 }
 0x106   : > { %v662_v56 = vpop.f32.mrf.mxu1 }
 0x107   : > { %v683_v57 = vadd.f32 %v662_v56, %v405_v55  ;;  %v3000_v58 = vpop.f32.mrf.mxu0 }
 0x108   : > { %v3036_v59 = vpop.f32.mrf.mxu1 }
 0x109   : > { %v408_v60 = vpop.f32.mrf.mxu0 }
 0x10a   : > { %v665_v61 = vpop.f32.mrf.mxu1 }
 0x10b   : > { %v684_v62 = vadd.f32 %v665_v61, %v408_v60  ;;  %v3001_v63 = vpop.f32.mrf.mxu0 }
 0x10c   : > { %v3037_v0 = vpop.f32.mrf.mxu1 }
 0x10d   : > { %v413_v2 = vpop.f32.mrf.mxu0 }
 0x10e   : > { %v670_v3 = vpop.f32.mrf.mxu1 }
 0x10f   : > { %v685_v4 = vadd.f32 %v670_v3, %v413_v2  ;;  %v3004_v5 = vpop.f32.mrf.mxu0 }
 0x110   : > { %v3040_v6 = vpop.f32.mrf.mxu1 }
 0x111   : > { %v416_v7 = vpop.f32.mrf.mxu0 }
 0x112   : > { %v673_v8 = vpop.f32.mrf.mxu1 }
 0x113   : > { %v686_v9 = vadd.f32 %v673_v8, %v416_v7  ;;  %v3005_v10 = vpop.f32.mrf.mxu0 }
 0x114   : > { %v3041_v11 = vpop.f32.mrf.mxu1 }
 0x115   : > { %v862_v12 = vpop.f32.mrf.mxu0 }
 0x116   : > { %v901_v13 = vadd.f32 %v862_v12, %v677_v28  ;;  %v1085_v14 = vpop.f32.mrf.mxu1 }
 0x117   : > { %v3060_v15 = vpop.f32.mrf.mxu0 }
 0x118   : > { %v1124_v16 = vadd.f32 %v1085_v14, %v901_v13  ;;  %v3096_v17 = vpop.f32.mrf.mxu1 }
 0x119   : > { %v865_v18 = vpop.f32.mrf.mxu0 }
 0x11a   : > { %v902_v19 = vadd.f32 %v865_v18, %v678_v33  ;;  %v1088_v20 = vpop.f32.mrf.mxu1 }
 0x11b   : > { %v3061_v21 = vpop.f32.mrf.mxu0 }
 0x11c   : > { %v1125_v22 = vadd.f32 %v1088_v20, %v902_v19  ;;  %v3097_v23 = vpop.f32.mrf.mxu1 }
 0x11d   : > { %v870_v24 = vpop.f32.mrf.mxu0 }
 0x11e   : > { %v903_v25 = vadd.f32 %v870_v24, %v679_v38  ;;  %v1093_v26 = vpop.f32.mrf.mxu1 }
 0x11f   : > { %v3064_v27 = vpop.f32.mrf.mxu0 }
 0x120   : > { %v1126_v29 = vadd.f32 %v1093_v26, %v903_v25  ;;  %v3100_v30 = vpop.f32.mrf.mxu1 }
 0x121   : > { %v873_v31 = vpop.f32.mrf.mxu0 }
 0x122   : > { %v904_v32 = vadd.f32 %v873_v31, %v680_v42  ;;  %v1096_v34 = vpop.f32.mrf.mxu1 }
 0x123   : > { %v3065_v28 = vpop.f32.mrf.mxu0 }
 0x124   : > { %v1127_v35 = vadd.f32 %v1096_v34, %v904_v32  ;;  %v3101_v36 = vpop.f32.mrf.mxu1 }
 0x125   : > { %v878_v37 = vpop.f32.mrf.mxu0 }
 0x126   : > { %v905_v39 = vadd.f32 %v878_v37, %v681_v47  ;;  %v1101_v40 = vpop.f32.mrf.mxu1 }
 0x127   : > { %v3068_v33 = vpop.f32.mrf.mxu0 }
 0x128   : > { %v1128_v41 = vadd.f32 %v1101_v40, %v905_v39  ;;  %v3104_v1 = vpop.f32.mrf.mxu1 }
 0x129   : > { %v881_v43 = vpop.f32.mrf.mxu0 }
 0x12a   : > { %v906_v44 = vadd.f32 %v881_v43, %v682_v52  ;;  %v1104_v45 = vpop.f32.mrf.mxu1 }
 0x12b   : > { %v3069_v38 = vpop.f32.mrf.mxu0 }
 0x12c   : > { %v1129_v46 = vadd.f32 %v1104_v45, %v906_v44  ;;  %v3105_v48 = vpop.f32.mrf.mxu1 }
 0x12d   : > { %v886_v49 = vpop.f32.mrf.mxu0 }
 0x12e   : > { %v907_v50 = vadd.f32 %v886_v49, %v683_v57  ;;  %v1109_v51 = vpop.f32.mrf.mxu1 }
 0x12f   : > { %v3072_v42 = vpop.f32.mrf.mxu0 }
 0x130   : > { %v4018_v53 = vadd.f32 %v1109_v51, %v907_v50  ;;  %v3108_v54 = vpop.f32.mrf.mxu1 }
 0x131   : > { %v889_v55 = vpop.f32.mrf.mxu0 }
 0x132   : > { %v908_v56 = vadd.f32 %v889_v55, %v684_v62  ;;  %v1112_v47 = vpop.f32.mrf.mxu1 }
 0x133   : > { %v3073_v58 = vpop.f32.mrf.mxu0 }
 0x134   : > { %v4020_v59 = vadd.f32 %v1112_v47, %v908_v56  ;;  %v3109_v60 = vpop.f32.mrf.mxu1 }
 0x135   : > { %v894_v61 = vpop.f32.mrf.mxu0 }
 0x136   : > { %v909_v52 = vadd.f32 %v894_v61, %v685_v4  ;;  %v1117_v63 = vpop.f32.mrf.mxu1 }
 0x137   : > { %v3076_v0 = vpop.f32.mrf.mxu0 }
 0x138   : > { %v4022_v2 = vadd.f32 %v1117_v63, %v909_v52  ;;  %v3112_v3 = vpop.f32.mrf.mxu1 }
 0x139   : > { %v897_v57 = vpop.f32.mrf.mxu0 }
 0x13a   : > { %v910_v5 = vadd.f32 %v897_v57, %v686_v9  ;;  %v1120_v6 = vpop.f32.mrf.mxu1 }
 0x13b   : > { %v3077_v7 = vpop.f32.mrf.mxu0 }
 0x13c   : > { %v4024_v8 = vadd.f32 %v1120_v6, %v910_v5  ;;  %v3113_v10 = vpop.f32.mrf.mxu1 }
 0x13d   : > { %v1351_v62 = vpop.f32.mrf.mxu0 }
 0x13e   : > { %v1390_v11 = vadd.f32 %v1351_v62, %v1124_v16  ;;  %v1575_v12 = vpop.f32.mrf.mxu1 }
 0x13f   : > { %v3132_v13 = vpop.f32.mrf.mxu0 }
 0x140   : > { %v4026_v14 = vadd.f32 %v1575_v12, %v1390_v11  ;;  %v3168_v15 = vpop.f32.mrf.mxu1 }
 0x141   : > { %v1354_v4 = vpop.f32.mrf.mxu0 }
 0x142   : > { %v1391_v17 = vadd.f32 %v1354_v4, %v1125_v22  ;;  %v1578_v18 = vpop.f32.mrf.mxu1 }
 0x143   : > { %v3133_v19 = vpop.f32.mrf.mxu0 }
 0x144   : > { %v4028_v20 = vadd.f32 %v1578_v18, %v1391_v17  ;;  %v3169_v21 = vpop.f32.mrf.mxu1 }
 0x145   : > { %v1359_v9 = vpop.f32.mrf.mxu0 }
 0x146   : > { %v1392_v23 = vadd.f32 %v1359_v9, %v1126_v29  ;;  %v1583_v24 = vpop.f32.mrf.mxu1 }
 0x147   : > { %v3136_v25 = vpop.f32.mrf.mxu0 }
 0x148   : > { %v4030_v26 = vadd.f32 %v1583_v24, %v1392_v23  ;;  %v3172_v27 = vpop.f32.mrf.mxu1 }
 0x149   : > { %v1362_v16 = vpop.f32.mrf.mxu0 }
 0x14a   : > { %v1393_v30 = vadd.f32 %v1362_v16, %v1127_v35  ;;  %v1586_v31 = vpop.f32.mrf.mxu1 }
 0x14b   : > { %v3137_v32 = vpop.f32.mrf.mxu0 }
 0x14c   : > { %v4032_v34 = vadd.f32 %v1586_v31, %v1393_v30  ;;  %v3173_v28 = vpop.f32.mrf.mxu1 }
 0x14d   : > { %v1367_v22 = vpop.f32.mrf.mxu0 }
 0x14e   : > { %v1394_v36 = vadd.f32 %v1367_v22, %v1128_v41  ;;  %v1591_v37 = vpop.f32.mrf.mxu1 }
 0x14f   : > { %v3140_v39 = vpop.f32.mrf.mxu0 }
 0x150   : > { %v4034_v40 = vadd.f32 %v1591_v37, %v1394_v36  ;;  %v3176_v33 = vpop.f32.mrf.mxu1 }
 0x151   : > { %v1370_v29 = vpop.f32.mrf.mxu0 }
 0x152   : > { %v1395_v1 = vadd.f32 %v1370_v29, %v1129_v46  ;;  %v1594_v43 = vpop.f32.mrf.mxu1 }
 0x153   : > { %v3141_v44 = vpop.f32.mrf.mxu0 }
 0x154   : > { %v4036_v45 = vadd.f32 %v1594_v43, %v1395_v1  ;;  %v3177_v38 = vpop.f32.mrf.mxu1 }
 0x155   : > { %v1375_v35 = vpop.f32.mrf.mxu0 }
 0x156   : > { %v1599_v48 = vpop.f32.mrf.mxu1  ;;  %v1396_v37 = vadd.f32 %v1375_v35, %v4018_v53 }
 0x157   : > { %v3144_v49 = vpop.f32.mrf.mxu0 }
 0x158   : > { %v3180_v50 = vpop.f32.mrf.mxu1  ;;  %v1620_v43 = vadd.f32 %v1599_v48, %v1396_v37 }
 0x159   : > { %v1378_v51 = vpop.f32.mrf.mxu0 }
 0x15a   : > { %v1602_v42 = vpop.f32.mrf.mxu1  ;;  %v1397_v44 = vadd.f32 %v1378_v51, %v4020_v59 }
 0x15b   : > { %v3145_v54 = vpop.f32.mrf.mxu0 }
 0x15c   : > { %v3181_v41 = vpop.f32.mrf.mxu1 }
 0x15d   : > { %v1383_v55 = vpop.f32.mrf.mxu0 }
 0x15e   : > { %v1607_v56 = vpop.f32.mrf.mxu1 }
 0x15f   : > { %v3148_v47 = vpop.f32.mrf.mxu0 }
 0x160   : > { %v3184_v58 = vpop.f32.mrf.mxu1 }
 0x161   : > { %v1386_v60 = vpop.f32.mrf.mxu0  ;;  %v1621_v58 = vadd.f32 %v1602_v42, %v1397_v44  ;;  %v4061_v42 = vld [vmem:[%s4106_s2] ss:$0 sm:$0xff] }
 0x162   : > { %v4038_v61 = vpop.f32.mrf.mxu1 }
 0x163   : > { %v3149_v46 = vpop.f32.mrf.mxu0 }
 0x164   : > { %v3185_v52 = vpop.f32.mrf.mxu1  ;;  %v1398_v46 = vadd.f32 %v1383_v55, %v4022_v2 }
 0x165   : > { %v1798_v63 = vpop.f32.mrf.mxu0 }
 0x166   : > { %v2064_v0 = vpop.f32.mrf.mxu1  ;;  %v1837_v49 = vadd.f32 %v1798_v63, %v4026_v14  ;;  %v1622_v51 = vadd.f32 %v1607_v56, %v1398_v46  ;;  %v1399_v14 = vadd.f32 %v1386_v60, %v4024_v8 }
 0x167   : > { %v3204_v3 = vpop.f32.mrf.mxu0 }
 0x168   : > { %v3240_v57 = vpop.f32.mrf.mxu1  ;;  %v2103_v3 = vadd.f32 %v2064_v0, %v1837_v49  ;;  %v1623_v8 = vadd.f32 %v4038_v61, %v1399_v14 }
 0x169   : > { %v1801_v5 = vpop.f32.mrf.mxu0 }
 0x16a   : > { %v2067_v6 = vpop.f32.mrf.mxu1  ;;  %v1838_v53 = vadd.f32 %v1801_v5, %v4028_v20 }
 0x16b   : > { %v3205_v7 = vpop.f32.mrf.mxu0 }
 0x16c   : > { %v3241_v10 = vpop.f32.mrf.mxu1  ;;  %v2104_v63 = vadd.f32 %v2067_v6, %v1838_v53 }
 0x16d   : > { %v1806_v62 = vpop.f32.mrf.mxu0 }
 0x16e   : > { %v4040_v11 = vpop.f32.mrf.mxu1  ;;  %v1839_v20 = vadd.f32 %v1806_v62, %v4030_v26 }
 0x16f   : > { %v3208_v12 = vpop.f32.mrf.mxu0 }
 0x170   : > { %v3244_v13 = vpop.f32.mrf.mxu1 }
 0x171   : > { %v1809_v15 = vpop.f32.mrf.mxu0 }
 0x172   : > { %v4042_v4 = vpop.f32.mrf.mxu1  ;;  %v1840_v6 = vadd.f32 %v1809_v15, %v4032_v34 }
 0x173   : > { %v3209_v17 = vpop.f32.mrf.mxu0 }
 0x174   : > { %v3245_v18 = vpop.f32.mrf.mxu1 }
 0x175   : > { %v4044_v19 = vpop.f32.mrf.mxu0 }
 0x176   : > { %v4046_v21 = vpop.f32.mrf.mxu1 }
 0x177   : > { %v3212_v9 = vpop.f32.mrf.mxu0 }
 0x178   : > { %v3248_v23 = vpop.f32.mrf.mxu1 }
 0x179   : > { %v4048_v24 = vpop.f32.mrf.mxu0 }
 0x17a   : > { %v4050_v25 = vpop.f32.mrf.mxu1 }
 0x17b   : > { %v3213_v27 = vpop.f32.mrf.mxu0 }
 0x17c   : > { %v3249_v16 = vpop.f32.mrf.mxu1  ;;  %v2105_v27 = vadd.f32 %v4040_v11, %v1839_v20 }
 0x17d   : > { %v1822_v30 = vpop.f32.mrf.mxu0 }
 0x17e   : > { %v2088_v31 = vpop.f32.mrf.mxu1  ;;  %v1843_v54 = vadd.f32 %v1822_v30, %v1620_v43 }
 0x17f   : > { %v3216_v32 = vpop.f32.mrf.mxu0 }
 0x180   : > { %v3252_v28 = vpop.f32.mrf.mxu1  ;;  %v2109_v57 = vadd.f32 %v2088_v31, %v1843_v54 }
 0x181   : > { %v1825_v22 = vpop.f32.mrf.mxu0 }
 0x182   : > { %v2091_v36 = vpop.f32.mrf.mxu1  ;;  %v1844_v7 = vadd.f32 %v1825_v22, %v1621_v58 }
 0x183   : > { %v3217_v39 = vpop.f32.mrf.mxu0 }
 0x184   : > { %v3253_v33 = vpop.f32.mrf.mxu1  ;;  %v2110_v5 = vadd.f32 %v2091_v36, %v1844_v7  ;;  %v2106_v39 = vadd.f32 %v4042_v4, %v1840_v6 }
 0x185   : > { %v1830_v29 = vpop.f32.mrf.mxu0  ;;  %v1841_v33 = vadd.f32 %v4044_v19, %v4034_v40  ;;  %v1842_v40 = vadd.f32 %v4048_v24, %v4036_v45 }
 0x186   : > { %v2096_v1 = vpop.f32.mrf.mxu1  ;;  %v1845_v12 = vadd.f32 %v1830_v29, %v1622_v51 }
 0x187   : > { %v3220_v38 = vpop.f32.mrf.mxu0  ;;  %v2107_v4 = vadd.f32 %v4046_v21, %v1841_v33  ;;  %v2108_v21 = vadd.f32 %v4050_v25, %v1842_v40 }
 0x188   : > { %v3256_v50 = vpop.f32.mrf.mxu1  ;;  %v2111_v16 = vadd.f32 %v2096_v1, %v1845_v12 }
 0x189   : > { %v1833_v41 = vpop.f32.mrf.mxu0 }
 0x18a   : > { %v2099_v47 = vpop.f32.mrf.mxu1  ;;  %v1846_v30 = vadd.f32 %v1833_v41, %v1623_v8 }
 0x18b   : > { %v3221_v52 = vpop.f32.mrf.mxu0 }
 0x18c   : > { %v3257_v35 = vpop.f32.mrf.mxu1  ;;  %v2112_v43 = vadd.f32 %v2099_v47, %v1846_v30 }
 0x18d   : > { %v2288_v48 = vpop.f32.mrf.mxu0 }
 0x18e   : > { %v2327_v10 = vadd.f32 %v2288_v48, %v2103_v3  ;;  %v2312_v59 = vpop.f32.mrf.mxu1 }
 0x18f   : > { %v2333_v2 = vadd.f32 %v2312_v59, %v2109_v57  ;;  %v3276_v55 = vpop.f32.mrf.mxu0 }
 0x190   : > { %v3288_v0 = vpop.f32.mrf.mxu1  ;;  %v2364_v17 = vadd.f32 %v4061_v42, %v2327_v10 }
 0x191   : > { %v2291_v13 = vpop.f32.mrf.mxu0  ;;  %v2370_v60 = vadd.f32 %v4061_v42, %v2333_v2 }
 0x192   : > { %v2328_v56 = vadd.f32 %v2291_v13, %v2104_v63  ;;  %v2315_v18 = vpop.f32.mrf.mxu1  ;;  %v2374_v28 = vmax.f32 %v2364_v17, 0.0 }
 0x193   : > { %v2334_v9 = vadd.f32 %v2315_v18, %v2110_v5  ;;  %v3277_v23 = vpop.f32.mrf.mxu0  ;;  %v2380_v37 = vmax.f32 %v2370_v60, 0.0 }
 0x194   : > { %v2365_v26 = vadd.f32 %v4061_v42, %v2328_v56  ;;  %v3289_v62 = vpop.f32.mrf.mxu1 }
 0x195   : > { %v2371_v31 = vadd.f32 %v4061_v42, %v2334_v9  ;;  %v2296_v32 = vpop.f32.mrf.mxu0 }
 0x196   : > { %v2375_v22 = vmax.f32 %v2365_v26, 0.0  ;;  %v2329_v61 = vadd.f32 %v2296_v32, %v2105_v27  ;;  %v2320_v36 = vpop.f32.mrf.mxu1 }
 0x197   : > { %v2381_v34 = vmax.f32 %v2371_v31, 0.0  ;;  %v2335_v11 = vadd.f32 %v2320_v36, %v2111_v16  ;;  %v3280_v15 = vpop.f32.mrf.mxu0 }
 0x198   : > { %v2827_v29 = vpack.c.bf16 %v2375_v22, %v2374_v28  ;;  %v3292_v1 = vpop.f32.mrf.mxu1  ;;  %v2366_v49 = vadd.f32 %v4061_v42, %v2329_v61 }
 0x199   : > { %v2842_v44 = vpack.c.bf16 %v2381_v34, %v2380_v37  ;;  %v2299_v38 = vpop.f32.mrf.mxu0  ;;  %v2372_v41 = vadd.f32 %v4061_v42, %v2335_v11 }
 0x19a   : > { %2828 = vst [vmem:[%s4075_s7] sm:$0xff] %v2827_v29   ;;  %v2330_v50 = vadd.f32 %v2299_v38, %v2106_v39  ;;  %v2323_v54 = vpop.f32.mrf.mxu1  ;;  %v2376_v53 = vmax.f32 %v2366_v49, 0.0 }
 0x19b   : > { %2851 = vst [vmem:[%s4075_s7 + $0x18] sm:$0xff] %v2842_v44   ;;  %v2336_v58 = vadd.f32 %v2323_v54, %v2112_v43  ;;  %v3281_v46 = vpop.f32.mrf.mxu0  ;;  %v2382_v7 = vmax.f32 %v2372_v41, 0.0 }
 0x19c   : > { %v2367_v19 = vadd.f32 %v4061_v42, %v2330_v50  ;;  %v3293_v47 = vpop.f32.mrf.mxu1 }
 0x19d   : > { %v2373_v52 = vadd.f32 %v4061_v42, %v2336_v58  ;;  %v2304_v3 = vpop.f32.mrf.mxu0 }
 0x19e   : > { %v2377_v35 = vmax.f32 %v2367_v19, 0.0  ;;  %v2331_v57 = vadd.f32 %v2304_v3, %v2107_v4 }
 0x19f   : > { %v2383_v48 = vmax.f32 %v2373_v52, 0.0  ;;  %v3284_v10 = vpop.f32.mrf.mxu0 }
 0x1a0   : > { %v2832_v59 = vpack.c.bf16 %v2377_v35, %v2376_v53  ;;  %v2368_v45 = vadd.f32 %v4061_v42, %v2331_v57 }
 0x1a1   : > { %v2847_v51 = vpack.c.bf16 %v2383_v48, %v2382_v7  ;;  %v2307_v14 = vpop.f32.mrf.mxu0 }
 0x1a2   : > { %2849 = vst [vmem:[%s4075_s7 + $0x8] sm:$0xff] %v2832_v59   ;;  %v2332_v24 = vadd.f32 %v2307_v14, %v2108_v21  ;;  %v2378_v63 = vmax.f32 %v2368_v45, 0.0 }
 0x1a3   : > { %2852 = vst [vmem:[%s4075_s7 + $0x20] sm:$0xff] %v2847_v51   ;;  %v3285_v2 = vpop.f32.mrf.mxu0 }
 0x1a4   : > { %v2369_v55 = vadd.f32 %v4061_v42, %v2332_v24 }
 0x1a6   : > { %v2379_v20 = vmax.f32 %v2369_v55, 0.0 }
 0x1a8   : > { %v2837_v0 = vpack.c.bf16 %v2379_v20, %v2378_v63 }
 0x1aa   : > { %2850 = vst [vmem:[%s4075_s7 + $0x10] sm:$0xff] %v2837_v0  }
 0x1ab PF: > { %s13_s14 = sadd.s32 1, %s3485_s14   ;;  %s4108_s12 = smov %s3481_s13 }
 0x1ac   : > { %p10_p5 = scmp.ge.s32.totalorder %s13_s14, 4   ;;  %s4109_s13 = smov %s4111_s15 }
 0x1ae   :  { %12 = sbr.rel (!%p10_p5) target bundleno = 2 (0x2), region = 76 }

// kernel: hypernetwork_forward.20
= control target key start
LH: loop header
LB: loop body
LE: loop exit
PB: predicated region body
PF: predicated region fallthrough
CT: control target
= control target key end

     0   :  { %s1144_s12 = smov 0   ;;  %s1146_s13 = smov 0   ;;  %s1264_s0 = inlined_call_operand.vmem [shape: bf16[32,2048], index: 0, kind: input, shape index: {}]   ;;  %s1265_s1 = inlined_call_operand.vmem [shape: bf16[2048,128], index: 1, kind: input, shape index: {}]   ;;  %s1266_s2 = inlined_call_operand.vmem [shape: f32[1,128], index: 2, kind: input, shape index: {}]   ;;  %s1267_s3 = inlined_call_operand.vmem [shape: bf16[32,128], index: 3, kind: output, shape index: {}]  }
   0x1   :  { %s1148_s14 = smov 0   ;;  %s1150_s15 = smov 0  }
   0x2   :  { %s1152_s16 = smov 0  }
   0x3 LB: > { %s25_s17 = sadd.s32 1, %s1117_s15  ;;  %p48_p1 = scmp.ne.s32.totalorder %s1109_s13, %s1105_s12  ;;  %s1121_s16 = sphi %s1152_s16, %s13_s16   ;;  %s1117_s15 = sphi %s1150_s15, %s1271_s15   ;;  %s1113_s14 = sphi %s1148_s14, %s1270_s14   ;;  %s1109_s13 = sphi %s1146_s13, %s1269_s13   ;;  %s1105_s12 = sphi %s1144_s12, %s1268_s12  }
   0x4   : > { %p26_p0 = scmp.ge.s32.totalorder %s25_s17, 4  ;;  %p49_p2 = scmp.eq.s32.totalorder %s1121_s16, 0 }
   0x5   : > { %s41_s19 = sadd.s32 1, %s1109_s13  ;;  %p867_p5 = scmp.ge.s32.totalorder %s1121_s16, 4 }
   0x6   : > { %s1273_s17 = smov (%p26_p0, %s25_s17), 0  ;;  %p50_p3 = por %p49_p2, %p48_p1 }
   0x7   : > { %s37_s18 = ssub.s32 %s1117_s15, %s1273_s17  ;;  %162 = sbr.rel (%p867_p5) target bundleno = 20 (0x14), region = 20 }
   0x8   : > { %p39_p4 = scmp.eq.s32.totalorder %s37_s18, 0 }
   0xa   : > { %s1179_s20 = scalar_select %p39_p4, %s1109_s13, %s41_s19  }
   0xc   : > { %165 = sbr.rel (!%p50_p3) target bundleno = 20 (0x14), region = 24  ;;  %s167_s21 = sand.u32 (%p50_p3), 1, %s1109_s13  }
   0xd   : > { %s926_s22 = sshll.u32 (%p50_p3), %s1117_s15, 4  ;;  %s868_s23 = sshll.u32 (%p50_p3), %s167_s21, 6 }
   0xe   : > { %s175_s26 = scalar_lea.vmem (%p50_p3), %s1264_s0, %s926_s22  ;;  %s169_s27 = scalar_lea.vmem (%p50_p3), [#allocation3], %s868_s23 }
   0xf   : > { %v188_v0 = vld [vmem:[%s175_s26] sm:$0xff] (%p50_p3)  ;;  %v190_v1 = vld [vmem:[%s175_s26 + $0x8] sm:$0xff] (%p50_p3) }
  0x10   : > { %v192_v2 = vld [vmem:[%s175_s26 + $0x40] sm:$0xff] (%p50_p3)  ;;  %189 = vst [vmem:[%s169_s27] sm:$0xff] (%p50_p3), %v188_v0  ;;  %191 = vst [vmem:[%s169_s27 + $0x8] sm:$0xff] (%p50_p3), %v190_v1  ;;  %v194_v3 = vld [vmem:[%s175_s26 + $0x48] sm:$0xff] (%p50_p3) }
  0x11   : > { %193 = vst [vmem:[%s169_s27 + $0x10] sm:$0xff] %v192_v2  ;;  %v196_v4 = vld [vmem:[%s175_s26 + $0x80] sm:$0xff]  ;;  %v198_v5 = vld [vmem:[%s175_s26 + $0x88] sm:$0xff]  ;;  %195 = vst [vmem:[%s169_s27 + $0x18] sm:$0xff] %v194_v3 }
  0x12   : > { %197 = vst [vmem:[%s169_s27 + $0x20] sm:$0xff] %v196_v4  ;;  %199 = vst [vmem:[%s169_s27 + $0x28] sm:$0xff] %v198_v5  ;;  %v200_v6 = vld [vmem:[%s175_s26 + $0xc0] sm:$0xff]  ;;  %v202_v7 = vld [vmem:[%s175_s26 + $0xc8] sm:$0xff] }
  0x13   : > { %201 = vst [vmem:[%s169_s27 + $0x30] sm:$0xff] %v200_v6  ;;  %203 = vst [vmem:[%s169_s27 + $0x38] sm:$0xff] %v202_v7 }
  0x14 PF: > { %p871_p6 = scmp.ge.s32.totalorder %s1121_s16, 1  ;;  %p220_p7 = scmp.lt.s32.totalorder %s1121_s16, 5 }
  0x16   : > { %p221_p8 = pnand %p871_p6, %p220_p7 }
  0x17   : > { %s227_s28 = sand.u32 (!%p221_p8), 1, %s1105_s12   ;;  %s873_s29 = sshll.u32 (!%p221_p8), %s1113_s14, 6 }
  0x18   : > { %224 = sbr.rel (%p221_p8) target bundleno = 300 (0x12c), region = 51  ;;  %s872_s30 = sshll.u32 (!%p221_p8), %s227_s28, 6 }
  0x19   : > { %p267_p9 = scmp.lt.s32.totalorder (!%p221_p8), %s873_s29, 255  ;;  %s1196_s8 = scalar_lea.vmem (!%p221_p8), [#allocation3], %s872_s30 }
  0x1a   : > { %p875_p10 = scmp.ne.s32.totalorder (!%p221_p8), %s1113_s14, 0 }
  0x1d   : > { %s1275_s29 = smov (!%p267_p9, %s873_s29), 255  ;;  %291 = sbr.rel (%p875_p10) target bundleno = 37 (0x25), region = 59 }
  0x1e   : > { %s874_s4 = sshll.u32 %s1275_s29, 2 }
  0x1f   : > { %s1194_s7 = scalar_lea.vmem %s1265_s1, %s874_s4 }
  0x22   : > { %v1123_v8 = vmov 0.0  }
  0x23   : > { %292 = vst [vmem:[#allocation2 + $0x10] sm:$0xff] %v1123_v8  ;;  %293 = vst [vmem:[#allocation2] sm:$0xff] %v1123_v8 }
  0x24   : > { %294 = vst [vmem:[#allocation2 + $0x18] sm:$0xff] %v1123_v8  ;;  %295 = vst [vmem:[#allocation2 + $0x8] sm:$0xff] %v1123_v8 }
  0x25 PF: > { %v1039_v9 = vld [vmem:[%s1194_s7 + $0x78] sm:$0xff]   ;;  %v1043_v13 = vld [vmem:[%s1194_s7 + $0x70] sm:$0xff]   ;;  %v1047_v17 = vld [vmem:[%s1194_s7 + $0x68] sm:$0xff]   ;;  %p916_p11 = scmp.ne.s32.totalorder %s1113_s14, 3 }
  0x26   : > { %v1040_v10 = vld [vmem:[%s1194_s7 + $0xf8] sm:$0xff]   ;;  %942 = vmatprep.subr.bf16.mxu0 %v1039_v9  ;;  %v1044_v14 = vld [vmem:[%s1194_s7 + $0xf0] sm:$0xff]   ;;  %v1048_v18 = vld [vmem:[%s1194_s7 + $0xe8] sm:$0xff]  }
  0x27   : > { %v1041_v11 = vld [vmem:[%s1194_s7 + $0x38] sm:$0xff]   ;;  %970 = vmatprep.subr.bf16.mxu1 %v1040_v10  ;;  %v1045_v15 = vld [vmem:[%s1194_s7 + $0x30] sm:$0xff]   ;;  %v1049_v19 = vld [vmem:[%s1194_s7 + $0x28] sm:$0xff]  }
  0x28   : > { %v1042_v12 = vld [vmem:[%s1194_s7 + $0xb8] sm:$0xff]   ;;  %943 = vmatpush3.bf16.msra.mxu0 %v1041_v11  ;;  %v1046_v16 = vld [vmem:[%s1194_s7 + $0xb0] sm:$0xff]   ;;  %v1050_v20 = vld [vmem:[%s1194_s7 + $0xa8] sm:$0xff]  }
  0x29   : > { %971 = vmatpush3.bf16.msra.mxu1 %v1042_v12  ;;  %944 = vmatprep.subr.bf16.mxu0 %v1043_v13  ;;  %v1051_v21 = vld [vmem:[%s1194_s7 + $0x60] sm:$0xff]   ;;  %v1055_v25 = vld [vmem:[%s1194_s7 + $0x58] sm:$0xff]   ;;  %v1059_v29 = vld [vmem:[%s1194_s7 + $0x50] sm:$0xff]  }
  0x2a   : > { %972 = vmatprep.subr.bf16.mxu1 %v1044_v14  ;;  %v1052_v22 = vld [vmem:[%s1194_s7 + $0xe0] sm:$0xff]   ;;  %v1056_v26 = vld [vmem:[%s1194_s7 + $0xd8] sm:$0xff]   ;;  %v1060_v30 = vld [vmem:[%s1194_s7 + $0xd0] sm:$0xff]  }
  0x2b   : > { %v1053_v23 = vld [vmem:[%s1194_s7 + $0x20] sm:$0xff]   ;;  %v1057_v27 = vld [vmem:[%s1194_s7 + $0x18] sm:$0xff]   ;;  %v1061_v31 = vld [vmem:[%s1194_s7 + $0x10] sm:$0xff]  }
  0x2c   : > { %945 = vmatpush3.bf16.msra.mxu0 %v1045_v15  ;;  %v1054_v24 = vld [vmem:[%s1194_s7 + $0xa0] sm:$0xff]   ;;  %v1058_v28 = vld [vmem:[%s1194_s7 + $0x98] sm:$0xff]   ;;  %v1062_v32 = vld [vmem:[%s1194_s7 + $0x90] sm:$0xff]  }
  0x2d   : > { %973 = vmatpush3.bf16.msra.mxu1 %v1046_v16  ;;  %946 = vmatprep.subr.bf16.mxu0 %v1047_v17  ;;  %v1063_v33 = vld [vmem:[%s1194_s7 + $0x48] sm:$0xff]   ;;  %v1067_v37 = vld [vmem:[%s1194_s7 + $0x40] sm:$0xff]   ;;  %v296_v56 = vld [vmem:[#allocation2 + $0x10] sm:$0xff] }
  0x2e   : > { %974 = vmatprep.subr.bf16.mxu1 %v1048_v18  ;;  %v1064_v34 = vld [vmem:[%s1194_s7 + $0xc8] sm:$0xff]   ;;  %v1068_v38 = vld [vmem:[%s1194_s7 + $0xc0] sm:$0xff]   ;;  %v298_v10 = vld [vmem:[#allocation2 + $0x18] sm:$0xff] }
  0x2f   : > { %v1065_v35 = vld [vmem:[%s1194_s7 + $0x8] sm:$0xff]   ;;  %v1069_v39 = vld [vmem:[%s1194_s7] sm:$0xff]  }
  0x30   : > { %947 = vmatpush3.bf16.msra.mxu0 %v1049_v19  ;;  %v1066_v36 = vld [vmem:[%s1194_s7 + $0x88] sm:$0xff]   ;;  %v1070_v40 = vld [vmem:[%s1194_s7 + $0x80] sm:$0xff]  }
  0x31   : > { %975 = vmatpush3.bf16.msra.mxu1 %v1050_v20  ;;  %948 = vmatprep.subr.bf16.mxu0 %v1051_v21  ;;  %v1071_v41 = vld [vmem:[%s1196_s8] ss:$16 sps:$4 sm:$0xff]   ;;  %v1073_v42 = vld [vmem:[%s1196_s8 + $0x4] ss:$16 sps:$4 sm:$0xff]   ;;  %v1074_v43 = vld [vmem:[%s1196_s8 + $0x8] ss:$16 sps:$4 sm:$0xff]  }
  0x32   : > { %976 = vmatprep.subr.bf16.mxu1 %v1052_v22  ;;  %v1076_v44 = vld [vmem:[%s1196_s8 + $0xc] ss:$16 sps:$4 sm:$0xff]   ;;  %636 = vmatprep.mubr.bf16.mxu0 %v1073_v42  ;;  %v1077_v45 = vld [vmem:[%s1196_s8 + $0x24] ss:$16 sps:$4 sm:$0xff]   ;;  %v1081_v47 = vld [vmem:[%s1196_s8 + $0x20] ss:$16 sps:$4 sm:$0xff]  }
  0x33   : > { %685 = vmatprep.mubr.bf16.mxu1 %v1076_v44  ;;  %v1079_v46 = vld [vmem:[%s1196_s8 + $0x2c] ss:$16 sps:$4 sm:$0xff]   ;;  %v1082_v48 = vld [vmem:[%s1196_s8 + $0x28] ss:$16 sps:$4 sm:$0xff]   ;;  %v297_v1 = vld [vmem:[#allocation2] sm:$0xff] }
  0x34   : > { %949 = vmatpush3.bf16.msra.mxu0 %v1053_v23  ;;  %v299_v18 = vld [vmem:[#allocation2 + $0x8] sm:$0xff] }
  0x35   : > { %977 = vmatpush3.bf16.msra.mxu1 %v1054_v24  ;;  %950 = vmatprep.subr.bf16.mxu0 %v1055_v25 }
  0x36   : > { %978 = vmatprep.subr.bf16.mxu1 %v1056_v26 }
  0x38   : > { %951 = vmatpush3.bf16.msra.mxu0 %v1057_v27 }
  0x39   : > { %979 = vmatpush3.bf16.msra.mxu1 %v1058_v28  ;;  %952 = vmatprep.subr.bf16.mxu0 %v1059_v29 }
  0x3a   : > { %980 = vmatprep.subr.bf16.mxu1 %v1060_v30 }
  0x3c   : > { %953 = vmatpush3.bf16.msra.mxu0 %v1061_v31 }
  0x3d   : > { %981 = vmatpush3.bf16.msra.mxu1 %v1062_v32  ;;  %954 = vmatprep.subr.bf16.mxu0 %v1063_v33 }
  0x3e   : > { %982 = vmatprep.subr.bf16.mxu1 %v1064_v34 }
  0x40   : > { %955 = vmatpush3.bf16.msra.mxu0 %v1065_v35 }
  0x41   : > { %983 = vmatpush3.bf16.msra.mxu1 %v1066_v36  ;;  %956 = vmatprep.subr.bf16.mxu0 %v1067_v37 }
  0x42   : > { %984 = vmatprep.subr.bf16.mxu1 %v1068_v38 }
  0x44   : > { %957 = vmatpush3.bf16.msra.mxu0 %v1069_v39 }
  0x45   : > { %985 = vmatpush3.bf16.msra.mxu1 %v1070_v40 }
  0x47   : > { %637 = vmatmul.mubr.bf16.vlgmr.msra.gmra.mxu0 %v1071_v41 }
  0x48   : > { %686 = vmatmul.mubr.bf16.vlgmr.msra.gmra.mxu1 %v1074_v43  ;;  %644 = vmatprep.mubr.bf16.mxu0 %v1077_v45 }
  0x49   : > { %693 = vmatprep.mubr.bf16.mxu1 %v1079_v46 }
  0x4f   : > { %645 = vmatmul.mubr.bf16.gmra.mxu0 %v1081_v47 }
  0x50   : > { %694 = vmatmul.mubr.bf16.gmra.mxu1 %v1082_v48 }
 0x107   : > { %v958_v49 = vpop.f32.mrf.mxu0 }
 0x108   : > { %v986_v50 = vpop.f32.mrf.mxu1 }
 0x109   : > { %v959_v51 = vpop.f32.mrf.mxu0 }
 0x10a   : > { %v960_v52 = vadd.f32 %v959_v51, %v958_v49  ;;  %v987_v53 = vpop.f32.mrf.mxu1 }
 0x10b   : > { %v988_v54 = vadd.f32 %v987_v53, %v986_v50  ;;  %v961_v55 = vpop.f32.mrf.mxu0 }
 0x10c   : > { %v989_v57 = vpop.f32.mrf.mxu1 }
 0x10d   : > { %v688_v58 = vadd.f32 %v988_v54, %v960_v52  ;;  %v962_v59 = vpop.f32.mrf.mxu0 }
 0x10e   : > { %v963_v60 = vadd.f32 %v962_v59, %v961_v55  ;;  %v990_v61 = vpop.f32.mrf.mxu1 }
 0x10f   : > { %v702_v62 = vadd.f32 %v688_v58, %v296_v56  ;;  %v991_v63 = vadd.f32 %v990_v61, %v989_v57  ;;  %v964_v0 = vpop.f32.mrf.mxu0 }
 0x110   : > { %v992_v2 = vpop.f32.mrf.mxu1 }
 0x111   : > { %706 = vst [vmem:[#allocation2 + $0x10] sm:$0xff] %v702_v62  ;;  %v691_v3 = vadd.f32 %v991_v63, %v963_v60  ;;  %v965_v4 = vpop.f32.mrf.mxu0 }
 0x112   : > { %v966_v5 = vadd.f32 %v965_v4, %v964_v0  ;;  %v993_v6 = vpop.f32.mrf.mxu1 }
 0x113   : > { %v703_v7 = vadd.f32 %v691_v3, %v297_v1  ;;  %v994_v8 = vadd.f32 %v993_v6, %v992_v2  ;;  %v967_v9 = vpop.f32.mrf.mxu0 }
 0x114   : > { %v995_v11 = vpop.f32.mrf.mxu1 }
 0x115   : > { %707 = vst [vmem:[#allocation2] sm:$0xff] %v703_v7  ;;  %v696_v12 = vadd.f32 %v994_v8, %v966_v5  ;;  %v968_v13 = vpop.f32.mrf.mxu0 }
 0x116   : > { %v969_v14 = vadd.f32 %v968_v13, %v967_v9  ;;  %v996_v15 = vpop.f32.mrf.mxu1 }
 0x117   : > { %v704_v16 = vadd.f32 %v696_v12, %v298_v10  ;;  %v997_v17 = vadd.f32 %v996_v15, %v995_v11 }
 0x119   : > { %708 = vst [vmem:[#allocation2 + $0x18] sm:$0xff] %v704_v16  ;;  %v699_v19 = vadd.f32 %v997_v17, %v969_v14  ;;  %713 = sbr.rel (%p916_p11) target bundleno = 300 (0x12c), region = 63 }
 0x11b   : > { %v705_v20 = vadd.f32 %v699_v19, %v299_v18 }
 0x11d   : > { %709 = vst [vmem:[#allocation2 + $0x8] sm:$0xff] %v705_v20 }
 0x11e   : > { %v714_v21 = vld [vmem:[#allocation2 + $0x10] sm:$0xff]  ;;  %v715_v22 = vld [vmem:[#allocation2] sm:$0xff] }
 0x11f   : > { %v917_v23 = vld [vmem:[%s1266_s2] ss:$0 sm:$0xff] }
 0x120   : > { %v725_v24 = vadd.f32 %v917_v23, %v714_v21  ;;  %v726_v25 = vadd.f32 %v917_v23, %v715_v22  ;;  %v716_v26 = vld [vmem:[#allocation2 + $0x18] sm:$0xff] }
 0x121   : > { %v727_v28 = vadd.f32 %v917_v23, %v716_v26 }
 0x122   : > { %v729_v30 = vmax.f32 %v725_v24, 0.0  ;;  %v730_v31 = vmax.f32 %v726_v25, 0.0 }
 0x123   : > { %v731_v32 = vmax.f32 %v727_v28, 0.0 }
 0x124   : > { %v717_v27 = vld [vmem:[#allocation2 + $0x8] sm:$0xff]  ;;  %v934_v34 = vpack.c.bf16 %v730_v31, %v729_v30 }
 0x125   : > { %v728_v29 = vadd.f32 %v917_v23, %v717_v27 }
 0x126   : > { %935 = vst [vmem:[%s1267_s3] sm:$0xff] %v934_v34  }
 0x127   : > { %v732_v33 = vmax.f32 %v728_v29, 0.0 }
 0x129   : > { %v939_v35 = vpack.c.bf16 %v732_v33, %v731_v32 }
 0x12b   : > { %941 = vst [vmem:[%s1267_s3 + $0x8] sm:$0xff] %v939_v35  }
 0x12c PF: > { %s13_s16 = sadd.s32 1, %s1121_s16   ;;  %s1268_s12 = smov %s1109_s13 }
 0x12d   : > { %p10_p12 = scmp.ge.s32.totalorder %s13_s16, 6   ;;  %s1269_s13 = smov %s1179_s20 }
 0x12e   : > { %s1270_s14 = smov %s1117_s15  ;;  %s1271_s15 = smov %s1273_s17 }
 0x12f   :  { %12 = sbr.rel (!%p10_p12) target bundleno = 3 (0x3), region = 104 }

// kernel: hypernetwork_forward.21
= control target key start
LH: loop header
LB: loop body
LE: loop exit
PB: predicated region body
PF: predicated region fallthrough
CT: control target
= control target key end

     0   :  { %s942_s12 = smov 0   ;;  %s944_s13 = smov 0   ;;  %s1025_s0 = inlined_call_operand.vmem [shape: bf16[8,2048], index: 0, kind: input, shape index: {}]   ;;  %s1026_s1 = inlined_call_operand.vmem [shape: bf16[2048,128], index: 1, kind: input, shape index: {}]   ;;  %s1027_s2 = inlined_call_operand.vmem [shape: f32[1,128], index: 2, kind: input, shape index: {}]   ;;  %s1028_s3 = inlined_call_operand.vmem [shape: bf16[8,128], index: 3, kind: output, shape index: {}]  }
   0x1   :  { %s946_s14 = smov 0  }
   0x2 LB: > { %s25_s15 = sadd.s32 1, %s915_s13  ;;  %p745_p0 = scmp.ge.s32.totalorder %s919_s14, 1  ;;  %s919_s14 = sphi %s946_s14, %s13_s14   ;;  %s915_s13 = sphi %s944_s13, %s1030_s13   ;;  %s911_s12 = sphi %s942_s12, %s1029_s12  }
   0x3   : > { %p26_p1 = scmp.ge.s32.totalorder %s25_s15, 4  ;;  %p189_p2 = scmp.lt.s32.totalorder %s919_s14, 5 }
   0x5   : > { %s1032_s15 = smov (%p26_p1, %s25_s15), 0  ;;  %p190_p3 = pnand %p745_p0, %p189_p2 }
   0x6   : > { %s746_s16 = sshll.u32 (!%p190_p3), %s911_s12, 2  ;;  %s748_s17 = sshll.u32 (!%p190_p3), %s911_s12, 6 }
   0x7   : > { %193 = sbr.rel (%p190_p3) target bundleno = 273 (0x111), region = 32  ;;  %p233_p4 = scmp.lt.s32.totalorder (!%p190_p3), %s746_s16, 15 }
   0x8   : > { %p241_p5 = scmp.lt.s32.totalorder (!%p190_p3), %s748_s17, 255  ;;  %p750_p6 = scmp.ne.s32.totalorder (!%p190_p3), %s911_s12, 0 }
   0xc   : > { %s1034_s16 = smov (!%p233_p4, %s746_s16), 15  ;;  %s1036_s17 = smov (!%p241_p5, %s748_s17), 255 }
   0xd   : > { %s747_s18 = sshll.u32 %s1034_s16, 2  ;;  %s749_s22 = sshll.u32 %s1036_s17, 2 }
   0xe   : > { %s967_s21 = scalar_lea.vmem %s1025_s0, %s747_s18  ;;  %s972_s25 = scalar_lea.vmem %s1026_s1, %s749_s22 }
   0xf   : > { %263 = sbr.rel (%p750_p6) target bundleno = 22 (0x16), region = 36 }
  0x14   : > { %v921_v0 = vmov 0.0  }
  0x15   : > { %264 = vst [vmem:[#allocation2] sm:$0xff] %v921_v0 }
  0x16 PF: > { %v861_v1 = vld [vmem:[%s972_s25 + $0x78] sm:$0xff]   ;;  %v865_v5 = vld [vmem:[%s972_s25 + $0x70] sm:$0xff]   ;;  %v869_v9 = vld [vmem:[%s972_s25 + $0x68] sm:$0xff]   ;;  %p787_p7 = scmp.ne.s32.totalorder %s911_s12, 3 }
  0x17   : > { %v862_v2 = vld [vmem:[%s972_s25 + $0xf8] sm:$0xff]   ;;  %792 = vmatprep.subr.bf16.mxu0 %v861_v1  ;;  %v866_v6 = vld [vmem:[%s972_s25 + $0xf0] sm:$0xff]   ;;  %v870_v10 = vld [vmem:[%s972_s25 + $0xe8] sm:$0xff]  }
  0x18   : > { %v863_v3 = vld [vmem:[%s972_s25 + $0x38] sm:$0xff]   ;;  %814 = vmatprep.subr.bf16.mxu1 %v862_v2  ;;  %v867_v7 = vld [vmem:[%s972_s25 + $0x30] sm:$0xff]   ;;  %v871_v11 = vld [vmem:[%s972_s25 + $0x28] sm:$0xff]  }
  0x19   : > { %v864_v4 = vld [vmem:[%s972_s25 + $0xb8] sm:$0xff]   ;;  %793 = vmatpush3.bf16.msra.mxu0 %v863_v3  ;;  %v868_v8 = vld [vmem:[%s972_s25 + $0xb0] sm:$0xff]   ;;  %v872_v12 = vld [vmem:[%s972_s25 + $0xa8] sm:$0xff]  }
  0x1a   : > { %815 = vmatpush3.bf16.msra.mxu1 %v864_v4  ;;  %794 = vmatprep.subr.bf16.mxu0 %v865_v5  ;;  %v873_v13 = vld [vmem:[%s972_s25 + $0x60] sm:$0xff]   ;;  %v877_v17 = vld [vmem:[%s972_s25 + $0x58] sm:$0xff]   ;;  %v881_v21 = vld [vmem:[%s972_s25 + $0x50] sm:$0xff]  }
  0x1b   : > { %816 = vmatprep.subr.bf16.mxu1 %v866_v6  ;;  %v874_v14 = vld [vmem:[%s972_s25 + $0xe0] sm:$0xff]   ;;  %v878_v18 = vld [vmem:[%s972_s25 + $0xd8] sm:$0xff]   ;;  %v882_v22 = vld [vmem:[%s972_s25 + $0xd0] sm:$0xff]  }
  0x1c   : > { %v875_v15 = vld [vmem:[%s972_s25 + $0x20] sm:$0xff]   ;;  %v879_v19 = vld [vmem:[%s972_s25 + $0x18] sm:$0xff]   ;;  %v883_v23 = vld [vmem:[%s972_s25 + $0x10] sm:$0xff]  }
  0x1d   : > { %795 = vmatpush3.bf16.msra.mxu0 %v867_v7  ;;  %v876_v16 = vld [vmem:[%s972_s25 + $0xa0] sm:$0xff]   ;;  %v880_v20 = vld [vmem:[%s972_s25 + $0x98] sm:$0xff]   ;;  %v884_v24 = vld [vmem:[%s972_s25 + $0x90] sm:$0xff]  }
  0x1e   : > { %817 = vmatpush3.bf16.msra.mxu1 %v868_v8  ;;  %796 = vmatprep.subr.bf16.mxu0 %v869_v9  ;;  %v885_v25 = vld [vmem:[%s972_s25 + $0x48] sm:$0xff]   ;;  %v889_v29 = vld [vmem:[%s972_s25 + $0x40] sm:$0xff]  }
  0x1f   : > { %818 = vmatprep.subr.bf16.mxu1 %v870_v10  ;;  %v886_v26 = vld [vmem:[%s972_s25 + $0xc8] sm:$0xff]   ;;  %v890_v30 = vld [vmem:[%s972_s25 + $0xc0] sm:$0xff]  }
  0x20   : > { %v887_v27 = vld [vmem:[%s972_s25 + $0x8] sm:$0xff]   ;;  %v891_v31 = vld [vmem:[%s972_s25] sm:$0xff]  }
  0x21   : > { %797 = vmatpush3.bf16.msra.mxu0 %v871_v11  ;;  %v888_v28 = vld [vmem:[%s972_s25 + $0x88] sm:$0xff]   ;;  %v892_v32 = vld [vmem:[%s972_s25 + $0x80] sm:$0xff]  }
  0x22   : > { %819 = vmatpush3.bf16.msra.mxu1 %v872_v12  ;;  %798 = vmatprep.subr.bf16.mxu0 %v873_v13  ;;  %v266_v33 = vld [vmem:[%s967_s21] sm:$0xff]  ;;  %v267_v34 = vld [vmem:[%s967_s21 + $0x8] sm:$0xff] }
  0x23   : > { %820 = vmatprep.subr.bf16.mxu1 %v874_v14  ;;  %v751_v35 = vcombine.low %v266_v33, %v266_v33  ;;  %v752_v36 = vcombine.high %v266_v33, %v266_v33  ;;  %v753_v37 = vcombine.low %v267_v34, %v267_v34  ;;  %v754_v38 = vcombine.high %v267_v34, %v267_v34  ;;  %v265_v45 = vld [vmem:[#allocation2] sm:$0xff] }
  0x25   : > { %799 = vmatpush3.bf16.msra.mxu0 %v875_v15  ;;  %570 = vmatprep.mubr.bf16.mxu0 %v752_v36 }
  0x26   : > { %821 = vmatpush3.bf16.msra.mxu1 %v876_v16  ;;  %800 = vmatprep.subr.bf16.mxu0 %v877_v17 }
  0x27   : > { %822 = vmatprep.subr.bf16.mxu1 %v878_v18  ;;  %610 = vmatprep.mubr.bf16.mxu1 %v754_v38 }
  0x29   : > { %801 = vmatpush3.bf16.msra.mxu0 %v879_v19 }
  0x2a   : > { %823 = vmatpush3.bf16.msra.mxu1 %v880_v20  ;;  %802 = vmatprep.subr.bf16.mxu0 %v881_v21 }
  0x2b   : > { %824 = vmatprep.subr.bf16.mxu1 %v882_v22 }
  0x2d   : > { %803 = vmatpush3.bf16.msra.mxu0 %v883_v23 }
  0x2e   : > { %825 = vmatpush3.bf16.msra.mxu1 %v884_v24  ;;  %804 = vmatprep.subr.bf16.mxu0 %v885_v25 }
  0x2f   : > { %826 = vmatprep.subr.bf16.mxu1 %v886_v26 }
  0x31   : > { %805 = vmatpush3.bf16.msra.mxu0 %v887_v27 }
  0x32   : > { %827 = vmatpush3.bf16.msra.mxu1 %v888_v28  ;;  %806 = vmatprep.subr.bf16.mxu0 %v889_v29 }
  0x33   : > { %828 = vmatprep.subr.bf16.mxu1 %v890_v30 }
  0x35   : > { %807 = vmatpush3.bf16.msra.mxu0 %v891_v31 }
  0x36   : > { %829 = vmatpush3.bf16.msra.mxu1 %v892_v32 }
  0x38   : > { %571 = vmatmul.mubr.bf16.vlgmr.msra.gmra.mxu0 %v751_v35 }
  0x39   : > { %611 = vmatmul.mubr.bf16.vlgmr.msra.gmra.mxu1 %v753_v37 }
  0xf8   : > { %v808_v39 = vpop.f32.mrf.mxu0 }
  0xf9   : > { %v830_v40 = vpop.f32.mrf.mxu1 }
  0xfa   : > { %v809_v41 = vpop.f32.mrf.mxu0 }
  0xfb   : > { %v831_v42 = vpop.f32.mrf.mxu1  ;;  %v810_v43 = vadd.f32 %v809_v41, %v808_v39 }
  0xfc   : > { %v832_v44 = vadd.f32 %v831_v42, %v830_v40  ;;  %v811_v46 = vpop.f32.mrf.mxu0 }
  0xfd   : > { %v833_v47 = vpop.f32.mrf.mxu1 }
  0xfe   : > { %v613_v48 = vadd.f32 %v832_v44, %v810_v43  ;;  %v812_v49 = vpop.f32.mrf.mxu0  ;;  %623 = sbr.rel (%p787_p7) target bundleno = 273 (0x111), region = 40 }
  0xff   : > { %v834_v50 = vpop.f32.mrf.mxu1 }
 0x100   : > { %v618_v51 = vadd.f32 %v613_v48, %v265_v45 }
 0x102   : > { %619 = vst [vmem:[#allocation2] sm:$0xff] %v618_v51 }
 0x103   : > { %v788_v53 = vld [vmem:[%s1027_s2] ss:$0 sm:$0xff] }
 0x109   : > { %v624_v52 = vld [vmem:[#allocation2] sm:$0xff] }
 0x10a   : > { %v632_v54 = vadd.f32 %v788_v53, %v624_v52 }
 0x10c   : > { %v633_v55 = vmax.f32 %v632_v54, 0.0 }
 0x10e   : > { %v634_v56 = vpack.c.bf16 %v633_v55, %v633_v55 }
 0x110   : > { %635 = vst [vmem:[%s1028_s3] sm:$0xf] %v634_v56 }
 0x111 PF: > { %s13_s14 = sadd.s32 1, %s919_s14   ;;  %s1029_s12 = smov %s915_s13 }
 0x112   : > { %p10_p8 = scmp.ge.s32.totalorder %s13_s14, 6   ;;  %s1030_s13 = smov %s1032_s15 }
 0x114   :  { %12 = sbr.rel (!%p10_p8) target bundleno = 2 (0x2), region = 76 }

// kernel: hypernetwork_forward.22
= control target key start
LH: loop header
LB: loop body
LE: loop exit
PB: predicated region body
PF: predicated region fallthrough
CT: control target
= control target key end

     0   :  { %s941_s12 = smov 0   ;;  %s943_s13 = smov 0   ;;  %s1024_s0 = inlined_call_operand.vmem [shape: bf16[8,2048], index: 0, kind: input, shape index: {}]   ;;  %s1025_s1 = inlined_call_operand.vmem [shape: bf16[2048,128], index: 1, kind: input, shape index: {}]   ;;  %s1026_s2 = inlined_call_operand.vmem [shape: f32[1,128], index: 2, kind: input, shape index: {}]   ;;  %s1027_s3 = inlined_call_operand.vmem [shape: f32[8,128], index: 3, kind: output, shape index: {}]  }
   0x1   :  { %s945_s14 = smov 0  }
   0x2 LB: > { %s25_s15 = sadd.s32 1, %s914_s13  ;;  %p744_p0 = scmp.ge.s32.totalorder %s918_s14, 1  ;;  %s918_s14 = sphi %s945_s14, %s13_s14   ;;  %s914_s13 = sphi %s943_s13, %s1029_s13   ;;  %s910_s12 = sphi %s941_s12, %s1028_s12  }
   0x3   : > { %p26_p1 = scmp.ge.s32.totalorder %s25_s15, 4  ;;  %p189_p2 = scmp.lt.s32.totalorder %s918_s14, 5 }
   0x5   : > { %s1031_s15 = smov (%p26_p1, %s25_s15), 0  ;;  %p190_p3 = pnand %p744_p0, %p189_p2 }
   0x6   : > { %s745_s16 = sshll.u32 (!%p190_p3), %s910_s12, 2  ;;  %s747_s17 = sshll.u32 (!%p190_p3), %s910_s12, 6 }
   0x7   : > { %193 = sbr.rel (%p190_p3) target bundleno = 271 (0x10f), region = 32  ;;  %p233_p4 = scmp.lt.s32.totalorder (!%p190_p3), %s745_s16, 15 }
   0x8   : > { %p241_p5 = scmp.lt.s32.totalorder (!%p190_p3), %s747_s17, 255  ;;  %p749_p6 = scmp.ne.s32.totalorder (!%p190_p3), %s910_s12, 0 }
   0xc   : > { %s1033_s16 = smov (!%p233_p4, %s745_s16), 15  ;;  %s1035_s17 = smov (!%p241_p5, %s747_s17), 255 }
   0xd   : > { %s746_s18 = sshll.u32 %s1033_s16, 2  ;;  %s748_s22 = sshll.u32 %s1035_s17, 2 }
   0xe   : > { %s966_s21 = scalar_lea.vmem %s1024_s0, %s746_s18  ;;  %s971_s25 = scalar_lea.vmem %s1025_s1, %s748_s22 }
   0xf   : > { %263 = sbr.rel (%p749_p6) target bundleno = 22 (0x16), region = 36 }
  0x14   : > { %v920_v0 = vmov 0.0  }
  0x15   : > { %264 = vst [vmem:[#allocation2] sm:$0xff] %v920_v0 }
  0x16 PF: > { %v860_v1 = vld [vmem:[%s971_s25 + $0x78] sm:$0xff]   ;;  %v864_v5 = vld [vmem:[%s971_s25 + $0x70] sm:$0xff]   ;;  %v868_v9 = vld [vmem:[%s971_s25 + $0x68] sm:$0xff]   ;;  %p786_p7 = scmp.ne.s32.totalorder %s910_s12, 3 }
  0x17   : > { %v861_v2 = vld [vmem:[%s971_s25 + $0xf8] sm:$0xff]   ;;  %791 = vmatprep.subr.bf16.mxu0 %v860_v1  ;;  %v865_v6 = vld [vmem:[%s971_s25 + $0xf0] sm:$0xff]   ;;  %v869_v10 = vld [vmem:[%s971_s25 + $0xe8] sm:$0xff]  }
  0x18   : > { %v862_v3 = vld [vmem:[%s971_s25 + $0x38] sm:$0xff]   ;;  %813 = vmatprep.subr.bf16.mxu1 %v861_v2  ;;  %v866_v7 = vld [vmem:[%s971_s25 + $0x30] sm:$0xff]   ;;  %v870_v11 = vld [vmem:[%s971_s25 + $0x28] sm:$0xff]  }
  0x19   : > { %v863_v4 = vld [vmem:[%s971_s25 + $0xb8] sm:$0xff]   ;;  %792 = vmatpush3.bf16.msra.mxu0 %v862_v3  ;;  %v867_v8 = vld [vmem:[%s971_s25 + $0xb0] sm:$0xff]   ;;  %v871_v12 = vld [vmem:[%s971_s25 + $0xa8] sm:$0xff]  }
  0x1a   : > { %814 = vmatpush3.bf16.msra.mxu1 %v863_v4  ;;  %793 = vmatprep.subr.bf16.mxu0 %v864_v5  ;;  %v872_v13 = vld [vmem:[%s971_s25 + $0x60] sm:$0xff]   ;;  %v876_v17 = vld [vmem:[%s971_s25 + $0x58] sm:$0xff]   ;;  %v880_v21 = vld [vmem:[%s971_s25 + $0x50] sm:$0xff]  }
  0x1b   : > { %815 = vmatprep.subr.bf16.mxu1 %v865_v6  ;;  %v873_v14 = vld [vmem:[%s971_s25 + $0xe0] sm:$0xff]   ;;  %v877_v18 = vld [vmem:[%s971_s25 + $0xd8] sm:$0xff]   ;;  %v881_v22 = vld [vmem:[%s971_s25 + $0xd0] sm:$0xff]  }
  0x1c   : > { %v874_v15 = vld [vmem:[%s971_s25 + $0x20] sm:$0xff]   ;;  %v878_v19 = vld [vmem:[%s971_s25 + $0x18] sm:$0xff]   ;;  %v882_v23 = vld [vmem:[%s971_s25 + $0x10] sm:$0xff]  }
  0x1d   : > { %794 = vmatpush3.bf16.msra.mxu0 %v866_v7  ;;  %v875_v16 = vld [vmem:[%s971_s25 + $0xa0] sm:$0xff]   ;;  %v879_v20 = vld [vmem:[%s971_s25 + $0x98] sm:$0xff]   ;;  %v883_v24 = vld [vmem:[%s971_s25 + $0x90] sm:$0xff]  }
  0x1e   : > { %816 = vmatpush3.bf16.msra.mxu1 %v867_v8  ;;  %795 = vmatprep.subr.bf16.mxu0 %v868_v9  ;;  %v884_v25 = vld [vmem:[%s971_s25 + $0x48] sm:$0xff]   ;;  %v888_v29 = vld [vmem:[%s971_s25 + $0x40] sm:$0xff]  }
  0x1f   : > { %817 = vmatprep.subr.bf16.mxu1 %v869_v10  ;;  %v885_v26 = vld [vmem:[%s971_s25 + $0xc8] sm:$0xff]   ;;  %v889_v30 = vld [vmem:[%s971_s25 + $0xc0] sm:$0xff]  }
  0x20   : > { %v886_v27 = vld [vmem:[%s971_s25 + $0x8] sm:$0xff]   ;;  %v890_v31 = vld [vmem:[%s971_s25] sm:$0xff]  }
  0x21   : > { %796 = vmatpush3.bf16.msra.mxu0 %v870_v11  ;;  %v887_v28 = vld [vmem:[%s971_s25 + $0x88] sm:$0xff]   ;;  %v891_v32 = vld [vmem:[%s971_s25 + $0x80] sm:$0xff]  }
  0x22   : > { %818 = vmatpush3.bf16.msra.mxu1 %v871_v12  ;;  %797 = vmatprep.subr.bf16.mxu0 %v872_v13  ;;  %v266_v33 = vld [vmem:[%s966_s21] sm:$0xff]  ;;  %v267_v34 = vld [vmem:[%s966_s21 + $0x8] sm:$0xff] }
  0x23   : > { %819 = vmatprep.subr.bf16.mxu1 %v873_v14  ;;  %v750_v35 = vcombine.low %v266_v33, %v266_v33  ;;  %v751_v36 = vcombine.high %v266_v33, %v266_v33  ;;  %v752_v37 = vcombine.low %v267_v34, %v267_v34  ;;  %v753_v38 = vcombine.high %v267_v34, %v267_v34  ;;  %v265_v45 = vld [vmem:[#allocation2] sm:$0xff] }
  0x25   : > { %798 = vmatpush3.bf16.msra.mxu0 %v874_v15  ;;  %570 = vmatprep.mubr.bf16.mxu0 %v751_v36 }
  0x26   : > { %820 = vmatpush3.bf16.msra.mxu1 %v875_v16  ;;  %799 = vmatprep.subr.bf16.mxu0 %v876_v17 }
  0x27   : > { %821 = vmatprep.subr.bf16.mxu1 %v877_v18  ;;  %610 = vmatprep.mubr.bf16.mxu1 %v753_v38 }
  0x29   : > { %800 = vmatpush3.bf16.msra.mxu0 %v878_v19 }
  0x2a   : > { %822 = vmatpush3.bf16.msra.mxu1 %v879_v20  ;;  %801 = vmatprep.subr.bf16.mxu0 %v880_v21 }
  0x2b   : > { %823 = vmatprep.subr.bf16.mxu1 %v881_v22 }
  0x2d   : > { %802 = vmatpush3.bf16.msra.mxu0 %v882_v23 }
  0x2e   : > { %824 = vmatpush3.bf16.msra.mxu1 %v883_v24  ;;  %803 = vmatprep.subr.bf16.mxu0 %v884_v25 }
  0x2f   : > { %825 = vmatprep.subr.bf16.mxu1 %v885_v26 }
  0x31   : > { %804 = vmatpush3.bf16.msra.mxu0 %v886_v27 }
  0x32   : > { %826 = vmatpush3.bf16.msra.mxu1 %v887_v28  ;;  %805 = vmatprep.subr.bf16.mxu0 %v888_v29 }
  0x33   : > { %827 = vmatprep.subr.bf16.mxu1 %v889_v30 }
  0x35   : > { %806 = vmatpush3.bf16.msra.mxu0 %v890_v31 }
  0x36   : > { %828 = vmatpush3.bf16.msra.mxu1 %v891_v32 }
  0x38   : > { %571 = vmatmul.mubr.bf16.vlgmr.msra.gmra.mxu0 %v750_v35 }
  0x39   : > { %611 = vmatmul.mubr.bf16.vlgmr.msra.gmra.mxu1 %v752_v37 }
  0xf8   : > { %v807_v39 = vpop.f32.mrf.mxu0 }
  0xf9   : > { %v829_v40 = vpop.f32.mrf.mxu1 }
  0xfa   : > { %v808_v41 = vpop.f32.mrf.mxu0 }
  0xfb   : > { %v830_v42 = vpop.f32.mrf.mxu1  ;;  %v809_v43 = vadd.f32 %v808_v41, %v807_v39 }
  0xfc   : > { %v831_v44 = vadd.f32 %v830_v42, %v829_v40  ;;  %v810_v46 = vpop.f32.mrf.mxu0 }
  0xfd   : > { %v832_v47 = vpop.f32.mrf.mxu1 }
  0xfe   : > { %v613_v48 = vadd.f32 %v831_v44, %v809_v43  ;;  %v811_v49 = vpop.f32.mrf.mxu0  ;;  %623 = sbr.rel (%p786_p7) target bundleno = 271 (0x10f), region = 40 }
  0xff   : > { %v833_v50 = vpop.f32.mrf.mxu1 }
 0x100   : > { %v618_v51 = vadd.f32 %v613_v48, %v265_v45 }
 0x102   : > { %619 = vst [vmem:[#allocation2] sm:$0xff] %v618_v51 }
 0x103   : > { %v787_v53 = vld [vmem:[%s1026_s2] ss:$0 sm:$0xff] }
 0x109   : > { %v624_v52 = vld [vmem:[#allocation2] sm:$0xff] }
 0x10a   : > { %v632_v54 = vadd.f32 %v787_v53, %v624_v52 }
 0x10c   : > { %v633_v55 = vmax.f32 %v632_v54, 0.0 }
 0x10e   : > { %634 = vst [vmem:[%s1027_s3] sm:$0xff] %v633_v55 }
 0x10f PF: > { %s13_s14 = sadd.s32 1, %s918_s14   ;;  %s1028_s12 = smov %s914_s13 }
 0x110   : > { %p10_p8 = scmp.ge.s32.totalorder %s13_s14, 6   ;;  %s1029_s13 = smov %s1031_s15 }
 0x112   :  { %12 = sbr.rel (!%p10_p8) target bundleno = 2 (0x2), region = 76 }

// kernel: hypernetwork_forward.23
= control target key start
LH: loop header
LB: loop body
LE: loop exit
PB: predicated region body
PF: predicated region fallthrough
CT: control target
= control target key end

     0   :  { %s567_s18 = smov 0   ;;  %s610_s0 = inlined_call_operand.vmem [shape: f32[2,32], index: 0, kind: input, shape index: {}]   ;;  %s611_s1 = inlined_call_operand.vmem [shape: f32[16,32,32], index: 1, kind: input, shape index: {}]   ;;  %s612_s2 = inlined_call_operand.vmem [shape: f32[16,1,32], index: 2, kind: input, shape index: {}]   ;;  %s613_s3 = inlined_call_operand.vmem [shape: f32[32,128], index: 3, kind: input, shape index: {}]   ;;  %s614_s4 = inlined_call_operand.vmem [shape: f32[1,128], index: 4, kind: input, shape index: {}]   ;;  %s615_s5 = inlined_call_operand.vmem [shape: f32[16,2,128], index: 5, kind: output, shape index: {}]  }
   0x1 LB: > { %s470_s19 = sadd.s32 4294967295, %s533_s18   ;;  %p474_p0 = scmp.ge.s32.totalorder %s533_s18, 1  ;;  %s533_s18 = sphi %s567_s18, %s15_s18  }
   0x2   : > { %p195_p1 = scmp.lt.s32.totalorder %s533_s18, 17 }
   0x4   : > { %p196_p2 = pnand %p474_p0, %p195_p1 }
   0x5   : > { %p225_p3 = scmp.lt.s32.totalorder (!%p196_p2), %s470_s19, 15 }
   0x6   : > { %199 = sbr.rel (%p196_p2) target bundleno = 413 (0x19d), region = 40 }
   0xb   : > { %v535_v0 = vmov 0.0   ;;  %vm536_vm0 = vmmov 0   ;;  %v326_v1 = vld [vmem:[%s613_s3 + $0x18] sm:$0xff]  ;;  %s617_s19 = smov (!%p225_p3, %s470_s19), 15  ;;  %v325_v2 = vld [vmem:[%s613_s3 + $0x10] sm:$0xff]  ;;  %vm249_vm1 = vcmask 261120  }
   0xc   : > { %495 = vmatprep.subr.mxu0 %v535_v0  ;;  %503 = vmatprep.mubr.msk.f32.mxu0 %vm536_vm0, %v535_v0  ;;  %s484_s24 = sshll.u32 %s617_s19, 5  ;;  %v237_v7 = vld [vmem:[%s610_s0] sm:$0x3]  ;;  %v324_v8 = vld [vmem:[%s613_s3 + $0x8] sm:$0xff]  ;;  %s232_s11 = scalar_lea.vmem %s612_s2, %s617_s19 }
   0xd   : > { %506 = vmatprep.subr.mxu1 %v535_v0  ;;  %514 = vmatprep.mubr.msk.f32.mxu1 %vm536_vm0, %v535_v0  ;;  %s229_s27 = scalar_lea.vmem %s611_s1, %s484_s24  ;;  %v323_v9 = vld [vmem:[%s613_s3] sm:$0xff]  ;;  %s477_s12 = sshll.u32 %s617_s19, 1 }
   0xe   : > { %507 = vmatpush3.msra.mxu1 %v326_v1  ;;  %v241_v3 = vld [vmem:[%s229_s27 + $0x18] sm:$0xff]  ;;  %v240_v4 = vld [vmem:[%s229_s27 + $0x10] sm:$0xff]  ;;  %v239_v5 = vld [vmem:[%s229_s27 + $0x8] sm:$0xff]  ;;  %s236_s17 = scalar_lea.vmem %s615_s5, %s477_s12 }
   0xf   : > { %508 = vmatprep.subr.mxu1 %v535_v0  ;;  %496 = vmatpush3.msra.mxu0 %v241_v3  ;;  %v238_v6 = vld [vmem:[%s229_s27] sm:$0xff] }
  0x10   : > { %509 = vmatpush3.msra.mxu1 %v325_v2  ;;  %497 = vmatprep.subr.mxu0 %v535_v0  ;;  %v478_v10 = vld [vmem:[%s232_s11] ss:$0 sm:$0xff] }
  0x11   : > { %510 = vmatprep.subr.mxu1 %v535_v0  ;;  %498 = vmatpush3.msra.mxu0 %v240_v4  ;;  %v480_v14 = vld [vmem:[%s614_s4] ss:$0 sm:$0xff] }
  0x12   : > { %499 = vmatprep.subr.mxu0 %v535_v0  ;;  %511 = vmatpush3.msra.mxu1 %v324_v8 }
  0x13   : > { %500 = vmatpush3.msra.mxu0 %v239_v5  ;;  %512 = vmatprep.subr.mxu1 %v535_v0 }
  0x14   : > { %501 = vmatprep.subr.mxu0 %v535_v0  ;;  %513 = vmatpush3.msra.mxu1 %v323_v9 }
  0x15   : > { %502 = vmatpush3.msra.mxu0 %v238_v6 }
  0x16   : > { %504 = vmatmul.mubr.msk.f32.vlgmr.msra.gmra.mxu0 %vm249_vm1, %v237_v7 }
  0xd6   : > { %v319_v11 = vpop.f32.mrf.mxu0 }
  0xd7   : > { %v320_v12 = vadd.f32 %v478_v10, %v319_v11 }
  0xd8   : > { %v505_v13 = vpop.f32.mrf.mxu0 }
  0xd9   : > { %515 = vmatmul.mubr.msk.f32.vlgmr.msra.gmra.mxu1 %vm249_vm1, %v320_v12 }
 0x199   : > { %v403_v15 = vpop.f32.mrf.mxu1 }
 0x19a   : > { %v404_v16 = vadd.f32 %v480_v14, %v403_v15 }
 0x19b   : > { %v516_v17 = vpop.f32.mrf.mxu1 }
 0x19c   : > { %407 = vst [vmem:[%s236_s17] sm:$0x3] %v404_v16 }
 0x19d PF: > { %s15_s18 = sadd.s32 1, %s533_s18  }
 0x19e   : > { %p12_p4 = scmp.ge.s32.totalorder %s15_s18, 18  }
 0x1a0   :  { %14 = sbr.rel (!%p12_p4) target bundleno = 1 (0x1), region = 73 }

// kernel: hypernetwork_forward.17
= control target key start
LH: loop header
LB: loop body
LE: loop exit
PB: predicated region body
PF: predicated region fallthrough
CT: control target
= control target key end

     0   :  { %s567_s18 = smov 0   ;;  %s610_s0 = inlined_call_operand.vmem [shape: f32[2,32], index: 0, kind: input, shape index: {}]   ;;  %s611_s1 = inlined_call_operand.vmem [shape: f32[8,32,32], index: 1, kind: input, shape index: {}]   ;;  %s612_s2 = inlined_call_operand.vmem [shape: f32[8,1,32], index: 2, kind: input, shape index: {}]   ;;  %s613_s3 = inlined_call_operand.vmem [shape: f32[32,128], index: 3, kind: input, shape index: {}]   ;;  %s614_s4 = inlined_call_operand.vmem [shape: f32[1,128], index: 4, kind: input, shape index: {}]   ;;  %s615_s5 = inlined_call_operand.vmem [shape: f32[8,2,128], index: 5, kind: output, shape index: {}]  }
   0x1 LB: > { %s470_s19 = sadd.s32 4294967295, %s533_s18   ;;  %p474_p0 = scmp.ge.s32.totalorder %s533_s18, 1  ;;  %s533_s18 = sphi %s567_s18, %s15_s18  }
   0x2   : > { %p195_p1 = scmp.lt.s32.totalorder %s533_s18, 9 }
   0x4   : > { %p196_p2 = pnand %p474_p0, %p195_p1 }
   0x5   : > { %p225_p3 = scmp.lt.s32.totalorder (!%p196_p2), %s470_s19, 7 }
   0x6   : > { %199 = sbr.rel (%p196_p2) target bundleno = 413 (0x19d), region = 40 }
   0xb   : > { %v535_v0 = vmov 0.0   ;;  %vm536_vm0 = vmmov 0   ;;  %v326_v1 = vld [vmem:[%s613_s3 + $0x18] sm:$0xff]  ;;  %s617_s19 = smov (!%p225_p3, %s470_s19), 7  ;;  %v325_v2 = vld [vmem:[%s613_s3 + $0x10] sm:$0xff]  ;;  %vm249_vm1 = vcmask 261120  }
   0xc   : > { %495 = vmatprep.subr.mxu0 %v535_v0  ;;  %503 = vmatprep.mubr.msk.f32.mxu0 %vm536_vm0, %v535_v0  ;;  %s484_s24 = sshll.u32 %s617_s19, 5  ;;  %v237_v7 = vld [vmem:[%s610_s0] sm:$0x3]  ;;  %v324_v8 = vld [vmem:[%s613_s3 + $0x8] sm:$0xff]  ;;  %s232_s11 = scalar_lea.vmem %s612_s2, %s617_s19 }
   0xd   : > { %506 = vmatprep.subr.mxu1 %v535_v0  ;;  %514 = vmatprep.mubr.msk.f32.mxu1 %vm536_vm0, %v535_v0  ;;  %s229_s27 = scalar_lea.vmem %s611_s1, %s484_s24  ;;  %v323_v9 = vld [vmem:[%s613_s3] sm:$0xff]  ;;  %s477_s12 = sshll.u32 %s617_s19, 1 }
   0xe   : > { %507 = vmatpush3.msra.mxu1 %v326_v1  ;;  %v241_v3 = vld [vmem:[%s229_s27 + $0x18] sm:$0xff]  ;;  %v240_v4 = vld [vmem:[%s229_s27 + $0x10] sm:$0xff]  ;;  %v239_v5 = vld [vmem:[%s229_s27 + $0x8] sm:$0xff]  ;;  %s236_s17 = scalar_lea.vmem %s615_s5, %s477_s12 }
   0xf   : > { %508 = vmatprep.subr.mxu1 %v535_v0  ;;  %496 = vmatpush3.msra.mxu0 %v241_v3  ;;  %v238_v6 = vld [vmem:[%s229_s27] sm:$0xff] }
  0x10   : > { %509 = vmatpush3.msra.mxu1 %v325_v2  ;;  %497 = vmatprep.subr.mxu0 %v535_v0  ;;  %v478_v10 = vld [vmem:[%s232_s11] ss:$0 sm:$0xff] }
  0x11   : > { %510 = vmatprep.subr.mxu1 %v535_v0  ;;  %498 = vmatpush3.msra.mxu0 %v240_v4  ;;  %v480_v14 = vld [vmem:[%s614_s4] ss:$0 sm:$0xff] }
  0x12   : > { %499 = vmatprep.subr.mxu0 %v535_v0  ;;  %511 = vmatpush3.msra.mxu1 %v324_v8 }
  0x13   : > { %500 = vmatpush3.msra.mxu0 %v239_v5  ;;  %512 = vmatprep.subr.mxu1 %v535_v0 }
  0x14   : > { %501 = vmatprep.subr.mxu0 %v535_v0  ;;  %513 = vmatpush3.msra.mxu1 %v323_v9 }
  0x15   : > { %502 = vmatpush3.msra.mxu0 %v238_v6 }
  0x16   : > { %504 = vmatmul.mubr.msk.f32.vlgmr.msra.gmra.mxu0 %vm249_vm1, %v237_v7 }
  0xd6   : > { %v319_v11 = vpop.f32.mrf.mxu0 }
  0xd7   : > { %v320_v12 = vadd.f32 %v478_v10, %v319_v11 }
  0xd8   : > { %v505_v13 = vpop.f32.mrf.mxu0 }
  0xd9   : > { %515 = vmatmul.mubr.msk.f32.vlgmr.msra.gmra.mxu1 %vm249_vm1, %v320_v12 }
 0x199   : > { %v403_v15 = vpop.f32.mrf.mxu1 }
 0x19a   : > { %v404_v16 = vadd.f32 %v480_v14, %v403_v15 }
 0x19b   : > { %v516_v17 = vpop.f32.mrf.mxu1 }
 0x19c   : > { %407 = vst [vmem:[%s236_s17] sm:$0x3] %v404_v16 }
 0x19d PF: > { %s15_s18 = sadd.s32 1, %s533_s18  }
 0x19e   : > { %p12_p4 = scmp.ge.s32.totalorder %s15_s18, 10  }
 0x1a0   :  { %14 = sbr.rel (!%p12_p4) target bundleno = 1 (0x1), region = 73 }

</bundles_post_ra>
